<compile_context>
chip_gen: v7x
topology: tpu7x:2x2x1
jax: 0.10.0
libtpu: 0.0.40
codegen_flags: <defaults>
</compile_context>

<pallas_src>
import functools
import math

import jax
import jax.numpy as jnp
import numpy as np
from jax.experimental import pallas as pl
from jax.experimental.pallas import tpu as pltpu

_TWO_PI = 2.0 * math.pi
_INV_TWO_PI = 1.0 / _TWO_PI
_HI = jax.lax.Precision.HIGHEST


def _silu(x):
    return x * jax.nn.sigmoid(x)


# --------------------------------------------------------------------------
# Kernel
# --------------------------------------------------------------------------

def _torus_egnn_kernel(
    feats_i_ref, hi_ref, hj_ref, coors_i_ref, coors_j_ref,
    w_d, eb1, ew2, eb2,                       # edge_mlp (layer-1 split)
    gw, gb,                                   # edge_gate (row form)
    cw1, cb1, cw2, cb2, cw3, cb3,             # coors_mlp (cw3 in row form)
    nw1_f, nw1_m, nb1, nw2, nb2, nw3, nb3,    # node_mlp (layer-1 split)
    node_out_ref, coors_out_ref,
    m_i_acc, coors_acc,
    *, n_valid, n_padded,
):
    j_step = pl.program_id(2)
    last_j = pl.num_programs(2) - 1

    hi = hi_ref[...]              # (bt, ti, H2)  f32   precomputed feats_i @ W_i
    hj = hj_ref[...]              # (bt, tj, H2)  f32   precomputed feats_j @ W_j
    coors_i = coors_i_ref[...]    # (bt, C, ti)   f32
    coors_j = coors_j_ref[...]    # (bt, C, tj)   f32
    bt, ti, h2 = hi.shape
    tj = hj.shape[1]
    n_c = coors_i.shape[1]

    ew2v = ew2[...]
    cdt = ew2v.dtype              # compute dtype of the MXU operands (bf16 / f32)

    @pl.when(j_step == 0)
    def _():
        m_i_acc[...] = jnp.zeros_like(m_i_acc)
        coors_acc[...] = jnp.zeros_like(coors_acc)

    # lane-validity mask over the j tile (only generated when N was padded)
    if n_padded != n_valid:
        lane = jax.lax.broadcasted_iota(jnp.int32, (1, tj), 1)
        j_valid = (j_step * tj + lane) < n_valid            # (1, tj) bool
    else:
        j_valid = None

    # ---- torus-wrapped relative coordinates (C leading, nodes on lanes) ----
    rel = coors_i[:, :, :, None] - coors_j[:, :, None, :]   # (bt, C, ti, tj)
    rel = rel - _TWO_PI * jnp.round(rel * _INV_TWO_PI)
    rel_sq = rel * rel
    rel_dist = rel_sq[:, 0]
    for cc in range(1, n_c):                                # static, tiny C
        rel_dist = rel_dist + rel_sq[:, cc]                 # (bt, ti, tj)

    # ---- edge MLP layer 1, concat-free (projections hoisted to wrapper) ----
    h = hi[:, :, None, :] + hj[:, None, :, :]               # (bt, ti, tj, H2)
    h = h + rel_dist[..., None] * w_d[...] + eb1[...]
    h = _silu(h).reshape(bt * ti * tj, h2).astype(cdt)

    # ---- edge MLP layer 2 + gate (activations / reductions stay f32) ----
    m_f = _silu(jnp.dot(h, ew2v, preferred_element_type=jnp.float32)
                + eb2[...])                                 # (M, H) f32
    gate = jax.nn.sigmoid(jnp.sum(m_f * gw[...], axis=-1, keepdims=True)
                          + gb[...])
    m_f = m_f * gate

    # ---- accumulate m_i NOW (ends the (M, H) live range before coors MLP) ----
    hdim = m_f.shape[-1]
    m_r = m_f.reshape(bt * ti, tj, hdim)
    if j_valid is not None:
        m_r = jnp.where(j_valid.reshape(1, tj, 1), m_r, 0.0)
    m_i_acc[...] += jnp.sum(m_r, axis=1)                    # (bt*ti, H) f32

    m_c = m_f.astype(cdt)                                   # bf16 MXU operand

    # ---- coors MLP (final width-1 projection as a lane reduce) ----
    c1 = _silu(jnp.dot(m_c, cw1[...], preferred_element_type=jnp.float32)
               + cb1[...]).astype(cdt)
    c2 = _silu(jnp.dot(c1, cw2[...], preferred_element_type=jnp.float32)
               + cb2[...])                                  # (M, H2) f32
    coor_w = (jnp.sum(c2 * cw3[...], axis=-1, keepdims=True)
              + cb3[...]).reshape(bt, ti, tj)

    # ---- accumulate coordinate update: sum_j coor_w * rel / (dist + 2pi) ----
    inv_d = pl.reciprocal(rel_dist + _TWO_PI, approx=(cdt != jnp.float32))
    w_over_d = coor_w * inv_d                               # (bt, ti, tj)
    if j_valid is not None:
        w_over_d = jnp.where(j_valid.reshape(1, 1, tj), w_over_d, 0.0)
    upd = jnp.stack(
        [jnp.sum(w_over_d * rel[:, cc], axis=-1) for cc in range(n_c)], axis=1)
    coors_acc[...] += upd                                   # (bt, C, ti)

    # ---- finalize: node MLP + writeback on the last j tile ----
    @pl.when(j_step == last_j)
    def _():
        coors_out_ref[...] = (coors_acc[...] + coors_i).astype(coors_out_ref.dtype)
        fi2 = feats_i_ref[...].reshape(bt * ti, -1)         # (bt*ti, D) f32
        m_i = m_i_acc[...]                                  # (bt*ti, H) f32
        n1 = _silu(
            jnp.dot(fi2.astype(cdt), nw1_f[...], preferred_element_type=jnp.float32)
            + jnp.dot(m_i.astype(cdt), nw1_m[...], preferred_element_type=jnp.float32)
            + nb1[...]).astype(cdt)
        n2 = _silu(jnp.dot(n1, nw2[...], preferred_element_type=jnp.float32)
                   + nb2[...]).astype(cdt)
        node_out = (jnp.dot(n2, nw3[...], preferred_element_type=jnp.float32)
                    + nb3[...] + fi2)
        # TODO(synk): for D << 128 a (B, D, N) lane-dense node_out layout would
        # avoid masked partial stores; traffic is tiny so kept node-major here.
        node_out_ref[...] = node_out.reshape(bt, ti, -1).astype(node_out_ref.dtype)


# --------------------------------------------------------------------------
# Tile / budget selection helpers (generation aware)
# --------------------------------------------------------------------------

def _vmem_limit_bytes():
    cap = 128 * 1024 * 1024
    try:
        info = pltpu.get_tpu_info()
        c = getattr(info, "vmem_capacity_bytes", None)
        if c:
            cap = int(c)
    except Exception:
        pass
    # ~5/8 of physical VMEM: ~40 MiB on v7x (64 MiB), ~80 MiB on v5e/v6e (128 MiB)
    return max(32 * 1024 * 1024, min((cap * 5) // 8, 80 * 1024 * 1024))


def _pick_node_tiles(n):
    """Return (padded N, ti, tj).  Nodes sit on the lane axis of the
    coordinate blocks, so tiled ti/tj must be multiples of 128; small graphs
    run untiled (block == full dim).  No untiled fallback for large N."""
    if n <= 128:
        return n, n, n
    n_pad = -(-n // 128) * 128
    return n_pad, 128, 128


def _pick_batch_tile(b, edges_per_step, hidden, budget_bytes, cdt_bytes):
    """Fold batch elements so per-edge matmuls see >= ~128 rows, capped by an
    estimate of the live per-edge intermediates."""
    want = max(1, -(-128 // edges_per_step))
    per_edge = hidden * (3 * cdt_bytes + 6) + 32   # rough live-intermediate bound
    cap = max(1, budget_bytes // max(1, edges_per_step * per_edge))
    bt = max(1, min(b, want, cap))
    while b % bt:
        bt -= 1
    return bt


# --------------------------------------------------------------------------
# Wrapper
# --------------------------------------------------------------------------

def torus_egnn_forward(feats, coors, params, compute_dtype=jnp.bfloat16):
    B, N, D = feats.shape
    C = coors.shape[-1]
    H2 = params["ew1"].shape[1]
    H = params["ew2"].shape[1]
    cdt = jnp.dtype(compute_dtype)

    # ---- weight layout plumbing (done once, outside the kernel) ----
    ew1 = params["ew1"]                        # (2D+1, H/2)
    w_i, w_j, w_d = ew1[:D], ew1[D:2 * D], ew1[2 * D:2 * D + 1]
    nw1 = params["nw1"]                        # (D+H, H)
    nw1_f, nw1_m = nw1[:D], nw1[D:]
    gw_row = params["gw"].T                    # (1, H)
    cw3_row = params["cw3"].T                  # (1, H/2)

    # hoist the tiny-K per-node layer-1 projections out of the edge loop
    hi_pre = jnp.dot(feats, w_i, precision=_HI)   # (B, N, H/2) f32
    hj_pre = jnp.dot(feats, w_j, precision=_HI)   # (B, N, H/2) f32

    def c(w):
        return w.astype(cdt)

    weights = [
        w_d, params["eb1"], c(params["ew2"]), params["eb2"],
        gw_row, params["gb"],
        c(params["cw1"]), params["cb1"], c(params["cw2"]), params["cb2"],
        cw3_row, params["cb3"],
        c(nw1_f), c(nw1_m), params["nb1"], c(params["nw2"]), params["nb2"],
        c(params["nw3"]), params["nb3"],
    ]

    vmem_limit = _vmem_limit_bytes()
    Np, ti, tj = _pick_node_tiles(N)
    bt = _pick_batch_tile(B, ti * tj, H, vmem_limit // 2, cdt.itemsize)
    # keep >= 2 parallel grid tiles when possible (v7x: 2 TensorCores/chip)
    while bt > 1 and (B // bt) * (Np // ti) < 2:
        bt -= 1
        while B % bt:
            bt -= 1

    if Np != N:
        pad = [(0, 0), (0, Np - N), (0, 0)]
        feats_p = jnp.pad(feats, pad)
        coors_p = jnp.pad(coors, pad)
        hi_p = jnp.pad(hi_pre, pad)
        hj_p = jnp.pad(hj_pre, pad)
    else:
        feats_p, coors_p, hi_p, hj_p = feats, coors, hi_pre, hj_pre
    coors_t = jnp.swapaxes(coors_p, 1, 2)      # (B, C, Np) -- nodes on lanes

    grid = (B // bt, Np // ti, Np // tj)

    def const_map(b, i, j):
        return (0, 0)

    in_specs = [
        pl.BlockSpec((bt, ti, D), lambda b, i, j: (b, i, 0)),    # feats (i rows)
        pl.BlockSpec((bt, ti, H2), lambda b, i, j: (b, i, 0)),   # hi (i rows)
        pl.BlockSpec((bt, tj, H2), lambda b, i, j: (b, j, 0)),   # hj (j rows)
        pl.BlockSpec((bt, C, ti), lambda b, i, j: (b, 0, i)),    # coors_t (i)
        pl.BlockSpec((bt, C, tj), lambda b, i, j: (b, 0, j)),    # coors_t (j)
    ] + [pl.BlockSpec(w.shape, const_map) for w in weights]      # small constants
    # TODO(synk): constant weight blocks could use pipeline_mode=pl.Buffered(1)
    # to drop their second pipeline buffer (small VMEM reclaim).

    out_specs = (
        pl.BlockSpec((bt, ti, D), lambda b, i, j: (b, i, 0)),    # node_out
        pl.BlockSpec((bt, C, ti), lambda b, i, j: (b, 0, i)),    # coors_out (C-major)
    )
    out_shape = (
        jax.ShapeDtypeStruct((B, Np, D), jnp.float32),
        jax.ShapeDtypeStruct((B, C, Np), jnp.float32),
    )

    kernel = functools.partial(_torus_egnn_kernel, n_valid=N, n_padded=Np)

    f = pl.pallas_call(
        kernel,
        grid=grid,
        in_specs=in_specs,
        out_specs=out_specs,
        out_shape=out_shape,
        scratch_shapes=[
            pltpu.VMEM((bt * ti, H), jnp.float32),   # m_i accumulator
            pltpu.VMEM((bt, C, ti), jnp.float32),    # coordinate-update accumulator
        ],
        compiler_params=pltpu.CompilerParams(
            dimension_semantics=("parallel", "parallel", "arbitrary"),
            vmem_limit_bytes=vmem_limit),
    )
    node_out, coors_out_cl = f(feats_p, hi_p, hj_p, coors_t, coors_t, *weights)
    node_out = node_out[:, :N]
    coors_out = jnp.swapaxes(coors_out_cl, 1, 2)[:, :N]
    return node_out, coors_out


# ---------------- parameter init (xavier_normal weights, zero biases) -------

def _xavier_normal(key, fan_in, fan_out):
    std = math.sqrt(2.0 / (fan_in + fan_out))
    # stored as (in, out) so the kernel can do  x @ W + b
    return jax.random.normal(key, (fan_in, fan_out), jnp.float32) * std


def init_params(key, feat_dim, hidden_features):
    H = hidden_features
    D = feat_dim
    dims = {
        # edge_mlp
        "ew1": (2 * D + 1, H // 2), "ew2": (H // 2, H),
        # edge_gate
        "gw": (H, 1),
        # coors_mlp
        "cw1": (H, H), "cw2": (H, H // 2), "cw3": (H // 2, 1),
        # node_mlp
        "nw1": (D + H, H), "nw2": (H, H // 2), "nw3": (H // 2, D),
    }
    params = {}
    keys = jax.random.split(key, len(dims))
    for k, (name, (fi, fo)) in zip(keys, sorted(dims.items())):
        params[name] = _xavier_normal(k, fi, fo)
        params[name.replace("w", "b")] = jnp.zeros((1, fo), jnp.float32)
    return params


# ---------------- pure-JAX reference for verification -----------------------

def ref_forward(feats, coors, p):
    b, n, d = feats.shape

    def lin(x, w, bb):
        return jnp.dot(x, w, precision=_HI) + bb

    rel = coors[:, :, None, :] - coors[:, None, :, :]
    rel = rel - _TWO_PI * jnp.round(rel * _INV_TWO_PI)
    rel_dist = jnp.sum(rel * rel, axis=-1, keepdims=True)

    fi = jnp.broadcast_to(feats[:, :, None, :], (b, n, n, d))
    fj = jnp.broadcast_to(feats[:, None, :, :], (b, n, n, d))
    e = jnp.concatenate([fi, fj, rel_dist], axis=-1)

    h = _silu(lin(e, p["ew1"], p["eb1"]))
    m = _silu(lin(h, p["ew2"], p["eb2"]))
    m = m * jax.nn.sigmoid(lin(m, p["gw"], p["gb"]))

    cw = lin(_silu(lin(_silu(lin(m, p["cw1"], p["cb1"])),
                       p["cw2"], p["cb2"])), p["cw3"], p["cb3"])[..., 0]
    coors_out = jnp.einsum("bij,bijc->bic", cw, rel / (rel_dist + _TWO_PI),
                           precision=_HI) + coors

    m_i = m.sum(axis=-2)
    ni = jnp.concatenate([feats, m_i], axis=-1)
    node_out = lin(_silu(lin(_silu(lin(ni, p["nw1"], p["nb1"])),
                             p["nw2"], p["nb2"])), p["nw3"], p["nb3"]) + feats
    return node_out, coors_out


def _assert_close(actual, desired, tol):
    actual = np.asarray(jax.device_get(actual), np.float64)
    desired = np.asarray(jax.device_get(desired), np.float64)
    scale = max(1.0, float(np.max(np.abs(desired))))
    np.testing.assert_allclose(actual, desired, rtol=tol, atol=tol * scale)


if __name__ == "__main__":
    keys = jax.random.split(jax.random.PRNGKey(0), 6)

    # --- test 1: small graph, single j tile, bf16 compute path --------------
    B, N, D, C, H = 2, 8, 4, 3, 32
    feats = jax.random.normal(keys[0], (B, N, D), jnp.float32)
    coors = jax.random.uniform(keys[1], (B, N, C), jnp.float32,
                               minval=-math.pi, maxval=math.pi)
    params = init_params(keys[2], feat_dim=D, hidden_features=H)

    node_out, coors_out = torus_egnn_forward(feats, coors, params,
                                             compute_dtype=jnp.bfloat16)
    jax.block_until_ready((node_out, coors_out))
    node_ref, coors_ref = ref_forward(feats, coors, params)
    # bf16 MXU operands with f32 accumulation -> relaxed tolerance
    _assert_close(node_out, node_ref, tol=5e-2)
    _assert_close(coors_out, coors_ref, tol=5e-2)

    # --- test 2: N=200 exercises 128x128 tiling, padding mask and multi-tile
    #     accumulation; f32 compute for a tight check of that logic ----------
    B2, N2, D2, C2, Hd2 = 1, 200, 4, 3, 64
    feats2 = jax.random.normal(keys[3], (B2, N2, D2), jnp.float32)
    coors2 = jax.random.uniform(keys[4], (B2, N2, C2), jnp.float32,
                                minval=-math.pi, maxval=math.pi)
    params2 = init_params(keys[5], feat_dim=D2, hidden_features=Hd2)

    node2, coors2_out = torus_egnn_forward(feats2, coors2, params2,
                                           compute_dtype=jnp.float32)
    jax.block_until_ready((node2, coors2_out))
    node2_ref, coors2_ref = ref_forward(feats2, coors2, params2)
    _assert_close(node2, node2_ref, tol=1e-3)
    _assert_close(coors2_out, coors2_ref, tol=1e-3)

    print("KERNEL_OK")
</pallas_src>

<mosaic_0001>
module attributes {stable_mosaic.version = 11 : i64} {
  func.func @_torus_egnn_kernel(%arg0: i32, %arg1: i32, %arg2: i32, %arg3: memref<1x8x4xf32, #tpu.memory_space<vmem>>, %arg4: memref<1x8x16xf32, #tpu.memory_space<vmem>>, %arg5: memref<1x8x16xf32, #tpu.memory_space<vmem>>, %arg6: memref<1x3x8xf32, #tpu.memory_space<vmem>>, %arg7: memref<1x3x8xf32, #tpu.memory_space<vmem>>, %arg8: memref<1x16xf32, #tpu.memory_space<vmem>>, %arg9: memref<1x16xf32, #tpu.memory_space<vmem>>, %arg10: memref<16x32xbf16, #tpu.memory_space<vmem>>, %arg11: memref<1x32xf32, #tpu.memory_space<vmem>>, %arg12: memref<1x32xf32, #tpu.memory_space<vmem>>, %arg13: memref<1x1xf32, #tpu.memory_space<vmem>>, %arg14: memref<32x32xbf16, #tpu.memory_space<vmem>>, %arg15: memref<1x32xf32, #tpu.memory_space<vmem>>, %arg16: memref<32x16xbf16, #tpu.memory_space<vmem>>, %arg17: memref<1x16xf32, #tpu.memory_space<vmem>>, %arg18: memref<1x16xf32, #tpu.memory_space<vmem>>, %arg19: memref<1x1xf32, #tpu.memory_space<vmem>>, %arg20: memref<4x32xbf16, #tpu.memory_space<vmem>>, %arg21: memref<32x32xbf16, #tpu.memory_space<vmem>>, %arg22: memref<1x32xf32, #tpu.memory_space<vmem>>, %arg23: memref<32x16xbf16, #tpu.memory_space<vmem>>, %arg24: memref<1x16xf32, #tpu.memory_space<vmem>>, %arg25: memref<16x4xbf16, #tpu.memory_space<vmem>>, %arg26: memref<1x4xf32, #tpu.memory_space<vmem>>, %arg27: memref<1x8x4xf32, #tpu.memory_space<vmem>>, %arg28: memref<1x3x8xf32, #tpu.memory_space<vmem>>, %arg29: memref<8x32xf32, #tpu.memory_space<vmem>>, %arg30: memref<1x3x8xf32, #tpu.memory_space<vmem>>) attributes {dimension_semantics = [#tpu.dimension_semantics<parallel>, #tpu.dimension_semantics<parallel>, #tpu.dimension_semantics<arbitrary>], iteration_bounds = array<i64: 2, 1, 1>, scalar_prefetch = 0 : i64, scratch_operands = 2 : i64, tpu.core_type = #tpu.core_type<tc>, window_params = [{transform_indices = @transform_0, window_bounds = array<i64: 1, 8, 4>}, {transform_indices = @transform_1, window_bounds = array<i64: 1, 8, 16>}, {transform_indices = @transform_2, window_bounds = array<i64: 1, 8, 16>}, {transform_indices = @transform_3, window_bounds = array<i64: 1, 3, 8>}, {transform_indices = @transform_4, window_bounds = array<i64: 1, 3, 8>}, {pipeline_mode = #tpu.pipeline_mode<synchronous>, transform_indices = @transform_5, window_bounds = array<i64: 1, 16>}, {pipeline_mode = #tpu.pipeline_mode<synchronous>, transform_indices = @transform_6, window_bounds = array<i64: 1, 16>}, {pipeline_mode = #tpu.pipeline_mode<synchronous>, transform_indices = @transform_7, window_bounds = array<i64: 16, 32>}, {pipeline_mode = #tpu.pipeline_mode<synchronous>, transform_indices = @transform_8, window_bounds = array<i64: 1, 32>}, {pipeline_mode = #tpu.pipeline_mode<synchronous>, transform_indices = @transform_9, window_bounds = array<i64: 1, 32>}, {pipeline_mode = #tpu.pipeline_mode<synchronous>, transform_indices = @transform_10, window_bounds = array<i64: 1, 1>}, {pipeline_mode = #tpu.pipeline_mode<synchronous>, transform_indices = @transform_11, window_bounds = array<i64: 32, 32>}, {pipeline_mode = #tpu.pipeline_mode<synchronous>, transform_indices = @transform_12, window_bounds = array<i64: 1, 32>}, {pipeline_mode = #tpu.pipeline_mode<synchronous>, transform_indices = @transform_13, window_bounds = array<i64: 32, 16>}, {pipeline_mode = #tpu.pipeline_mode<synchronous>, transform_indices = @transform_14, window_bounds = array<i64: 1, 16>}, {pipeline_mode = #tpu.pipeline_mode<synchronous>, transform_indices = @transform_15, window_bounds = array<i64: 1, 16>}, {pipeline_mode = #tpu.pipeline_mode<synchronous>, transform_indices = @transform_16, window_bounds = array<i64: 1, 1>}, {pipeline_mode = #tpu.pipeline_mode<synchronous>, transform_indices = @transform_17, window_bounds = array<i64: 4, 32>}, {pipeline_mode = #tpu.pipeline_mode<synchronous>, transform_indices = @transform_18, window_bounds = array<i64: 32, 32>}, {pipeline_mode = #tpu.pipeline_mode<synchronous>, transform_indices = @transform_19, window_bounds = array<i64: 1, 32>}, {pipeline_mode = #tpu.pipeline_mode<synchronous>, transform_indices = @transform_20, window_bounds = array<i64: 32, 16>}, {pipeline_mode = #tpu.pipeline_mode<synchronous>, transform_indices = @transform_21, window_bounds = array<i64: 1, 16>}, {pipeline_mode = #tpu.pipeline_mode<synchronous>, transform_indices = @transform_22, window_bounds = array<i64: 16, 4>}, {pipeline_mode = #tpu.pipeline_mode<synchronous>, transform_indices = @transform_23, window_bounds = array<i64: 1, 4>}, {transform_indices = @transform_24, window_bounds = array<i64: 1, 8, 4>}, {transform_indices = @transform_25, window_bounds = array<i64: 1, 3, 8>}]} {
    %c0 = arith.constant 0 : index
    %c0_0 = arith.constant 0 : index
    %c0_1 = arith.constant 0 : index
    %0 = vector.load %arg4[%c0, %c0_0, %c0_1] : memref<1x8x16xf32, #tpu.memory_space<vmem>>, vector<1x8x16xf32>
    %c0_2 = arith.constant 0 : index
    %c0_3 = arith.constant 0 : index
    %c0_4 = arith.constant 0 : index
    %1 = vector.load %arg5[%c0_2, %c0_3, %c0_4] : memref<1x8x16xf32, #tpu.memory_space<vmem>>, vector<1x8x16xf32>
    %c0_5 = arith.constant 0 : index
    %c0_6 = arith.constant 0 : index
    %c0_7 = arith.constant 0 : index
    %2 = vector.load %arg6[%c0_5, %c0_6, %c0_7] : memref<1x3x8xf32, #tpu.memory_space<vmem>>, vector<1x3x8xf32>
    %c0_8 = arith.constant 0 : index
    %c0_9 = arith.constant 0 : index
    %c0_10 = arith.constant 0 : index
    %3 = vector.load %arg7[%c0_8, %c0_9, %c0_10] : memref<1x3x8xf32, #tpu.memory_space<vmem>>, vector<1x3x8xf32>
    %c0_11 = arith.constant 0 : index
    %c0_12 = arith.constant 0 : index
    %4 = vector.load %arg10[%c0_11, %c0_12] : memref<16x32xbf16, #tpu.memory_space<vmem>>, vector<16x32xbf16>
    %c0_i32 = arith.constant 0 : i32
    %5 = arith.cmpi eq, %arg2, %c0_i32 : i32
    %6 = arith.extui %5 : i1 to i32
    %c0_i32_13 = arith.constant 0 : i32
    %7 = arith.cmpi ne, %6, %c0_i32_13 : i32
    scf.if %7 {
      %cst_64 = arith.constant 0.000000e+00 : f32
      %141 = vector.broadcast %cst_64 : f32 to vector<8x32xf32>
      %c0_65 = arith.constant 0 : index
      %c0_66 = arith.constant 0 : index
      %142 = vector.load %arg29[%c0_65, %c0_66] : memref<8x32xf32, #tpu.memory_space<vmem>>, vector<8x32xf32>
      tpu.vector_store %arg29[%c0_65, %c0_66], %141 {strides = array<i32>} : memref<8x32xf32, #tpu.memory_space<vmem>>, vector<8x32xf32>,
      %cst_67 = arith.constant 0.000000e+00 : f32
      %143 = vector.broadcast %cst_67 : f32 to vector<1x3x8xf32>
      %c0_68 = arith.constant 0 : index
      %c0_69 = arith.constant 0 : index
      %c0_70 = arith.constant 0 : index
      %144 = vector.load %arg30[%c0_68, %c0_69, %c0_70] : memref<1x3x8xf32, #tpu.memory_space<vmem>>, vector<1x3x8xf32>
      tpu.vector_store %arg30[%c0_68, %c0_69, %c0_70], %143 {strides = array<i32>} : memref<1x3x8xf32, #tpu.memory_space<vmem>>, vector<1x3x8xf32>,
    } else {
    }
    %8 = vector.shape_cast %2 : vector<1x3x8xf32> to vector<1x3x8x1xf32>
    %9 = vector.shape_cast %3 : vector<1x3x8xf32> to vector<1x3x1x8xf32>
    %10 = vector.broadcast %8 : vector<1x3x8x1xf32> to vector<1x3x8x8xf32>
    %11 = vector.broadcast %9 : vector<1x3x1x8xf32> to vector<1x3x8x8xf32>
    %12 = arith.subf %10, %11 : vector<1x3x8x8xf32>
    %cst = arith.constant 0.159154937 : f32
    %13 = vector.broadcast %cst : f32 to vector<1x3x8x8xf32>
    %14 = arith.mulf %12, %13 : vector<1x3x8x8xf32>
    %15 = math.roundeven %14 : vector<1x3x8x8xf32>
    %cst_14 = arith.constant 6.28318548 : f32
    %16 = vector.broadcast %cst_14 : f32 to vector<1x3x8x8xf32>
    %17 = arith.mulf %16, %15 : vector<1x3x8x8xf32>
    %18 = arith.subf %12, %17 : vector<1x3x8x8xf32>
    %19 = arith.mulf %18, %18 : vector<1x3x8x8xf32>
    %20 = vector.extract_strided_slice %19 {offsets = [0, 0, 0, 0], sizes = [1, 1, 8, 8], strides = [1, 1, 1, 1]} : vector<1x3x8x8xf32> to vector<1x1x8x8xf32>
    %21 = vector.shape_cast %20 : vector<1x1x8x8xf32> to vector<1x8x8xf32>
    %22 = vector.extract_strided_slice %19 {offsets = [0, 1, 0, 0], sizes = [1, 1, 8, 8], strides = [1, 1, 1, 1]} : vector<1x3x8x8xf32> to vector<1x1x8x8xf32>
    %23 = vector.shape_cast %22 : vector<1x1x8x8xf32> to vector<1x8x8xf32>
    %24 = arith.addf %21, %23 : vector<1x8x8xf32>
    %25 = vector.extract_strided_slice %19 {offsets = [0, 2, 0, 0], sizes = [1, 1, 8, 8], strides = [1, 1, 1, 1]} : vector<1x3x8x8xf32> to vector<1x1x8x8xf32>
    %26 = vector.shape_cast %25 : vector<1x1x8x8xf32> to vector<1x8x8xf32>
    %27 = arith.addf %24, %26 : vector<1x8x8xf32>
    %28 = vector.shape_cast %0 : vector<1x8x16xf32> to vector<1x8x1x16xf32>
    %29 = vector.shape_cast %1 : vector<1x8x16xf32> to vector<1x1x8x16xf32>
    %30 = vector.broadcast %28 : vector<1x8x1x16xf32> to vector<1x8x8x16xf32>
    %31 = vector.broadcast %29 : vector<1x1x8x16xf32> to vector<1x8x8x16xf32>
    %32 = arith.addf %30, %31 : vector<1x8x8x16xf32>
    %33 = vector.shape_cast %27 : vector<1x8x8xf32> to vector<1x8x8x1xf32>
    %c0_15 = arith.constant 0 : index
    %c0_16 = arith.constant 0 : index
    %34 = vector.load %arg8[%c0_15, %c0_16] : memref<1x16xf32, #tpu.memory_space<vmem>>, vector<1x16xf32>
    %35 = vector.shape_cast %34 : vector<1x16xf32> to vector<1x1x1x16xf32>
    %36 = vector.broadcast %33 : vector<1x8x8x1xf32> to vector<1x8x8x16xf32>
    %37 = vector.broadcast %35 : vector<1x1x1x16xf32> to vector<1x8x8x16xf32>
    %38 = arith.mulf %36, %37 : vector<1x8x8x16xf32>
    %39 = arith.addf %32, %38 : vector<1x8x8x16xf32>
    %c0_17 = arith.constant 0 : index
    %c0_18 = arith.constant 0 : index
    %40 = vector.load %arg9[%c0_17, %c0_18] : memref<1x16xf32, #tpu.memory_space<vmem>>, vector<1x16xf32>
    %41 = vector.shape_cast %40 : vector<1x16xf32> to vector<1x1x1x16xf32>
    %42 = vector.broadcast %41 : vector<1x1x1x16xf32> to vector<1x8x8x16xf32>
    %43 = arith.addf %39, %42 : vector<1x8x8x16xf32>
    %44 = arith.negf %43 : vector<1x8x8x16xf32>
    %45 = math.exp %44 : vector<1x8x8x16xf32>
    %cst_19 = arith.constant 1.000000e+00 : f32
    %46 = vector.broadcast %cst_19 : f32 to vector<1x8x8x16xf32>
    %47 = arith.addf %46, %45 : vector<1x8x8x16xf32>
    %48 = arith.divf %46, %47 : vector<1x8x8x16xf32>
    %49 = arith.mulf %43, %48 : vector<1x8x8x16xf32>
    %50 = vector.shape_cast %49 : vector<1x8x8x16xf32> to vector<64x16xf32>
    %51 = arith.truncf %50 : vector<64x16xf32> to vector<64x16xbf16>
    %cst_20 = arith.constant dense<0.000000e+00> : vector<64x32xf32>
    %52 = tpu.matmul %51, %4, %cst_20 {dimension_numbers = #tpu.dot_dimension_numbers<[1], [0], [0], [1], [0, 0, 1, 1], [], []>} : vector<64x16xbf16>, vector<16x32xbf16>, vector<64x32xf32> -> vector<64x32xf32>
    %c0_21 = arith.constant 0 : index
    %c0_22 = arith.constant 0 : index
    %53 = vector.load %arg11[%c0_21, %c0_22] : memref<1x32xf32, #tpu.memory_space<vmem>>, vector<1x32xf32>
    %54 = vector.broadcast %53 : vector<1x32xf32> to vector<64x32xf32>
    %55 = arith.addf %52, %54 : vector<64x32xf32>
    %56 = arith.negf %55 : vector<64x32xf32>
    %57 = math.exp %56 : vector<64x32xf32>
    %cst_23 = arith.constant 1.000000e+00 : f32
    %58 = vector.broadcast %cst_23 : f32 to vector<64x32xf32>
    %59 = arith.addf %58, %57 : vector<64x32xf32>
    %60 = arith.divf %58, %59 : vector<64x32xf32>
    %61 = arith.mulf %55, %60 : vector<64x32xf32>
    %c0_24 = arith.constant 0 : index
    %c0_25 = arith.constant 0 : index
    %62 = vector.load %arg12[%c0_24, %c0_25] : memref<1x32xf32, #tpu.memory_space<vmem>>, vector<1x32xf32>
    %63 = vector.broadcast %62 : vector<1x32xf32> to vector<64x32xf32>
    %64 = arith.mulf %61, %63 : vector<64x32xf32>
    %cst_26 = arith.constant dense<0.000000e+00> : vector<64xf32>
    %65 = vector.multi_reduction <add>, %64, %cst_26 [1] : vector<64x32xf32> to vector<64xf32>
    %66 = vector.shape_cast %65 : vector<64xf32> to vector<64x1xf32>
    %c0_27 = arith.constant 0 : index
    %c0_28 = arith.constant 0 : index
    %67 = vector.load %arg13[%c0_27, %c0_28] : memref<1x1xf32, #tpu.memory_space<vmem>>, vector<1x1xf32>
    %68 = vector.broadcast %67 : vector<1x1xf32> to vector<64x1xf32>
    %69 = arith.addf %66, %68 : vector<64x1xf32>
    %70 = arith.negf %69 : vector<64x1xf32>
    %71 = math.exp %70 : vector<64x1xf32>
    %cst_29 = arith.constant 1.000000e+00 : f32
    %72 = vector.broadcast %cst_29 : f32 to vector<64x1xf32>
    %73 = arith.addf %72, %71 : vector<64x1xf32>
    %74 = arith.divf %72, %73 : vector<64x1xf32>
    %75 = vector.broadcast %74 : vector<64x1xf32> to vector<64x32xf32>
    %76 = arith.mulf %61, %75 : vector<64x32xf32>
    %77 = vector.shape_cast %76 : vector<64x32xf32> to vector<8x8x32xf32>
    %c0_30 = arith.constant 0 : index
    %c0_31 = arith.constant 0 : index
    %78 = vector.load %arg29[%c0_30, %c0_31] : memref<8x32xf32, #tpu.memory_space<vmem>>, vector<8x32xf32>
    %cst_32 = arith.constant dense<0.000000e+00> : vector<8x32xf32>
    %79 = vector.multi_reduction <add>, %77, %cst_32 [1] : vector<8x8x32xf32> to vector<8x32xf32>
    %80 = arith.addf %78, %79 : vector<8x32xf32>
    %c0_33 = arith.constant 0 : index
    %c0_34 = arith.constant 0 : index
    %81 = vector.load %arg29[%c0_33, %c0_34] : memref<8x32xf32, #tpu.memory_space<vmem>>, vector<8x32xf32>
    tpu.vector_store %arg29[%c0_33, %c0_34], %80 {strides = array<i32>} : memref<8x32xf32, #tpu.memory_space<vmem>>, vector<8x32xf32>,
    %82 = arith.truncf %76 : vector<64x32xf32> to vector<64x32xbf16>
    %c0_35 = arith.constant 0 : index
    %c0_36 = arith.constant 0 : index
    %83 = vector.load %arg14[%c0_35, %c0_36] : memref<32x32xbf16, #tpu.memory_space<vmem>>, vector<32x32xbf16>
    %cst_37 = arith.constant dense<0.000000e+00> : vector<64x32xf32>
    %84 = tpu.matmul %82, %83, %cst_37 {dimension_numbers = #tpu.dot_dimension_numbers<[1], [0], [0], [1], [0, 0, 1, 1], [], []>} : vector<64x32xbf16>, vector<32x32xbf16>, vector<64x32xf32> -> vector<64x32xf32>
    %c0_38 = arith.constant 0 : index
    %c0_39 = arith.constant 0 : index
    %85 = vector.load %arg15[%c0_38, %c0_39] : memref<1x32xf32, #tpu.memory_space<vmem>>, vector<1x32xf32>
    %86 = vector.broadcast %85 : vector<1x32xf32> to vector<64x32xf32>
    %87 = arith.addf %84, %86 : vector<64x32xf32>
    %88 = arith.negf %87 : vector<64x32xf32>
    %89 = math.exp %88 : vector<64x32xf32>
    %cst_40 = arith.constant 1.000000e+00 : f32
    %90 = vector.broadcast %cst_40 : f32 to vector<64x32xf32>
    %91 = arith.addf %90, %89 : vector<64x32xf32>
    %92 = arith.divf %90, %91 : vector<64x32xf32>
    %93 = arith.mulf %87, %92 : vector<64x32xf32>
    %94 = arith.truncf %93 : vector<64x32xf32> to vector<64x32xbf16>
    %c0_41 = arith.constant 0 : index
    %c0_42 = arith.constant 0 : index
    %95 = vector.load %arg16[%c0_41, %c0_42] : memref<32x16xbf16, #tpu.memory_space<vmem>>, vector<32x16xbf16>
    %cst_43 = arith.constant dense<0.000000e+00> : vector<64x16xf32>
    %96 = tpu.matmul %94, %95, %cst_43 {dimension_numbers = #tpu.dot_dimension_numbers<[1], [0], [0], [1], [0, 0, 1, 1], [], []>} : vector<64x32xbf16>, vector<32x16xbf16>, vector<64x16xf32> -> vector<64x16xf32>
    %c0_44 = arith.constant 0 : index
    %c0_45 = arith.constant 0 : index
    %97 = vector.load %arg17[%c0_44, %c0_45] : memref<1x16xf32, #tpu.memory_space<vmem>>, vector<1x16xf32>
    %98 = vector.broadcast %97 : vector<1x16xf32> to vector<64x16xf32>
    %99 = arith.addf %96, %98 : vector<64x16xf32>
    %100 = arith.negf %99 : vector<64x16xf32>
    %101 = math.exp %100 : vector<64x16xf32>
    %cst_46 = arith.constant 1.000000e+00 : f32
    %102 = vector.broadcast %cst_46 : f32 to vector<64x16xf32>
    %103 = arith.addf %102, %101 : vector<64x16xf32>
    %104 = arith.divf %102, %103 : vector<64x16xf32>
    %105 = arith.mulf %99, %104 : vector<64x16xf32>
    %c0_47 = arith.constant 0 : index
    %c0_48 = arith.constant 0 : index
    %106 = vector.load %arg18[%c0_47, %c0_48] : memref<1x16xf32, #tpu.memory_space<vmem>>, vector<1x16xf32>
    %107 = vector.broadcast %106 : vector<1x16xf32> to vector<64x16xf32>
    %108 = arith.mulf %105, %107 : vector<64x16xf32>
    %cst_49 = arith.constant dense<0.000000e+00> : vector<64xf32>
    %109 = vector.multi_reduction <add>, %108, %cst_49 [1] : vector<64x16xf32> to vector<64xf32>
    %110 = vector.shape_cast %109 : vector<64xf32> to vector<64x1xf32>
    %c0_50 = arith.constant 0 : index
    %c0_51 = arith.constant 0 : index
    %111 = vector.load %arg19[%c0_50, %c0_51] : memref<1x1xf32, #tpu.memory_space<vmem>>, vector<1x1xf32>
    %112 = vector.broadcast %111 : vector<1x1xf32> to vector<64x1xf32>
    %113 = arith.addf %110, %112 : vector<64x1xf32>
    %114 = vector.shape_cast %113 : vector<64x1xf32> to vector<1x8x8xf32>
    %cst_52 = arith.constant 6.28318548 : f32
    %115 = vector.broadcast %cst_52 : f32 to vector<1x8x8xf32>
    %116 = arith.addf %27, %115 : vector<1x8x8xf32>
    %117 = tpu.reciprocal %116 {approx = true} : vector<1x8x8xf32> -> vector<1x8x8xf32>
    %118 = arith.mulf %114, %117 : vector<1x8x8xf32>
    %119 = vector.extract_strided_slice %18 {offsets = [0, 0, 0, 0], sizes = [1, 1, 8, 8], strides = [1, 1, 1, 1]} : vector<1x3x8x8xf32> to vector<1x1x8x8xf32>
    %120 = vector.shape_cast %119 : vector<1x1x8x8xf32> to vector<1x8x8xf32>
    %121 = arith.mulf %118, %120 : vector<1x8x8xf32>
    %cst_53 = arith.constant dense<0.000000e+00> : vector<1x8xf32>
    %122 = vector.multi_reduction <add>, %121, %cst_53 [2] : vector<1x8x8xf32> to vector<1x8xf32>
    %123 = vector.extract_strided_slice %18 {offsets = [0, 1, 0, 0], sizes = [1, 1, 8, 8], strides = [1, 1, 1, 1]} : vector<1x3x8x8xf32> to vector<1x1x8x8xf32>
    %124 = vector.shape_cast %123 : vector<1x1x8x8xf32> to vector<1x8x8xf32>
    %125 = arith.mulf %118, %124 : vector<1x8x8xf32>
    %cst_54 = arith.constant dense<0.000000e+00> : vector<1x8xf32>
    %126 = vector.multi_reduction <add>, %125, %cst_54 [2] : vector<1x8x8xf32> to vector<1x8xf32>
    %127 = vector.extract_strided_slice %18 {offsets = [0, 2, 0, 0], sizes = [1, 1, 8, 8], strides = [1, 1, 1, 1]} : vector<1x3x8x8xf32> to vector<1x1x8x8xf32>
    %128 = vector.shape_cast %127 : vector<1x1x8x8xf32> to vector<1x8x8xf32>
    %129 = arith.mulf %118, %128 : vector<1x8x8xf32>
    %cst_55 = arith.constant dense<0.000000e+00> : vector<1x8xf32>
    %130 = vector.multi_reduction <add>, %129, %cst_55 [2] : vector<1x8x8xf32> to vector<1x8xf32>
    %131 = vector.shape_cast %122 : vector<1x8xf32> to vector<1x1x8xf32>
    %132 = vector.shape_cast %126 : vector<1x8xf32> to vector<1x1x8xf32>
    %133 = vector.shape_cast %130 : vector<1x8xf32> to vector<1x1x8xf32>
    %134 = tpu.concatenate %131, %132, %133 in 1 : vector<1x1x8xf32>, vector<1x1x8xf32>, vector<1x1x8xf32> -> vector<1x3x8xf32>
    %c0_56 = arith.constant 0 : index
    %c0_57 = arith.constant 0 : index
    %c0_58 = arith.constant 0 : index
    %135 = vector.load %arg30[%c0_56, %c0_57, %c0_58] : memref<1x3x8xf32, #tpu.memory_space<vmem>>, vector<1x3x8xf32>
    %136 = arith.addf %135, %134 : vector<1x3x8xf32>
    %c0_59 = arith.constant 0 : index
    %c0_60 = arith.constant 0 : index
    %c0_61 = arith.constant 0 : index
    %137 = vector.load %arg30[%c0_59, %c0_60, %c0_61] : memref<1x3x8xf32, #tpu.memory_space<vmem>>, vector<1x3x8xf32>
    tpu.vector_store %arg30[%c0_59, %c0_60, %c0_61], %136 {strides = array<i32>} : memref<1x3x8xf32, #tpu.memory_space<vmem>>, vector<1x3x8xf32>,
    %c0_i32_62 = arith.constant 0 : i32
    %138 = arith.cmpi eq, %arg2, %c0_i32_62 : i32
    %139 = arith.extui %138 : i1 to i32
    %c0_i32_63 = arith.constant 0 : i32
    %140 = arith.cmpi ne, %139, %c0_i32_63 : i32
    scf.if %140 {
      %c0_64 = arith.constant 0 : index
      %c0_65 = arith.constant 0 : index
      %c0_66 = arith.constant 0 : index
      %141 = vector.load %arg30[%c0_64, %c0_65, %c0_66] : memref<1x3x8xf32, #tpu.memory_space<vmem>>, vector<1x3x8xf32>
      %142 = arith.addf %141, %2 : vector<1x3x8xf32>
      %c0_67 = arith.constant 0 : index
      %c0_68 = arith.constant 0 : index
      %c0_69 = arith.constant 0 : index
      %143 = vector.load %arg28[%c0_67, %c0_68, %c0_69] : memref<1x3x8xf32, #tpu.memory_space<vmem>>, vector<1x3x8xf32>
      tpu.vector_store %arg28[%c0_67, %c0_68, %c0_69], %142 {strides = array<i32>} : memref<1x3x8xf32, #tpu.memory_space<vmem>>, vector<1x3x8xf32>,
      %c0_70 = arith.constant 0 : index
      %c0_71 = arith.constant 0 : index
      %c0_72 = arith.constant 0 : index
      %144 = vector.load %arg3[%c0_70, %c0_71, %c0_72] : memref<1x8x4xf32, #tpu.memory_space<vmem>>, vector<1x8x4xf32>
      %145 = vector.shape_cast %144 : vector<1x8x4xf32> to vector<8x4xf32>
      %c0_73 = arith.constant 0 : index
      %c0_74 = arith.constant 0 : index
      %146 = vector.load %arg29[%c0_73, %c0_74] : memref<8x32xf32, #tpu.memory_space<vmem>>, vector<8x32xf32>
      %147 = arith.truncf %145 : vector<8x4xf32> to vector<8x4xbf16>
      %c0_75 = arith.constant 0 : index
      %c0_76 = arith.constant 0 : index
      %148 = vector.load %arg20[%c0_75, %c0_76] : memref<4x32xbf16, #tpu.memory_space<vmem>>, vector<4x32xbf16>
      %cst_77 = arith.constant dense<0.000000e+00> : vector<8x32xf32>
      %149 = tpu.matmul %147, %148, %cst_77 {dimension_numbers = #tpu.dot_dimension_numbers<[1], [0], [0], [1], [0, 0, 1, 1], [], []>} : vector<8x4xbf16>, vector<4x32xbf16>, vector<8x32xf32> -> vector<8x32xf32>
      %150 = arith.truncf %146 : vector<8x32xf32> to vector<8x32xbf16>
      %c0_78 = arith.constant 0 : index
      %c0_79 = arith.constant 0 : index
      %151 = vector.load %arg21[%c0_78, %c0_79] : memref<32x32xbf16, #tpu.memory_space<vmem>>, vector<32x32xbf16>
      %cst_80 = arith.constant dense<0.000000e+00> : vector<8x32xf32>
      %152 = tpu.matmul %150, %151, %cst_80 {dimension_numbers = #tpu.dot_dimension_numbers<[1], [0], [0], [1], [0, 0, 1, 1], [], []>} : vector<8x32xbf16>, vector<32x32xbf16>, vector<8x32xf32> -> vector<8x32xf32>
      %153 = arith.addf %149, %152 : vector<8x32xf32>
      %c0_81 = arith.constant 0 : index
      %c0_82 = arith.constant 0 : index
      %154 = vector.load %arg22[%c0_81, %c0_82] : memref<1x32xf32, #tpu.memory_space<vmem>>, vector<1x32xf32>
      %155 = vector.broadcast %154 : vector<1x32xf32> to vector<8x32xf32>
      %156 = arith.addf %153, %155 : vector<8x32xf32>
      %157 = arith.negf %156 : vector<8x32xf32>
      %158 = math.exp %157 : vector<8x32xf32>
      %cst_83 = arith.constant 1.000000e+00 : f32
      %159 = vector.broadcast %cst_83 : f32 to vector<8x32xf32>
      %160 = arith.addf %159, %158 : vector<8x32xf32>
      %161 = arith.divf %159, %160 : vector<8x32xf32>
      %162 = arith.mulf %156, %161 : vector<8x32xf32>
      %163 = arith.truncf %162 : vector<8x32xf32> to vector<8x32xbf16>
      %c0_84 = arith.constant 0 : index
      %c0_85 = arith.constant 0 : index
      %164 = vector.load %arg23[%c0_84, %c0_85] : memref<32x16xbf16, #tpu.memory_space<vmem>>, vector<32x16xbf16>
      %cst_86 = arith.constant dense<0.000000e+00> : vector<8x16xf32>
      %165 = tpu.matmul %163, %164, %cst_86 {dimension_numbers = #tpu.dot_dimension_numbers<[1], [0], [0], [1], [0, 0, 1, 1], [], []>} : vector<8x32xbf16>, vector<32x16xbf16>, vector<8x16xf32> -> vector<8x16xf32>
      %c0_87 = arith.constant 0 : index
      %c0_88 = arith.constant 0 : index
      %166 = vector.load %arg24[%c0_87, %c0_88] : memref<1x16xf32, #tpu.memory_space<vmem>>, vector<1x16xf32>
      %167 = vector.broadcast %166 : vector<1x16xf32> to vector<8x16xf32>
      %168 = arith.addf %165, %167 : vector<8x16xf32>
      %169 = arith.negf %168 : vector<8x16xf32>
      %170 = math.exp %169 : vector<8x16xf32>
      %cst_89 = arith.constant 1.000000e+00 : f32
      %171 = vector.broadcast %cst_89 : f32 to vector<8x16xf32>
      %172 = arith.addf %171, %170 : vector<8x16xf32>
      %173 = arith.divf %171, %172 : vector<8x16xf32>
      %174 = arith.mulf %168, %173 : vector<8x16xf32>
      %175 = arith.truncf %174 : vector<8x16xf32> to vector<8x16xbf16>
      %c0_90 = arith.constant 0 : index
      %c0_91 = arith.constant 0 : index
      %176 = vector.load %arg25[%c0_90, %c0_91] : memref<16x4xbf16, #tpu.memory_space<vmem>>, vector<16x4xbf16>
      %cst_92 = arith.constant dense<0.000000e+00> : vector<8x4xf32>
      %177 = tpu.matmul %175, %176, %cst_92 {dimension_numbers = #tpu.dot_dimension_numbers<[1], [0], [0], [1], [0, 0, 1, 1], [], []>} : vector<8x16xbf16>, vector<16x4xbf16>, vector<8x4xf32> -> vector<8x4xf32>
      %c0_93 = arith.constant 0 : index
      %c0_94 = arith.constant 0 : index
      %178 = vector.load %arg26[%c0_93, %c0_94] : memref<1x4xf32, #tpu.memory_space<vmem>>, vector<1x4xf32>
      %179 = vector.broadcast %178 : vector<1x4xf32> to vector<8x4xf32>
      %180 = arith.addf %177, %179 : vector<8x4xf32>
      %181 = arith.addf %180, %145 : vector<8x4xf32>
      %182 = vector.shape_cast %181 : vector<8x4xf32> to vector<1x8x4xf32>
      %c0_95 = arith.constant 0 : index
      %c0_96 = arith.constant 0 : index
      %c0_97 = arith.constant 0 : index
      %183 = vector.load %arg27[%c0_95, %c0_96, %c0_97] : memref<1x8x4xf32, #tpu.memory_space<vmem>>, vector<1x8x4xf32>
      tpu.vector_store %arg27[%c0_95, %c0_96, %c0_97], %182 {strides = array<i32>} : memref<1x8x4xf32, #tpu.memory_space<vmem>>, vector<1x8x4xf32>,
    } else {
    }
    return
  }
  func.func @transform_0(%arg0: i32, %arg1: i32, %arg2: i32) -> (i32, i32, i32) {
    %c0_i32 = arith.constant 0 : i32
    %c0_i32_0 = arith.constant 0 : i32
    return %arg0, %arg1, %c0_i32 : i32, i32, i32
  }
  func.func @transform_1(%arg0: i32, %arg1: i32, %arg2: i32) -> (i32, i32, i32) {
    %c0_i32 = arith.constant 0 : i32
    %c0_i32_0 = arith.constant 0 : i32
    return %arg0, %arg1, %c0_i32 : i32, i32, i32
  }
  func.func @transform_2(%arg0: i32, %arg1: i32, %arg2: i32) -> (i32, i32, i32) {
    %c0_i32 = arith.constant 0 : i32
    %c0_i32_0 = arith.constant 0 : i32
    return %arg0, %arg2, %c0_i32 : i32, i32, i32
  }
  func.func @transform_3(%arg0: i32, %arg1: i32, %arg2: i32) -> (i32, i32, i32) {
    %c0_i32 = arith.constant 0 : i32
    %c0_i32_0 = arith.constant 0 : i32
    return %arg0, %c0_i32, %arg1 : i32, i32, i32
  }
  func.func @transform_4(%arg0: i32, %arg1: i32, %arg2: i32) -> (i32, i32, i32) {
    %c0_i32 = arith.constant 0 : i32
    %c0_i32_0 = arith.constant 0 : i32
    return %arg0, %c0_i32, %arg2 : i32, i32, i32
  }
  func.func @transform_5(%arg0: i32, %arg1: i32, %arg2: i32) -> (i32, i32) {
    %c0_i32 = arith.constant 0 : i32
    %c0_i32_0 = arith.constant 0 : i32
    %c0_i32_1 = arith.constant 0 : i32
    return %c0_i32, %c0_i32_0 : i32, i32
  }
  func.func @transform_6(%arg0: i32, %arg1: i32, %arg2: i32) -> (i32, i32) {
    %c0_i32 = arith.constant 0 : i32
    %c0_i32_0 = arith.constant 0 : i32
    %c0_i32_1 = arith.constant 0 : i32
    return %c0_i32, %c0_i32_0 : i32, i32
  }
  func.func @transform_7(%arg0: i32, %arg1: i32, %arg2: i32) -> (i32, i32) {
    %c0_i32 = arith.constant 0 : i32
    %c0_i32_0 = arith.constant 0 : i32
    %c0_i32_1 = arith.constant 0 : i32
    return %c0_i32, %c0_i32_0 : i32, i32
  }
  func.func @transform_8(%arg0: i32, %arg1: i32, %arg2: i32) -> (i32, i32) {
    %c0_i32 = arith.constant 0 : i32
    %c0_i32_0 = arith.constant 0 : i32
    %c0_i32_1 = arith.constant 0 : i32
    return %c0_i32, %c0_i32_0 : i32, i32
  }
  func.func @transform_9(%arg0: i32, %arg1: i32, %arg2: i32) -> (i32, i32) {
    %c0_i32 = arith.constant 0 : i32
    %c0_i32_0 = arith.constant 0 : i32
    %c0_i32_1 = arith.constant 0 : i32
    return %c0_i32, %c0_i32_0 : i32, i32
  }
  func.func @transform_10(%arg0: i32, %arg1: i32, %arg2: i32) -> (i32, i32) {
    %c0_i32 = arith.constant 0 : i32
    %c0_i32_0 = arith.constant 0 : i32
    %c0_i32_1 = arith.constant 0 : i32
    return %c0_i32, %c0_i32_0 : i32, i32
  }
  func.func @transform_11(%arg0: i32, %arg1: i32, %arg2: i32) -> (i32, i32) {
    %c0_i32 = arith.constant 0 : i32
    %c0_i32_0 = arith.constant 0 : i32
    %c0_i32_1 = arith.constant 0 : i32
    return %c0_i32, %c0_i32_0 : i32, i32
  }
  func.func @transform_12(%arg0: i32, %arg1: i32, %arg2: i32) -> (i32, i32) {
    %c0_i32 = arith.constant 0 : i32
    %c0_i32_0 = arith.constant 0 : i32
    %c0_i32_1 = arith.constant 0 : i32
    return %c0_i32, %c0_i32_0 : i32, i32
  }
  func.func @transform_13(%arg0: i32, %arg1: i32, %arg2: i32) -> (i32, i32) {
    %c0_i32 = arith.constant 0 : i32
    %c0_i32_0 = arith.constant 0 : i32
    %c0_i32_1 = arith.constant 0 : i32
    return %c0_i32, %c0_i32_0 : i32, i32
  }
  func.func @transform_14(%arg0: i32, %arg1: i32, %arg2: i32) -> (i32, i32) {
    %c0_i32 = arith.constant 0 : i32
    %c0_i32_0 = arith.constant 0 : i32
    %c0_i32_1 = arith.constant 0 : i32
    return %c0_i32, %c0_i32_0 : i32, i32
  }
  func.func @transform_15(%arg0: i32, %arg1: i32, %arg2: i32) -> (i32, i32) {
    %c0_i32 = arith.constant 0 : i32
    %c0_i32_0 = arith.constant 0 : i32
    %c0_i32_1 = arith.constant 0 : i32
    return %c0_i32, %c0_i32_0 : i32, i32
  }
  func.func @transform_16(%arg0: i32, %arg1: i32, %arg2: i32) -> (i32, i32) {
    %c0_i32 = arith.constant 0 : i32
    %c0_i32_0 = arith.constant 0 : i32
    %c0_i32_1 = arith.constant 0 : i32
    return %c0_i32, %c0_i32_0 : i32, i32
  }
  func.func @transform_17(%arg0: i32, %arg1: i32, %arg2: i32) -> (i32, i32) {
    %c0_i32 = arith.constant 0 : i32
    %c0_i32_0 = arith.constant 0 : i32
    %c0_i32_1 = arith.constant 0 : i32
    return %c0_i32, %c0_i32_0 : i32, i32
  }
  func.func @transform_18(%arg0: i32, %arg1: i32, %arg2: i32) -> (i32, i32) {
    %c0_i32 = arith.constant 0 : i32
    %c0_i32_0 = arith.constant 0 : i32
    %c0_i32_1 = arith.constant 0 : i32
    return %c0_i32, %c0_i32_0 : i32, i32
  }
  func.func @transform_19(%arg0: i32, %arg1: i32, %arg2: i32) -> (i32, i32) {
    %c0_i32 = arith.constant 0 : i32
    %c0_i32_0 = arith.constant 0 : i32
    %c0_i32_1 = arith.constant 0 : i32
    return %c0_i32, %c0_i32_0 : i32, i32
  }
  func.func @transform_20(%arg0: i32, %arg1: i32, %arg2: i32) -> (i32, i32) {
    %c0_i32 = arith.constant 0 : i32
    %c0_i32_0 = arith.constant 0 : i32
    %c0_i32_1 = arith.constant 0 : i32
    return %c0_i32, %c0_i32_0 : i32, i32
  }
  func.func @transform_21(%arg0: i32, %arg1: i32, %arg2: i32) -> (i32, i32) {
    %c0_i32 = arith.constant 0 : i32
    %c0_i32_0 = arith.constant 0 : i32
    %c0_i32_1 = arith.constant 0 : i32
    return %c0_i32, %c0_i32_0 : i32, i32
  }
  func.func @transform_22(%arg0: i32, %arg1: i32, %arg2: i32) -> (i32, i32) {
    %c0_i32 = arith.constant 0 : i32
    %c0_i32_0 = arith.constant 0 : i32
    %c0_i32_1 = arith.constant 0 : i32
    return %c0_i32, %c0_i32_0 : i32, i32
  }
  func.func @transform_23(%arg0: i32, %arg1: i32, %arg2: i32) -> (i32, i32) {
    %c0_i32 = arith.constant 0 : i32
    %c0_i32_0 = arith.constant 0 : i32
    %c0_i32_1 = arith.constant 0 : i32
    return %c0_i32, %c0_i32_0 : i32, i32
  }
  func.func @transform_24(%arg0: i32, %arg1: i32, %arg2: i32) -> (i32, i32, i32) {
    %c0_i32 = arith.constant 0 : i32
    %c0_i32_0 = arith.constant 0 : i32
    return %arg0, %arg1, %c0_i32 : i32, i32, i32
  }
  func.func @transform_25(%arg0: i32, %arg1: i32, %arg2: i32) -> (i32, i32, i32) {
    %c0_i32 = arith.constant 0 : i32
    %c0_i32_0 = arith.constant 0 : i32
    return %arg0, %c0_i32, %arg1 : i32, i32, i32
  }
}

</mosaic_0001>

<bundles_post_ra>
// kernel: tpu_custom_call.1
= control target key start
LH: loop header
LB: loop body
LE: loop exit
PB: predicated region body
PF: predicated region fallthrough
CT: control target
= control target key end

     0   :  { %s6346_s0 = inlined_call_operand.hbm [shape: f32[2,8,4], index: 0, kind: input, shape index: {}]   ;;  %s6347_s1 = inlined_call_operand.hbm [shape: f32[2,8,16], index: 1, kind: input, shape index: {}]   ;;  %s6348_s2 = inlined_call_operand.hbm [shape: f32[2,8,16], index: 2, kind: input, shape index: {}]   ;;  %s6349_s3 = inlined_call_operand.hbm [shape: f32[2,3,8], index: 3, kind: input, shape index: {}]   ;;  %s6350_s4 = inlined_call_operand.hbm [shape: f32[2,3,8], index: 4, kind: input, shape index: {}]   ;;  %s6351_s5 = inlined_call_operand.hbm [shape: f32[1,16], index: 5, kind: input, shape index: {}]   ;;  %s6352_s6 = inlined_call_operand.hbm [shape: f32[1,16], index: 6, kind: input, shape index: {}]   ;;  %s6353_s7 = inlined_call_operand.hbm [shape: bf16[16,32], index: 7, kind: input, shape index: {}]   ;;  %s6354_s8 = inlined_call_operand.hbm [shape: f32[1,32], index: 8, kind: input, shape index: {}]   ;;  %s6355_s9 = inlined_call_operand.hbm [shape: f32[1,32], index: 9, kind: input, shape index: {}]   ;;  %s6356_s10 = inlined_call_operand.<no memory space> [shape: f32[1,1], index: 10, kind: input, shape index: {}]   ;;  %s6357_s11 = inlined_call_operand.hbm [shape: bf16[32,32], index: 11, kind: input, shape index: {}]   ;;  %s6358_s12 = inlined_call_operand.hbm [shape: f32[1,32], index: 12, kind: input, shape index: {}]   ;;  %s6359_s13 = inlined_call_operand.hbm [shape: bf16[32,16], index: 13, kind: input, shape index: {}]   ;;  %s6360_s14 = inlined_call_operand.hbm [shape: f32[1,16], index: 14, kind: input, shape index: {}]   ;;  %s6361_s15 = inlined_call_operand.hbm [shape: f32[1,16], index: 15, kind: input, shape index: {}]   ;;  %s6362_s17 = inlined_call_operand.hbm [shape: bf16[4,32], index: 17, kind: input, shape index: {}]   ;;  %s6363_s18 = inlined_call_operand.hbm [shape: bf16[32,32], index: 18, kind: input, shape index: {}]   ;;  %s6364_s19 = inlined_call_operand.hbm [shape: f32[1,32], index: 19, kind: input, shape index: {}]   ;;  %s6365_s20 = inlined_call_operand.hbm [shape: bf16[32,16], index: 20, kind: input, shape index: {}]   ;;  %s6366_s21 = inlined_call_operand.hbm [shape: f32[1,16], index: 21, kind: input, shape index: {}]   ;;  %s6367_s22 = inlined_call_operand.hbm [shape: bf16[16,4], index: 22, kind: input, shape index: {}]   ;;  %s6368_s23 = inlined_call_operand.hbm [shape: f32[1,4], index: 23, kind: input, shape index: {}]   ;;  %s6369_s24 = inlined_call_operand.hbm [shape: f32[2,8,4], index: 24, kind: output, shape index: {0}]   ;;  %s6370_s25 = inlined_call_operand.hbm [shape: f32[2,3,8], index: 25, kind: output, shape index: {1}]   ;;  %s6371_s16 = inlined_call_operand.<no memory space> [shape: f32[1,1], index: 16, kind: input, shape index: {}]  }
   0x1   :  { %6428 = sst [smem:[#allocation69_spill]] %s6346_s0  ;;  %v31_v0 = vstv %s6356_s10  ;;  %v33_v1 = vstv %s6371_s16 }
   0x2   :  { %6429 = sst [smem:[#allocation70_spill]] %s6347_s1  ;;  %32 = vst [vmem:[#allocation4] sm:$0x1] %v31_v0  ;;  %34 = vst [vmem:[#allocation5] sm:$0x1] %v33_v1 }
   0x3   :  { %6430 = sst [smem:[#allocation71_spill]] %s6348_s2 }
   0x4   :  { %6431 = sst [smem:[#allocation72_spill]] %s6349_s3 }
   0x5   :  { %6432 = sst [smem:[#allocation73_spill]] %s6350_s4 }
   0x6   :  { %6433 = sst [smem:[#allocation74_spill]] %s6351_s5 }
   0x7   :  { %6434 = sst [smem:[#allocation75_spill]] %s6352_s6 }
   0x8   :  { %6435 = sst [smem:[#allocation76_spill]] %s6353_s7 }
   0x9   :  { %6436 = sst [smem:[#allocation77_spill]] %s6354_s8 }
   0xa   :  { %6437 = sst [smem:[#allocation78_spill]] %s6355_s9 }
   0xb   :  { %6438 = sst [smem:[#allocation79_spill]] %s6357_s11 }
   0xc   :  { %6439 = sst [smem:[#allocation80_spill]] %s6358_s12 }
   0xd   :  { %6440 = sst [smem:[#allocation81_spill]] %s6359_s13 }
   0xe   :  { %6441 = sst [smem:[#allocation82_spill]] %s6360_s14 }
   0xf   :  { %6442 = sst [smem:[#allocation83_spill]] %s6361_s15 }
  0x10   :  { %6443 = sst [smem:[#allocation84_spill]] %s6362_s17 }
  0x11   :  { %6444 = sst [smem:[#allocation85_spill]] %s6363_s18 }
  0x12   :  { %6445 = sst [smem:[#allocation86_spill]] %s6364_s19 }
  0x13   :  { %6446 = sst [smem:[#allocation87_spill]] %s6365_s20 }
  0x14   :  { %6447 = sst [smem:[#allocation88_spill]] %s6366_s21 }
  0x15   :  { %6448 = sst [smem:[#allocation89_spill]] %s6367_s22 }
  0x16   :  { %6449 = sst [smem:[#allocation90_spill]] %s6368_s23 }
  0x17   :  { %6450 = sst [smem:[#allocation91_spill]] %s6369_s24 }
  0x18   :  { %6451 = sst [smem:[#allocation92_spill]] %s6370_s25 }
  0x19   :  { %35 = vsyncpa [#allocation7], 0 }
  0x1a   :  { %37 = vsyncpa [#allocation7 + $0x1], 0 }
  0x1b   :  { %38 = vsyncpa [#allocation10], 0 }
  0x1c   :  { %40 = vsyncpa [#allocation10 + $0x1], 0 }
  0x1d   :  { %41 = vsyncpa [#allocation13], 0 }
  0x1e   :  { %43 = vsyncpa [#allocation13 + $0x1], 0 }
  0x1f   :  { %44 = vsyncpa [#allocation16], 0 }
  0x20   :  { %45 = vsyncpa [#allocation19], 0 }
  0x21   :  { %46 = vsyncpa [#allocation22], 0 }
  0x22   :  { %47 = vsyncpa [#allocation25], 0 }
  0x23   :  { %48 = vsyncpa [#allocation28], 0 }
  0x24   :  { %49 = vsyncpa [#allocation31], 0 }
  0x25   :  { %50 = vsyncpa [#allocation34], 0 }
  0x26   :  { %51 = vsyncpa [#allocation37], 0 }
  0x27   :  { %52 = vsyncpa [#allocation40], 0 }
  0x28   :  { %53 = vsyncpa [#allocation8], 0 }
  0x29   :  { %55 = vsyncpa [#allocation8 + $0x1], 0 }
  0x2a   :  { %56 = vsyncpa [#allocation43], 0 }
  0x2b   :  { %58 = vsyncpa [#allocation43 + $0x1], 0  ;;  %s5153_s10 = smov 0   ;;  %s5155_s16 = smov 0  }
  0x2c   :  { %s5157_s7 = smov 0   ;;  %s5159_s3 = smov 0  }
  0x2d   :  { %s5161_s26 = smov 0   ;;  %s5163_s1 = smov 0  }
  0x2e LB: > { %6452 = sst [smem:[#allocation58_spill]] %s4965_s10  ;;  %s5184_s8 = sadd.s32 4294967295, %s4985_s1   ;;  %s4985_s1 = sphi %s5163_s1, %s64_s1   ;;  %s4981_s26 = sphi %s5161_s26, %s6541_s26   ;;  %s4977_s3 = sphi %s5159_s3, %s6540_s3   ;;  %s4973_s7 = sphi %s5157_s7, %s6539_s7   ;;  %s4969_s16 = sphi %s5155_s16, %s6543_s16   ;;  %s4965_s10 = sphi %s5153_s10, %s6542_s10  }
  0x2f   : > { %6453 = sst [smem:[#allocation59_spill]] %s4973_s7  ;;  %p3520_p0 = scmp.ge.s32.totalorder %s4985_s1, 1 }
  0x30   : > { %6454 = sst [smem:[#allocation60_spill]] %s4977_s3  ;;  %p6386_p1 = scmp.eq.s32.totalorder %s5184_s8, 0 }
  0x31   : > { %6455 = sst [smem:[#allocation61_spill]] %s4981_s26  ;;  %p683_p2 = scmp.lt.s32.totalorder %s4985_s1, 3 }
  0x32   : > { %6456 = sst [smem:[#allocation62_spill]] %s4985_s1  ;;  %s4987_s4 = smov [#allocation15]  }
  0x33   : > { %6457 = sst [smem:[#allocation63_spill]] %s5184_s8  ;;  %p5189_p3 = pnand %p3520_p0, %p683_p2 }
  0x34   : > { %s696_s28 = sshll.u32 %s4987_s4, 4  ;;  %s4988_s9 = smov [#allocation18]   ;;  %s697_s28 = int_to_ptr.vmem [resolvable:$true] %s696_s28 }
  0x35   : > { %s6458_s27 = scalar_select %p5189_p3, 1, 0 }
  0x36   : > { %p3835_p5 = pneg %p5189_p3  ;;  %s717_s5 = sshll.u32 %s4988_s9, 4  ;;  %s5202_s5 = int_to_ptr.vmem [resolvable:$true] %s717_s5 }
  0x37   : > { %6459 = sst [smem:[#allocation64_spill]] %s6458_s27  ;;  %s4989_s29 = smov [#allocation21]  }
  0x38   : > { %p5198_p6 = pnand %p3835_p5, %p6386_p1  ;;  %s5204_s2 = sshll.u32 %s4989_s29, 4  ;;  %s743_s2 = int_to_ptr.vmem [resolvable:$true] %s5204_s2 }
  0x39   : > { %s6461_s4 = sld [smem:[#allocation74_spill]] }
  0x3a   : > { %s6460_s0 = scalar_select %p5198_p6, 1, 0 }
  0x3b   : > { %p5214_p8 = pneg %p5198_p6 }
  0x3d   : > { %s6462_s9 = scalar_select %p5214_p8, 1, 0 }
  0x3f   : > { %s4201_s25 = scalar_lea.hbm %s6461_s4, 16 }
  0x40   : > { %p4202_p7 = scmp.ne.s32.totalorder %s6461_s4, %s4201_s25  ;;  %p4208_p11 = scmp.lt.u32.totalorder %s4201_s25, %s6461_s4 }
  0x42   : > { %p4204_p9 = pnand %p5214_p8, %p4202_p7 }
  0x44   : > { %p4205_p10 = pneg %p4204_p9 }
  0x46   : > { %p4210_p12 = pnand %p4208_p11, %p4205_p10 }
  0x48   : > { %4213 = shalt.err (!%p4210_p12)
}
  0x49   : > { %s4214_s6 = scalar_lea.vmem %s697_s28, 16  ;;  %s4221_s24 = scalar_lea.vmem %s697_s28, 32 }
  0x4a   : > { %p4215_p13 = scmp.ne.s32.totalorder %s697_s28, %s4214_s6  ;;  %p4222_p5 = scmp.lt.s32.totalorder %s697_s28, %s697_s28 }
  0x4b   : > { %p4223_p4 = scmp.lt.s32.totalorder %s4221_s24, %s4214_s6 }
  0x4c   : > { %p4217_p0 = pnand %p4215_p13, %p5214_p8 }
  0x4d   : > { %p4224_p1 = por %p4223_p4, %p4222_p5 }
  0x4e   : > { %p4218_p2 = pneg %p4217_p0 }
  0x50   : > { %p4225_p3 = pnand %p4224_p1, %p4218_p2 }
  0x52   : > { %4228 = shalt.err (!%p4225_p3)
}
  0x53   : > { %3838 = dma.hbm_to_vmem [thread:$0]  (!%p5198_p6), %s6461_s4, 16, %s697_s28, [#allocation16]  }
  0x54   : > { %s6463_s29 = sld [smem:[#allocation76_spill]] }
  0x5a   : > { %s4229_s23 = scalar_lea.hbm %s6463_s29, 128 }
  0x5b   : > { %p4230_p7 = scmp.ne.s32.totalorder %s6463_s29, %s4229_s23  ;;  %p4236_p1 = scmp.lt.u32.totalorder %s4229_s23, %s6463_s29 }
  0x5d   : > { %p4232_p9 = pnand %p4230_p7, %p5214_p8 }
  0x5f   : > { %p4233_p4 = pneg %p4232_p9 }
  0x61   : > { %p4238_p3 = pnand %p4236_p1, %p4233_p4 }
  0x63   : > { %4241 = shalt.err (!%p4238_p3)
}
  0x64   : > { %s4242_s28 = scalar_lea.vmem %s5202_s5, 128  ;;  %p4250_p13 = scmp.lt.s32.totalorder %s5202_s5, %s5202_s5 }
  0x65   : > { %p4243_p10 = scmp.ne.s32.totalorder %s5202_s5, %s4242_s28  ;;  %p4251_p0 = scmp.lt.s32.totalorder %s4242_s28, %s4242_s28 }
  0x67   : > { %p4245_p11 = pnand %p4243_p10, %p5214_p8  ;;  %p4252_p2 = por %p4251_p0, %p4250_p13 }
  0x69   : > { %p4246_p12 = pneg %p4245_p11 }
  0x6b   : > { %p4253_p5 = pnand %p4252_p2, %p4246_p12 }
  0x6d   : > { %4256 = shalt.err (!%p4253_p5)
}
  0x6e   : > { %s6393_s20 = smov 64   ;;  %s6395_s22 = smov 4  }
  0x6f   : > { %3844 = dma.hbm_to_vmem [thread:$0]  (!%p5198_p6), %s6463_s29, 128, %s5202_s5, [#allocation19], %s6393_s20, %s6393_s20, %s6395_s22  }
  0x70   : > { %s6464_s27 = sld [smem:[#allocation78_spill]] }
  0x76   : > { %s4257_s6 = scalar_lea.hbm %s6464_s27, 16 }
  0x77   : > { %p4258_p7 = scmp.ne.s32.totalorder %s6464_s27, %s4257_s6  ;;  %p4264_p1 = scmp.lt.u32.totalorder %s4257_s6, %s6464_s27 }
  0x79   : > { %p4260_p9 = pnand %p4258_p7, %p5214_p8 }
  0x7b   : > { %p4261_p4 = pneg %p4260_p9 }
  0x7d   : > { %p4266_p3 = pnand %p4264_p1, %p4261_p4 }
  0x7f   : > { %4269 = shalt.err (!%p4266_p3)
}
  0x80   : > { %s4270_s23 = scalar_lea.vmem %s743_s2, 16  ;;  %s4277_s5 = scalar_lea.vmem %s743_s2, 32 }
  0x81   : > { %p4271_p10 = scmp.ne.s32.totalorder %s743_s2, %s4270_s23  ;;  %p4278_p13 = scmp.lt.s32.totalorder %s743_s2, %s743_s2 }
  0x82   : > { %p4279_p0 = scmp.lt.s32.totalorder %s4277_s5, %s4270_s23 }
  0x83   : > { %p4273_p11 = pnand %p4271_p10, %p5214_p8 }
  0x84   : > { %p4280_p2 = por %p4279_p0, %p4278_p13 }
  0x85   : > { %p4274_p12 = pneg %p4273_p11 }
  0x87   : > { %p4281_p5 = pnand %p4280_p2, %p4274_p12 }
  0x89   : > { %4284 = shalt.err (!%p4281_p5)
}
  0x8a   : > { %3850 = dma.hbm_to_vmem [thread:$0]  (!%p5198_p6), %s6464_s27, 16, %s743_s2, [#allocation22]  }
  0x8b   : > { %s4992_s18 = smov [#allocation24]   ;;  %s4993_s25 = smov [#allocation27]  }
  0x8c   : > { %s769_s4 = sshll.u32 %s4992_s18, 4  ;;  %s793_s6 = sshll.u32 %s4993_s25, 4  ;;  %s770_s4 = int_to_ptr.vmem [resolvable:$true] %s769_s4  ;;  %s794_s6 = int_to_ptr.vmem [resolvable:$true] %s793_s6 }
  0x8d   : > { %s6465_s12 = sld [smem:[#allocation80_spill]] }
  0x93   : > { %s4285_s20 = scalar_lea.hbm %s6465_s12, 16 }
  0x94   : > { %p4286_p7 = scmp.ne.s32.totalorder %s6465_s12, %s4285_s20  ;;  %p4292_p1 = scmp.lt.u32.totalorder %s4285_s20, %s6465_s12 }
  0x96   : > { %p4288_p9 = pnand %p4286_p7, %p5214_p8 }
  0x98   : > { %p4289_p4 = pneg %p4288_p9 }
  0x9a   : > { %p4294_p3 = pnand %p4292_p1, %p4289_p4 }
  0x9c   : > { %4297 = shalt.err (!%p4294_p3)
}
  0x9d   : > { %s4298_s2 = scalar_lea.vmem %s770_s4, 16  ;;  %s4305_s30 = scalar_lea.vmem %s770_s4, 32 }
  0x9e   : > { %p4299_p10 = scmp.ne.s32.totalorder %s770_s4, %s4298_s2  ;;  %p4306_p13 = scmp.lt.s32.totalorder %s770_s4, %s770_s4 }
  0x9f   : > { %p4307_p0 = scmp.lt.s32.totalorder %s4305_s30, %s4298_s2 }
  0xa0   : > { %p4301_p11 = pnand %p4299_p10, %p5214_p8 }
  0xa1   : > { %p4308_p2 = por %p4307_p0, %p4306_p13 }
  0xa2   : > { %p4302_p12 = pneg %p4301_p11 }
  0xa4   : > { %p4309_p5 = pnand %p4308_p2, %p4302_p12 }
  0xa6   : > { %4312 = shalt.err (!%p4309_p5)
}
  0xa7   : > { %3856 = dma.hbm_to_vmem [thread:$0]  (!%p5198_p6), %s6465_s12, 16, %s770_s4, [#allocation25]  }
  0xa8   : > { %s6466_s14 = sld [smem:[#allocation82_spill]] }
  0xae   : > { %s4313_s24 = scalar_lea.hbm %s6466_s14, 16 }
  0xaf   : > { %p4314_p7 = scmp.ne.s32.totalorder %s6466_s14, %s4313_s24  ;;  %p4320_p1 = scmp.lt.u32.totalorder %s4313_s24, %s6466_s14 }
  0xb1   : > { %p4316_p9 = pnand %p4314_p7, %p5214_p8 }
  0xb3   : > { %p4317_p4 = pneg %p4316_p9 }
  0xb5   : > { %p4322_p3 = pnand %p4320_p1, %p4317_p4 }
  0xb7   : > { %4325 = shalt.err (!%p4322_p3)
}
  0xb8   : > { %s4326_s2 = scalar_lea.vmem %s794_s6, 16  ;;  %s4333_s4 = scalar_lea.vmem %s794_s6, 32 }
  0xb9   : > { %p4327_p10 = scmp.ne.s32.totalorder %s794_s6, %s4326_s2  ;;  %p4334_p13 = scmp.lt.s32.totalorder %s794_s6, %s794_s6 }
  0xba   : > { %p4335_p0 = scmp.lt.s32.totalorder %s4333_s4, %s4326_s2 }
  0xbb   : > { %p4329_p11 = pnand %p4327_p10, %p5214_p8 }
  0xbc   : > { %p4336_p2 = por %p4335_p0, %p4334_p13 }
  0xbd   : > { %p4330_p12 = pneg %p4329_p11 }
  0xbf   : > { %p4337_p5 = pnand %p4336_p2, %p4330_p12 }
  0xc1   : > { %4340 = shalt.err (!%p4337_p5)
}
  0xc2   : > { %3862 = dma.hbm_to_vmem [thread:$0]  (!%p5198_p6), %s6466_s14, 16, %s794_s6, [#allocation28]  }
  0xc3   : > { %s4994_s25 = smov [#allocation30]   ;;  %s4995_s22 = smov [#allocation33]  }
  0xc4   : > { %s818_s20 = sshll.u32 %s4994_s25, 4  ;;  %s842_s24 = sshll.u32 %s4995_s22, 4  ;;  %s819_s20 = int_to_ptr.vmem [resolvable:$true] %s818_s20  ;;  %s843_s24 = int_to_ptr.vmem [resolvable:$true] %s842_s24 }
  0xc5   : > { %s6467_s17 = sld [smem:[#allocation84_spill]] }
  0xcb   : > { %s4341_s5 = scalar_lea.hbm %s6467_s17, 32 }
  0xcc   : > { %p4342_p7 = scmp.ne.s32.totalorder %s6467_s17, %s4341_s5  ;;  %p4348_p1 = scmp.lt.u32.totalorder %s4341_s5, %s6467_s17 }
  0xce   : > { %p4344_p9 = pnand %p4342_p7, %p5214_p8 }
  0xd0   : > { %p4345_p4 = pneg %p4344_p9 }
  0xd2   : > { %p4350_p3 = pnand %p4348_p1, %p4345_p4 }
  0xd4   : > { %4353 = shalt.err (!%p4350_p3)
}
  0xd5   : > { %s4354_s6 = scalar_lea.vmem %s819_s20, 32  ;;  %p4362_p13 = scmp.lt.s32.totalorder %s819_s20, %s819_s20 }
  0xd6   : > { %p4355_p10 = scmp.ne.s32.totalorder %s819_s20, %s4354_s6  ;;  %p4363_p0 = scmp.lt.s32.totalorder %s4354_s6, %s4354_s6 }
  0xd8   : > { %p4357_p11 = pnand %p4355_p10, %p5214_p8  ;;  %p4364_p2 = por %p4363_p0, %p4362_p13 }
  0xda   : > { %p4358_p12 = pneg %p4357_p11 }
  0xdc   : > { %p4365_p5 = pnand %p4364_p2, %p4358_p12 }
  0xde   : > { %4368 = shalt.err (!%p4365_p5)
}
  0xdf   : > { %3868 = dma.hbm_to_vmem [thread:$0]  (!%p5198_p6), %s6467_s17, 32, %s819_s20, [#allocation31]  }
  0xe0   : > { %s6468_s19 = sld [smem:[#allocation86_spill]] }
  0xe6   : > { %s4369_s23 = scalar_lea.hbm %s6468_s19, 16 }
  0xe7   : > { %p4370_p7 = scmp.ne.s32.totalorder %s6468_s19, %s4369_s23  ;;  %p4376_p1 = scmp.lt.u32.totalorder %s4369_s23, %s6468_s19 }
  0xe9   : > { %p4372_p9 = pnand %p4370_p7, %p5214_p8 }
  0xeb   : > { %p4373_p4 = pneg %p4372_p9 }
  0xed   : > { %p4378_p3 = pnand %p4376_p1, %p4373_p4 }
  0xef   : > { %4381 = shalt.err (!%p4378_p3)
}
  0xf0   : > { %s4382_s30 = scalar_lea.vmem %s843_s24, 16  ;;  %s4389_s20 = scalar_lea.vmem %s843_s24, 32 }
  0xf1   : > { %p4383_p10 = scmp.ne.s32.totalorder %s843_s24, %s4382_s30  ;;  %p4390_p13 = scmp.lt.s32.totalorder %s843_s24, %s843_s24 }
  0xf2   : > { %p4391_p0 = scmp.lt.s32.totalorder %s4389_s20, %s4382_s30 }
  0xf3   : > { %p4385_p11 = pnand %p4383_p10, %p5214_p8 }
  0xf4   : > { %p4392_p2 = por %p4391_p0, %p4390_p13 }
  0xf5   : > { %p4386_p12 = pneg %p4385_p11 }
  0xf7   : > { %p4393_p5 = pnand %p4392_p2, %p4386_p12 }
  0xf9   : > { %4396 = shalt.err (!%p4393_p5)
}
  0xfa   : > { %3874 = dma.hbm_to_vmem [thread:$0]  (!%p5198_p6), %s6468_s19, 16, %s843_s24, [#allocation34]  }
  0xfb   : > { %s4996_s25 = smov [#allocation36]   ;;  %s6469_s21 = sld [smem:[#allocation88_spill]] }
  0xfc   : > { %s866_s22 = sshll.u32 %s4996_s25, 4  ;;  %s867_s22 = int_to_ptr.vmem [resolvable:$true] %s866_s22 }
 0x101   : > { %s4397_s5 = scalar_lea.hbm %s6469_s21, 16 }
 0x102   : > { %p4398_p7 = scmp.ne.s32.totalorder %s6469_s21, %s4397_s5  ;;  %p4404_p1 = scmp.lt.u32.totalorder %s4397_s5, %s6469_s21 }
 0x104   : > { %p4400_p9 = pnand %p4398_p7, %p5214_p8 }
 0x106   : > { %p4401_p4 = pneg %p4400_p9 }
 0x108   : > { %p4406_p3 = pnand %p4404_p1, %p4401_p4 }
 0x10a   : > { %4409 = shalt.err (!%p4406_p3)
}
 0x10b   : > { %s4410_s24 = scalar_lea.vmem %s867_s22, 16  ;;  %s4417_s20 = scalar_lea.vmem %s867_s22, 32 }
 0x10c   : > { %p4411_p10 = scmp.ne.s32.totalorder %s867_s22, %s4410_s24  ;;  %p4418_p13 = scmp.lt.s32.totalorder %s867_s22, %s867_s22 }
 0x10d   : > { %p4419_p0 = scmp.lt.s32.totalorder %s4417_s20, %s4410_s24 }
 0x10e   : > { %p4413_p11 = pnand %p4411_p10, %p5214_p8 }
 0x10f   : > { %p4420_p2 = por %p4419_p0, %p4418_p13 }
 0x110   : > { %p4414_p12 = pneg %p4413_p11 }
 0x112   : > { %p4421_p5 = pnand %p4420_p2, %p4414_p12 }
 0x114   : > { %4424 = shalt.err (!%p4421_p5)
}
 0x115   : > { %3880 = dma.hbm_to_vmem [thread:$0]  (!%p5198_p6), %s6469_s21, 16, %s867_s22, [#allocation37]  }
 0x116   : > { %s3519_s25 = sadd.s32 4294967294, %s4985_s1   ;;  %s83_s28 = sadd.s32 1, %s4981_s26 }
 0x117   : > { %p85_p7 = scmp.ge.s32.totalorder %s83_s28, 2  ;;  %s92_s23 = sadd.s32 1, %s4973_s7 }
 0x118   : > { %p99_p9 = scmp.ne.s32.totalorder %s4973_s7, %s4969_s16  ;;  %p100_p4 = scmp.eq.s32.totalorder %s4985_s1, 0 }
 0x119   : > { %s6545_s28 = smov (%p85_p7, %s83_s28), 0  ;;  %p105_p3 = scmp.ne.s32.totalorder %s4969_s16, %s4965_s10 }
 0x11a   : > { %6470 = sst [smem:[#allocation65_spill]] %s6545_s28  ;;  %p5373_p1 = por %p100_p4, %p99_p9 }
 0x11b   : > { %s87_s22 = ssub.s32 %s4981_s26, %s6545_s28  ;;  %p642_p10 = scmp.eq.s32.totalorder %s5184_s8, 1 }
 0x11c   : > { %p90_p11 = scmp.eq.s32.totalorder %s87_s22, 0  ;;  %p6472_p12 = scmp.eq.s32.totalorder %s5184_s8, 0 }
 0x11d   : > { %p5388_p0 = por %p642_p10, %p99_p9  ;;  %p648_p2 = scmp.eq.s32.totalorder %s3519_s25, 1 }
 0x11e   : > { %p5384_p13 = por %p6472_p12, %p105_p3  ;;  %p3927_p7 = scmp.lt.s32.totalorder %s4985_s1, 2 }
 0x11f   : > { %s6474_s2 = scalar_select %p5388_p0, 1, 0 }
 0x120   : > { %s6473_s3 = scalar_select %p5384_p13, 1, 0 }
 0x121   : > { %6475 = sst [smem:[#allocation66_spill]] %s6474_s2  ;;  %p5395_p5 = por %p648_p2, %p105_p3 }
 0x122   : > { %s5393_s4 = scalar_select %p90_p11, %s4973_s7, %s92_s23  }
 0x123   : > { %s6477_s30 = scalar_select %p5395_p5, 1, 0 }
 0x124   : > { %6476 = sst [smem:[#allocation67_spill]] %s5393_s4  ;;  %s5401_s24 = sand.u32 1, %s4973_s7  }
 0x125   : > { %6478 = sst [smem:[#allocation68_spill]] %s6477_s30  ;;  %s5404_s20 = sshll.u32 %s4981_s26, 7 }
 0x126   : > { %s5407_s6 = sshll.u32 %s5401_s24, 3  ;;  %p5411_p9 = pnand %p3927_p7, %p5373_p1 }
 0x127   : > { %s6401_s25 = sand.u32 1, %s4985_s1   ;;  %s6480_s12 = sld [smem:[#allocation70_spill]] }
 0x128   : > { %s6479_s18 = scalar_select %p5411_p9, 1, 0 }
 0x129   : > { %s924_s17 = scalar_lea.vmem [#allocation9], %s5407_s6  ;;  %s5427_s5 = scalar_lea.sflag [#allocation10], %s6401_s25 }
 0x12a   : > { %s932_s19 = sshll.u32 %s924_s17, 4  ;;  %p5433_p1 = pneg %p5411_p9  ;;  %s5423_s19 = int_to_ptr.vmem [resolvable:$true] %s932_s19 }
 0x12c   : > { %s6481_s27 = scalar_select %p5433_p1, 1, 0 }
 0x12d   : > { %s5420_s14 = scalar_lea.hbm %s6480_s12, %s5404_s20  ;;  %s4430_s17 = scalar_lea.hbm %s6480_s12, 256 }
 0x12e   : > { %s4425_s21 = scalar_lea.hbm %s5420_s14, 128  ;;  %p4431_p11 = scmp.lt.u32.totalorder %s5420_s14, %s6480_s12 }
 0x12f   : > { %p4426_p4 = scmp.ne.s32.totalorder %s5420_s14, %s4425_s21  ;;  %p4432_p12 = scmp.lt.u32.totalorder %s4430_s17, %s4425_s21 }
 0x130   : > { %p4434_p7 = scmp.lt.u32.totalorder %s4425_s21, %s5420_s14 }
 0x131   : > { %p4428_p3 = pnand %p5433_p1, %p4426_p4  ;;  %p4433_p2 = por %p4432_p12, %p4431_p11 }
 0x133   : > { %p4429_p10 = pneg %p4428_p3  ;;  %p4435_p5 = por %p4434_p7, %p4433_p2 }
 0x135   : > { %p4436_p0 = pnand %p4435_p5, %p4429_p10 }
 0x137   : > { %4439 = shalt.err (!%p4436_p0)
}
 0x138   : > { %s4440_s25 = scalar_lea.vmem %s5423_s19, 128  ;;  %s4997_s23 = smov [#allocation9]  }
 0x139   : > { %p4441_p4 = scmp.ne.s32.totalorder %s5423_s19, %s4440_s25  ;;  %s4445_s22 = sshll.u32 %s4997_s23, 4  ;;  %s4446_s22 = int_to_ptr.vmem [resolvable:$false] %s4445_s22 }
 0x13a   : > { %s4447_s29 = scalar_lea.vmem %s4446_s22, 256  ;;  %p4448_p6 = scmp.lt.s32.totalorder %s5423_s19, %s4446_s22 }
 0x13b   : > { %p4443_p3 = pnand %p4441_p4, %p5433_p1  ;;  %p4449_p8 = scmp.lt.s32.totalorder %s4447_s29, %s4440_s25 }
 0x13d   : > { %p4444_p13 = pneg %p4443_p3  ;;  %p4450_p11 = por %p4449_p8, %p4448_p6 }
 0x13f   : > { %p4451_p12 = pnand %p4450_p11, %p4444_p13 }
 0x141   : > { %4454 = shalt.err (!%p4451_p12)
}
 0x142   : > { %3893 = dma.hbm_to_vmem [thread:$0]  (!%p5411_p9), %s5420_s14, 128, %s5423_s19, %s5427_s5  }
 0x143   : > { %s6412_s21 = sshll.u32 %s5401_s24, 2  ;;  %s3546_s28 = sshll.u32 %s4981_s26, 6 }
 0x144   : > { %s6482_s22 = sld [smem:[#allocation72_spill]]  ;;  %s962_s29 = scalar_lea.vmem [#allocation12], %s6412_s21 }
 0x145   : > { %s970_s12 = sshll.u32 %s962_s29, 4  ;;  %s6483_s30 = sld [smem:[#allocation73_spill]]  ;;  %s5466_s12 = int_to_ptr.vmem [resolvable:$true] %s970_s12 }
 0x146   : > { %s6484_s19 = sand.u32 1, %s4985_s1  }
 0x147   : > { %s5475_s26 = scalar_lea.sflag [#allocation13], %s6484_s19 }
 0x14a   : > { %s5462_s25 = scalar_lea.hbm %s6482_s22, %s3546_s28  ;;  %s4460_s21 = scalar_lea.hbm %s6482_s22, 128 }
 0x14b   : > { %s5471_s14 = scalar_lea.hbm %s6483_s30, %s3546_s28  ;;  %s4455_s17 = scalar_lea.hbm %s5462_s25, 64 }
 0x14c   : > { %p4456_p6 = scmp.ne.s32.totalorder %s5462_s25, %s4455_s17  ;;  %p4461_p0 = scmp.lt.u32.totalorder %s5462_s25, %s6482_s22 }
 0x14d   : > { %p4462_p5 = scmp.lt.u32.totalorder %s4460_s21, %s4455_s17  ;;  %p4464_p2 = scmp.lt.u32.totalorder %s4455_s17, %s5462_s25 }
 0x14e   : > { %p4458_p8 = pnand %p4456_p6, %p5433_p1 }
 0x14f   : > { %p4463_p10 = por %p4462_p5, %p4461_p0 }
 0x150   : > { %p4459_p13 = pneg %p4458_p8 }
 0x151   : > { %p4465_p7 = por %p4464_p2, %p4463_p10 }
 0x153   : > { %p4466_p4 = pnand %p4465_p7, %p4459_p13 }
 0x155   : > { %4469 = shalt.err (!%p4466_p4)
}
 0x156   : > { %s4470_s7 = scalar_lea.vmem %s5466_s12, 64  ;;  %s4998_s10 = smov [#allocation12]  }
 0x157   : > { %p4471_p3 = scmp.ne.s32.totalorder %s5466_s12, %s4470_s7  ;;  %s4475_s4 = sshll.u32 %s4998_s10, 4  ;;  %s4476_s4 = int_to_ptr.vmem [resolvable:$false] %s4475_s4 }
 0x158   : > { %s4477_s2 = scalar_lea.vmem %s4476_s4, 128  ;;  %p4478_p6 = scmp.lt.s32.totalorder %s5466_s12, %s4476_s4 }
 0x159   : > { %p4473_p11 = pnand %p4471_p3, %p5433_p1  ;;  %p4479_p8 = scmp.lt.s32.totalorder %s4477_s2, %s4470_s7 }
 0x15b   : > { %p4474_p12 = pneg %p4473_p11  ;;  %p4480_p0 = por %p4479_p8, %p4478_p6 }
 0x15d   : > { %p4481_p5 = pnand %p4480_p0, %p4474_p12 }
 0x15f   : > { %4484 = shalt.err (!%p4481_p5)
}
 0x160   : > { %3899 = dma.hbm_to_vmem [thread:$0]  (!%p5411_p9), %s5462_s25, 64, %s5466_s12, %s5475_s26  }
 0x161   : > { %s4999_s21 = smov [#allocation17]   ;;  %s5000_s19 = smov [#allocation20]  }
 0x162   : > { %s707_s28 = sshll.u32 %s4999_s21, 4  ;;  %s731_s17 = sshll.u32 %s5000_s19, 4  ;;  %s708_s28 = int_to_ptr.vmem [resolvable:$true] %s707_s28  ;;  %s5499_s17 = int_to_ptr.vmem [resolvable:$true] %s731_s17 }
 0x163   : > { %s6485_s7 = sld [smem:[#allocation75_spill]]  ;;  %p6487_p10 = scmp.ne.s32.totalorder %s6462_s9, 0 }
 0x169   : > { %s6486_s4 = smov %s6485_s7  ;;  %s4485_s10 = scalar_lea.hbm %s6485_s7, 16 }
 0x16a   : > { %p4486_p13 = scmp.ne.s32.totalorder %s6486_s4, %s4485_s10  ;;  %p4492_p4 = scmp.lt.u32.totalorder %s4485_s10, %s6486_s4 }
 0x16c   : > { %p4488_p2 = pnand %p4486_p13, %p6487_p10 }
 0x16e   : > { %p4489_p7 = pneg %p4488_p2 }
 0x170   : > { %p4494_p3 = pnand %p4492_p4, %p4489_p7 }
 0x172   : > { %4497 = shalt.err (!%p4494_p3)
}
 0x173   : > { %s4498_s25 = scalar_lea.vmem %s708_s28, 16  ;;  %s4505_s21 = scalar_lea.vmem %s708_s28, 32 }
 0x174   : > { %p4499_p11 = scmp.ne.s32.totalorder %s708_s28, %s4498_s25  ;;  %p4506_p8 = scmp.lt.s32.totalorder %s708_s28, %s708_s28 }
 0x175   : > { %p4507_p0 = scmp.lt.s32.totalorder %s4505_s21, %s4498_s25 }
 0x176   : > { %p4501_p12 = pnand %p4499_p11, %p6487_p10 }
 0x177   : > { %p4508_p5 = por %p4507_p0, %p4506_p8 }
 0x178   : > { %p4502_p6 = pneg %p4501_p12 }
 0x17a   : > { %p4509_p9 = pnand %p4508_p5, %p4502_p6 }
 0x17c   : > { %4512 = shalt.err (!%p4509_p9)
}
 0x17d   : > { %p6488_p13 = scmp.ne.s32.totalorder %s6460_s0, 0  ;;  %s6489_s29 = sld [smem:[#allocation77_spill]] }
 0x17f   : > { %3841 = dma.hbm_to_vmem [thread:$0]  (!%p6488_p13), %s6486_s4, 16, %s708_s28, [#allocation16]  }
 0x183   : > { %s4513_s7 = scalar_lea.hbm %s6489_s29, 16 }
 0x184   : > { %p4514_p2 = scmp.ne.s32.totalorder %s6489_s29, %s4513_s7  ;;  %p4520_p9 = scmp.lt.u32.totalorder %s4513_s7, %s6489_s29 }
 0x186   : > { %p4516_p7 = pnand %p4514_p2, %p6487_p10 }
 0x188   : > { %p4517_p4 = pneg %p4516_p7 }
 0x18a   : > { %p4522_p3 = pnand %p4520_p9, %p4517_p4 }
 0x18c   : > { %4525 = shalt.err (!%p4522_p3)
}
 0x18d   : > { %s4526_s28 = scalar_lea.vmem %s5499_s17, 16  ;;  %s4533_s21 = scalar_lea.vmem %s5499_s17, 32 }
 0x18e   : > { %p4527_p11 = scmp.ne.s32.totalorder %s5499_s17, %s4526_s28  ;;  %p4534_p8 = scmp.lt.s32.totalorder %s5499_s17, %s5499_s17 }
 0x18f   : > { %p4535_p0 = scmp.lt.s32.totalorder %s4533_s21, %s4526_s28 }
 0x190   : > { %p4529_p12 = pnand %p4527_p11, %p6487_p10 }
 0x191   : > { %p4536_p5 = por %p4535_p0, %p4534_p8 }
 0x192   : > { %p4530_p6 = pneg %p4529_p12 }
 0x194   : > { %p4537_p2 = pnand %p4536_p5, %p4530_p6 }
 0x196   : > { %4540 = shalt.err (!%p4537_p2)
}
 0x197   : > { %3847 = dma.hbm_to_vmem [thread:$0]  (!%p6488_p13), %s6489_s29, 16, %s5499_s17, [#allocation19]  }
 0x198   : > { %s5001_s1 = smov [#allocation23]   ;;  %s5002_s7 = smov [#allocation26]  }
 0x199   : > { %s755_s23 = sshll.u32 %s5001_s1, 4  ;;  %s779_s10 = sshll.u32 %s5002_s7, 4  ;;  %s756_s23 = int_to_ptr.vmem [resolvable:$true] %s755_s23  ;;  %s5543_s10 = int_to_ptr.vmem [resolvable:$true] %s779_s10 }
 0x19a   : > { %s6490_s11 = sld [smem:[#allocation79_spill]] }
 0x1a0   : > { %s4541_s25 = scalar_lea.hbm %s6490_s11, 256 }
 0x1a1   : > { %p4542_p7 = scmp.ne.s32.totalorder %s6490_s11, %s4541_s25  ;;  %p4548_p3 = scmp.lt.u32.totalorder %s4541_s25, %s6490_s11 }
 0x1a3   : > { %p4544_p4 = pnand %p4542_p7, %p6487_p10 }
 0x1a5   : > { %p4545_p9 = pneg %p4544_p4 }
 0x1a7   : > { %p4550_p11 = pnand %p4548_p3, %p4545_p9 }
 0x1a9   : > { %4553 = shalt.err (!%p4550_p11)
}
 0x1aa   : > { %s4554_s19 = scalar_lea.vmem %s756_s23, 256  ;;  %p4562_p0 = scmp.lt.s32.totalorder %s756_s23, %s756_s23 }
 0x1ab   : > { %p4555_p12 = scmp.ne.s32.totalorder %s756_s23, %s4554_s19  ;;  %p4563_p5 = scmp.lt.s32.totalorder %s4554_s19, %s4554_s19 }
 0x1ad   : > { %p4557_p6 = pnand %p4555_p12, %p6487_p10  ;;  %p4564_p2 = por %p4563_p5, %p4562_p0 }
 0x1af   : > { %p4558_p8 = pneg %p4557_p6 }
 0x1b1   : > { %p4565_p1 = pnand %p4564_p2, %p4558_p8 }
 0x1b3   : > { %4568 = shalt.err (!%p4565_p1)
}
 0x1b4   : > { %s6491_s1 = smov 4   ;;  %s6492_s7 = smov 64  }
 0x1b5   : > { %3853 = dma.hbm_to_vmem [thread:$0]  (!%p6488_p13), %s6490_s11, 256, %s756_s23, [#allocation22], %s6492_s7, %s6492_s7, %s6491_s1  }
 0x1b6   : > { %s6493_s13 = sld [smem:[#allocation81_spill]] }
 0x1bc   : > { %s4569_s21 = scalar_lea.hbm %s6493_s13, 256 }
 0x1bd   : > { %p4570_p7 = scmp.ne.s32.totalorder %s6493_s13, %s4569_s21  ;;  %p4576_p9 = scmp.lt.u32.totalorder %s4569_s21, %s6493_s13 }
 0x1bf   : > { %p4572_p1 = pnand %p4570_p7, %p6487_p10 }
 0x1c1   : > { %p4573_p4 = pneg %p4572_p1 }
 0x1c3   : > { %p4578_p3 = pnand %p4576_p9, %p4573_p4 }
 0x1c5   : > { %4581 = shalt.err (!%p4578_p3)
}
 0x1c6   : > { %s4582_s23 = scalar_lea.vmem %s5543_s10, 256  ;;  %p4590_p8 = scmp.lt.s32.totalorder %s5543_s10, %s5543_s10 }
 0x1c7   : > { %p4583_p11 = scmp.ne.s32.totalorder %s5543_s10, %s4582_s23  ;;  %p4591_p0 = scmp.lt.s32.totalorder %s4582_s23, %s4582_s23 }
 0x1c9   : > { %p4585_p12 = pnand %p4583_p11, %p6487_p10  ;;  %p4592_p5 = por %p4591_p0, %p4590_p8 }
 0x1cb   : > { %p4586_p6 = pneg %p4585_p12 }
 0x1cd   : > { %p4593_p2 = pnand %p4592_p5, %p4586_p6 }
 0x1cf   : > { %4596 = shalt.err (!%p4593_p2)
}
 0x1d0   : > { %3859 = dma.hbm_to_vmem [thread:$0]  (!%p6488_p13), %s6493_s13, 256, %s5543_s10, [#allocation25], %s6492_s7, %s6492_s7, %s6491_s1  }
 0x1d1   : > { %s5003_s12 = smov [#allocation29]   ;;  %s5004_s28 = smov [#allocation32]  }
 0x1d2   : > { %s804_s25 = sshll.u32 %s5003_s12, 4  ;;  %s828_s21 = sshll.u32 %s5004_s28, 4  ;;  %s805_s25 = int_to_ptr.vmem [resolvable:$true] %s804_s25  ;;  %s5592_s21 = int_to_ptr.vmem [resolvable:$true] %s828_s21 }
 0x1d3   : > { %s6494_s15 = sld [smem:[#allocation83_spill]] }
 0x1d9   : > { %s4597_s19 = scalar_lea.hbm %s6494_s15, 16 }
 0x1da   : > { %p4598_p7 = scmp.ne.s32.totalorder %s6494_s15, %s4597_s19  ;;  %p4604_p9 = scmp.lt.u32.totalorder %s4597_s19, %s6494_s15 }
 0x1dc   : > { %p4600_p1 = pnand %p4598_p7, %p6487_p10 }
 0x1de   : > { %p4601_p4 = pneg %p4600_p1 }
 0x1e0   : > { %p4606_p3 = pnand %p4604_p9, %p4601_p4 }
 0x1e2   : > { %4609 = shalt.err (!%p4606_p3)
}
 0x1e3   : > { %s4610_s2 = scalar_lea.vmem %s805_s25, 16  ;;  %s4617_s12 = scalar_lea.vmem %s805_s25, 32 }
 0x1e4   : > { %p4611_p11 = scmp.ne.s32.totalorder %s805_s25, %s4610_s2  ;;  %p4618_p8 = scmp.lt.s32.totalorder %s805_s25, %s805_s25 }
 0x1e5   : > { %p4619_p0 = scmp.lt.s32.totalorder %s4617_s12, %s4610_s2 }
 0x1e6   : > { %p4613_p12 = pnand %p4611_p11, %p6487_p10 }
 0x1e7   : > { %p4620_p5 = por %p4619_p0, %p4618_p8 }
 0x1e8   : > { %p4614_p6 = pneg %p4613_p12 }
 0x1ea   : > { %p4621_p2 = pnand %p4620_p5, %p4614_p6 }
 0x1ec   : > { %4624 = shalt.err (!%p4621_p2)
}
 0x1ed   : > { %3865 = dma.hbm_to_vmem [thread:$0]  (!%p6488_p13), %s6494_s15, 16, %s805_s25, [#allocation28]  }
 0x1ee   : > { %s6495_s19 = sld [smem:[#allocation85_spill]] }
 0x1f4   : > { %s4625_s23 = scalar_lea.hbm %s6495_s19, 256 }
 0x1f5   : > { %p4626_p7 = scmp.ne.s32.totalorder %s6495_s19, %s4625_s23  ;;  %p4632_p9 = scmp.lt.u32.totalorder %s4625_s23, %s6495_s19 }
 0x1f7   : > { %p4628_p1 = pnand %p4626_p7, %p6487_p10 }
 0x1f9   : > { %p4629_p4 = pneg %p4628_p1 }
 0x1fb   : > { %p4634_p3 = pnand %p4632_p9, %p4629_p4 }
 0x1fd   : > { %4637 = shalt.err (!%p4634_p3)
}
 0x1fe   : > { %s4638_s25 = scalar_lea.vmem %s5592_s21, 256  ;;  %p4646_p8 = scmp.lt.s32.totalorder %s5592_s21, %s5592_s21 }
 0x1ff   : > { %p4639_p11 = scmp.ne.s32.totalorder %s5592_s21, %s4638_s25  ;;  %p4647_p0 = scmp.lt.s32.totalorder %s4638_s25, %s4638_s25 }
 0x201   : > { %p4641_p12 = pnand %p4639_p11, %p6487_p10  ;;  %p4648_p5 = por %p4647_p0, %p4646_p8 }
 0x203   : > { %p4642_p6 = pneg %p4641_p12 }
 0x205   : > { %p4649_p2 = pnand %p4648_p5, %p4642_p6 }
 0x207   : > { %4652 = shalt.err (!%p4649_p2)
}
 0x208   : > { %3871 = dma.hbm_to_vmem [thread:$0]  (!%p6488_p13), %s6495_s19, 256, %s5592_s21, [#allocation31], %s6492_s7, %s6492_s7, %s6491_s1  }
 0x209   : > { %s5005_s22 = smov [#allocation35]   ;;  %s5006_s23 = smov [#allocation38]  }
 0x20a   : > { %s852_s17 = sshll.u32 %s5005_s22, 4  ;;  %s876_s4 = sshll.u32 %s5006_s23, 4  ;;  %s853_s17 = int_to_ptr.vmem [resolvable:$true] %s852_s17  ;;  %s5638_s4 = int_to_ptr.vmem [resolvable:$true] %s876_s4 }
 0x20b   : > { %s6496_s12 = sld [smem:[#allocation87_spill]] }
 0x211   : > { %s4653_s25 = scalar_lea.hbm %s6496_s12, 256 }
 0x212   : > { %p4654_p7 = scmp.ne.s32.totalorder %s6496_s12, %s4653_s25  ;;  %p4660_p9 = scmp.lt.u32.totalorder %s4653_s25, %s6496_s12 }
 0x214   : > { %p4656_p1 = pnand %p4654_p7, %p6487_p10 }
 0x216   : > { %p4657_p4 = pneg %p4656_p1 }
 0x218   : > { %p4662_p3 = pnand %p4660_p9, %p4657_p4 }
 0x21a   : > { %4665 = shalt.err (!%p4662_p3)
}
 0x21b   : > { %s4666_s28 = scalar_lea.vmem %s853_s17, 256  ;;  %p4674_p8 = scmp.lt.s32.totalorder %s853_s17, %s853_s17 }
 0x21c   : > { %p4667_p11 = scmp.ne.s32.totalorder %s853_s17, %s4666_s28  ;;  %p4675_p0 = scmp.lt.s32.totalorder %s4666_s28, %s4666_s28 }
 0x21e   : > { %p4669_p12 = pnand %p4667_p11, %p6487_p10  ;;  %p4676_p5 = por %p4675_p0, %p4674_p8 }
 0x220   : > { %p4670_p6 = pneg %p4669_p12 }
 0x222   : > { %p4677_p2 = pnand %p4676_p5, %p4670_p6 }
 0x224   : > { %4680 = shalt.err (!%p4677_p2)
}
 0x225   : > { %3877 = dma.hbm_to_vmem [thread:$0]  (!%p6488_p13), %s6496_s12, 256, %s853_s17, [#allocation34], %s6492_s7, %s6492_s7, %s6491_s1  }
 0x226   : > { %s6497_s10 = sld [smem:[#allocation89_spill]] }
 0x22c   : > { %s6498_s2 = smov %s6497_s10  ;;  %s4681_s25 = scalar_lea.hbm %s6497_s10, 128 }
 0x22d   : > { %p4682_p7 = scmp.ne.s32.totalorder %s6498_s2, %s4681_s25  ;;  %p4688_p9 = scmp.lt.u32.totalorder %s4681_s25, %s6498_s2 }
 0x22f   : > { %p4684_p1 = pnand %p4682_p7, %p6487_p10 }
 0x231   : > { %p4685_p4 = pneg %p4684_p1 }
 0x233   : > { %p4690_p3 = pnand %p4688_p9, %p4685_p4 }
 0x235   : > { %4693 = shalt.err (!%p4690_p3)
}
 0x236   : > { %s4694_s17 = scalar_lea.vmem %s5638_s4, 128  ;;  %p4702_p8 = scmp.lt.s32.totalorder %s5638_s4, %s5638_s4 }
 0x237   : > { %p4695_p11 = scmp.ne.s32.totalorder %s5638_s4, %s4694_s17  ;;  %p4703_p0 = scmp.lt.s32.totalorder %s4694_s17, %s4694_s17 }
 0x239   : > { %p4697_p12 = pnand %p4695_p11, %p6487_p10  ;;  %p4704_p5 = por %p4703_p0, %p4702_p8 }
 0x23b   : > { %p4698_p6 = pneg %p4697_p12 }
 0x23d   : > { %p4705_p2 = pnand %p4704_p5, %p4698_p6 }
 0x23f   : > { %4708 = shalt.err (!%p4705_p2)
}
 0x240   : > { %3883 = dma.hbm_to_vmem [thread:$0]  (!%p6488_p13), %s6498_s2, 128, %s5638_s4, [#allocation37], %s6492_s7, %s6492_s7, %s6491_s1  }
 0x241   : > { %s5007_s15 = smov [#allocation39]   ;;  %s6499_s25 = sld [smem:[#allocation69_spill]] }
 0x242   : > { %s890_s22 = sshll.u32 %s5007_s15, 4  ;;  %s6500_s17 = sld [smem:[#allocation90_spill]]  ;;  %s891_s22 = int_to_ptr.vmem [resolvable:$true] %s890_s22 }
 0x247   : > { %s5691_s11 = scalar_lea.hbm %s6499_s25, %s5404_s20 }
 0x248   : > { %s4709_s12 = scalar_lea.hbm %s6500_s17, 16 }
 0x249   : > { %p4710_p7 = scmp.ne.s32.totalorder %s6500_s17, %s4709_s12  ;;  %p4716_p9 = scmp.lt.u32.totalorder %s4709_s12, %s6500_s17 }
 0x24b   : > { %p4712_p1 = pnand %p4710_p7, %p6487_p10 }
 0x24d   : > { %p4713_p4 = pneg %p4712_p1 }
 0x24f   : > { %p4718_p3 = pnand %p4716_p9, %p4713_p4 }
 0x251   : > { %4721 = shalt.err (!%p4718_p3)
}
 0x252   : > { %s4722_s4 = scalar_lea.vmem %s891_s22, 16  ;;  %s4729_s19 = scalar_lea.vmem %s891_s22, 32 }
 0x253   : > { %p4723_p11 = scmp.ne.s32.totalorder %s891_s22, %s4722_s4  ;;  %p4730_p8 = scmp.lt.s32.totalorder %s891_s22, %s891_s22 }
 0x254   : > { %p4731_p0 = scmp.lt.s32.totalorder %s4729_s19, %s4722_s4 }
 0x255   : > { %p4725_p12 = pnand %p4723_p11, %p6487_p10 }
 0x256   : > { %p4732_p5 = por %p4731_p0, %p4730_p8 }
 0x257   : > { %p4726_p6 = pneg %p4725_p12 }
 0x259   : > { %p4733_p2 = pnand %p4732_p5, %p4726_p6 }
 0x25b   : > { %4736 = shalt.err (!%p4733_p2)
}
 0x25c   : > { %3886 = dma.hbm_to_vmem [thread:$0]  (!%p6488_p13), %s6500_s17, 16, %s891_s22, [#allocation40]  }
 0x25d   : > { %s905_s9 = scalar_lea.vmem [#allocation6], %s5407_s6  ;;  %s6501_s23 = sld [smem:[#allocation71_spill]] }
 0x25e   : > { %s913_s12 = sshll.u32 %s905_s9, 4  ;;  %s902_s10 = scalar_lea.sflag [#allocation7], %s5401_s24  ;;  %s5712_s12 = int_to_ptr.vmem [resolvable:$true] %s913_s12 }
 0x25f   : > { %s4737_s21 = scalar_lea.hbm %s5691_s11, 128  ;;  %p6502_p7 = scmp.ne.s32.totalorder %s6481_s27, 0 }
 0x260   : > { %p4738_p10 = scmp.ne.s32.totalorder %s5691_s11, %s4737_s21  ;;  %s4742_s7 = scalar_lea.hbm %s6499_s25, 256 }
 0x261   : > { %p4743_p13 = scmp.lt.u32.totalorder %s5691_s11, %s6499_s25  ;;  %p4744_p9 = scmp.lt.u32.totalorder %s4742_s7, %s4737_s21 }
 0x262   : > { %p4740_p1 = pnand %p4738_p10, %p6502_p7  ;;  %p4746_p11 = scmp.lt.u32.totalorder %s4737_s21, %s5691_s11 }
 0x263   : > { %s5718_s0 = scalar_lea.hbm %s6501_s23, %s5404_s20  ;;  %p4745_p3 = por %p4744_p9, %p4743_p13 }
 0x264   : > { %p4741_p4 = pneg %p4740_p1 }
 0x265   : > { %p4747_p12 = por %p4746_p11, %p4745_p3 }
 0x267   : > { %p4748_p6 = pnand %p4747_p12, %p4741_p4 }
 0x269   : > { %4751 = shalt.err (!%p4748_p6)
}
 0x26a   : > { %s4752_s20 = scalar_lea.vmem %s5712_s12, 128  ;;  %s5008_s19 = smov [#allocation6]  }
 0x26b   : > { %p4753_p8 = scmp.ne.s32.totalorder %s5712_s12, %s4752_s20  ;;  %s4757_s8 = sshll.u32 %s5008_s19, 4  ;;  %s4758_s8 = int_to_ptr.vmem [resolvable:$false] %s4757_s8 }
 0x26c   : > { %s4759_s29 = scalar_lea.vmem %s4758_s8, 256  ;;  %p4760_p2 = scmp.lt.s32.totalorder %s5712_s12, %s4758_s8 }
 0x26d   : > { %p4755_p0 = pnand %p4753_p8, %p6502_p7  ;;  %p4761_p10 = scmp.lt.s32.totalorder %s4759_s29, %s4752_s20 }
 0x26f   : > { %p4756_p5 = pneg %p4755_p0  ;;  %p4762_p1 = por %p4761_p10, %p4760_p2 }
 0x271   : > { %p4763_p13 = pnand %p4762_p1, %p4756_p5 }
 0x273   : > { %4766 = shalt.err (!%p4763_p13)
}
 0x274   : > { %p6503_p4 = scmp.ne.s32.totalorder %s6479_s18, 0  ;;  %s943_s9 = scalar_lea.vmem [#allocation11], %s5407_s6 }
 0x275   : > { %s951_s13 = sshll.u32 %s943_s9, 4  ;;  %s6504_s15 = sshll.u32 %s5401_s24, 2  ;;  %s952_s13 = int_to_ptr.vmem [resolvable:$true] %s951_s13 }
 0x276   : > { %3890 = dma.hbm_to_vmem [thread:$0]  (!%p6503_p4), %s5691_s11, 128, %s5712_s12, %s902_s10  }
 0x277   : > { %s981_s21 = scalar_lea.vmem [#allocation14], %s6504_s15  ;;  %s4767_s1 = scalar_lea.hbm %s5718_s0, 128 }
 0x278   : > { %s989_s28 = sshll.u32 %s981_s21, 4  ;;  %p4768_p9 = scmp.ne.s32.totalorder %s5718_s0, %s4767_s1  ;;  %s5745_s28 = int_to_ptr.vmem [resolvable:$true] %s989_s28 }
 0x279   : > { %s4772_s4 = scalar_lea.hbm %s6501_s23, 256  ;;  %p4773_p12 = scmp.lt.u32.totalorder %s5718_s0, %s6501_s23 }
 0x27a   : > { %p4770_p3 = pnand %p4768_p9, %p6502_p7  ;;  %p4774_p6 = scmp.lt.u32.totalorder %s4772_s4, %s4767_s1 }
 0x27b   : > { %p4776_p0 = scmp.lt.u32.totalorder %s4767_s1, %s5718_s0 }
 0x27c   : > { %p4771_p11 = pneg %p4770_p3  ;;  %p4775_p8 = por %p4774_p6, %p4773_p12 }
 0x27e   : > { %p4777_p5 = por %p4776_p0, %p4775_p8 }
 0x280   : > { %p4778_p2 = pnand %p4777_p5, %p4771_p11 }
 0x282   : > { %4781 = shalt.err (!%p4778_p2)
}
 0x283   : > { %s4782_s24 = scalar_lea.vmem %s952_s13, 128  ;;  %s5009_s6 = smov [#allocation11]  }
 0x284   : > { %p4783_p10 = scmp.ne.s32.totalorder %s952_s13, %s4782_s24  ;;  %s4787_s11 = sshll.u32 %s5009_s6, 4  ;;  %s4788_s11 = int_to_ptr.vmem [resolvable:$false] %s4787_s11 }
 0x285   : > { %s4789_s12 = scalar_lea.vmem %s4788_s11, 256  ;;  %p4790_p9 = scmp.lt.s32.totalorder %s952_s13, %s4788_s11 }
 0x286   : > { %p4785_p1 = pnand %p4783_p10, %p6502_p7  ;;  %p4791_p3 = scmp.lt.s32.totalorder %s4789_s12, %s4782_s24 }
 0x288   : > { %p4786_p13 = pneg %p4785_p1  ;;  %p4792_p4 = por %p4791_p3, %p4790_p9 }
 0x28a   : > { %p4793_p6 = pnand %p4792_p4, %p4786_p13 }
 0x28c   : > { %4796 = shalt.err (!%p4793_p6)
}
 0x28d   : > { %p6505_p12 = scmp.ne.s32.totalorder %s6479_s18, 0  ;;  %s4797_s10 = scalar_lea.hbm %s5471_s14, 64 }
 0x28e   : > { %p4798_p11 = scmp.ne.s32.totalorder %s5471_s14, %s4797_s10  ;;  %s4802_s9 = scalar_lea.hbm %s6483_s30, 128 }
 0x28f   : > { %3896 = dma.hbm_to_vmem [thread:$0]  (!%p6505_p12), %s5718_s0, 128, %s952_s13, %s5427_s5  }
 0x290   : > { %p4800_p8 = pnand %p4798_p11, %p6502_p7  ;;  %p4803_p4 = scmp.lt.u32.totalorder %s5471_s14, %s6483_s30 }
 0x291   : > { %p4804_p5 = scmp.lt.u32.totalorder %s4802_s9, %s4797_s10  ;;  %p4806_p10 = scmp.lt.u32.totalorder %s4797_s10, %s5471_s14 }
 0x292   : > { %p4801_p0 = pneg %p4800_p8 }
 0x293   : > { %p4805_p2 = por %p4804_p5, %p4803_p4 }
 0x295   : > { %p4807_p1 = por %p4806_p10, %p4805_p2 }
 0x297   : > { %p4808_p13 = pnand %p4807_p1, %p4801_p0 }
 0x299   : > { %4811 = shalt.err (!%p4808_p13)
}
 0x29a   : > { %s4812_s5 = scalar_lea.vmem %s5745_s28, 64  ;;  %s5010_s0 = smov [#allocation14]  }
 0x29b   : > { %p4813_p9 = scmp.ne.s32.totalorder %s5745_s28, %s4812_s5  ;;  %s4817_s13 = sshll.u32 %s5010_s0, 4  ;;  %s4818_s13 = int_to_ptr.vmem [resolvable:$false] %s4817_s13 }
 0x29c   : > { %s4819_s1 = scalar_lea.vmem %s4818_s13, 128  ;;  %p4820_p11 = scmp.lt.s32.totalorder %s5745_s28, %s4818_s13 }
 0x29d   : > { %p4815_p3 = pnand %p4813_p9, %p6502_p7  ;;  %p4821_p8 = scmp.lt.s32.totalorder %s4819_s1, %s4812_s5 }
 0x29f   : > { %p4816_p6 = pneg %p4815_p3  ;;  %p4822_p4 = por %p4821_p8, %p4820_p11 }
 0x2a1   : > { %p4823_p5 = pnand %p4822_p4, %p4816_p6 }
 0x2a3   : > { %4826 = shalt.err (!%p4823_p5)
}
 0x2a4   : > { %3902 = dma.hbm_to_vmem [thread:$0]  (!%p6505_p12), %s5471_s14, 64, %s5745_s28, %s5475_s26  }
 0x2a5   : > { %s6506_s7 = sld [smem:[#allocation64_spill]] }
 0x2ab   : > { %p6507_p0 = scmp.ne.s32.totalorder %s6506_s7, 0 }
 0x2ac   : > { %s5790_s27 = sand.u32 (!%p6507_p0), 1, %s4969_s16   ;;  %p6508_p7 = scmp.ne.s32.totalorder (!%p6507_p0), %s6473_s3, 0 }
 0x2ad   : > { %998 = sbr.rel (%p6507_p0) target bundleno = 2580 (0xa14), region = 116  ;;  %s5793_s22 = sshll.u32 (!%p6507_p0), %s5790_s27, 3 }
 0x2ae   : > { %s1001_s4 = scalar_lea.sflag (!%p6507_p0), [#allocation7], %s5790_s27  ;;  %s1004_s20 = scalar_lea.vmem (!%p6507_p0), [#allocation6], %s5793_s22 }
 0x2b4   : > { %4908 = dma.done.wait (%p6508_p7), %s1001_s4, 128  }
 0x2b5   : > { %4910 = vsyncadd (%p6508_p7), %s1001_s4, 4294967168  ;;  %s6509_s26 = sld [smem:[#allocation63_spill]]  ;;  %s1013_s28 = scalar_lea.vmem [#allocation9], %s5793_s22 }
 0x2bb   : > { %s1009_s18 = sand.u32 1, %s6509_s26  }
 0x2bc   : > { %s1010_s14 = scalar_lea.sflag [#allocation10], %s1009_s18 }
 0x2bd   : > { %4912 = dma.done.wait (%p6508_p7), %s1010_s14, 256  }
 0x2be   : > { %4914 = vsyncadd (%p6508_p7), %s1010_s14, 4294967040  ;;  %s5808_s19 = sshll.u32 %s5790_s27, 2  ;;  %s1022_s24 = scalar_lea.vmem [#allocation11], %s5793_s22 }
 0x2bf   : > { %s1028_s6 = scalar_lea.sflag [#allocation13], %s1009_s18  ;;  %s1031_s11 = scalar_lea.vmem [#allocation12], %s5808_s19 }
 0x2c0   : > { %4916 = dma.done.wait (%p6508_p7), %s1028_s6, 128  }
 0x2c1   : > { %4918 = vsyncadd (%p6508_p7), %s1028_s6, 4294967168  ;;  %s1040_s12 = scalar_lea.vmem [#allocation14], %s5808_s19  ;;  %p6510_p12 = scmp.eq.s32.totalorder %s6509_s26, 0 }
 0x2c3   : > { %4920 = dma.done.wait (%p6510_p12), [#allocation16], 32   ;;  %p6511_p2 = pmov %p6510_p12 }
 0x2c5   : > { %4922 = vsyncadd (%p6511_p2), [#allocation16], 4294967264  ;;  %p6512_p10 = pmov %p6511_p2 }
 0x2c6   : > { %p6513_p1 = pmov %p6511_p2 }
 0x2c7   : > { %4924 = dma.done.wait (%p6512_p10), [#allocation19], 144  }
 0x2c8   : > { %4926 = vsyncadd (%p6513_p1), [#allocation19], 4294967152  ;;  %p6514_p13 = pmov %p6513_p1 }
 0x2c9   : > { %p6515_p9 = pmov %p6513_p1 }
 0x2ca   : > { %4928 = dma.done.wait (%p6514_p13), [#allocation22], 272  }
 0x2cb   : > { %4930 = vsyncadd (%p6515_p9), [#allocation22], 4294967024  ;;  %p6516_p3 = pmov %p6513_p1 }
 0x2cc   : > { %p6517_p6 = pmov %p6513_p1 }
 0x2cd   : > { %4932 = dma.done.wait (%p6516_p3), [#allocation25], 272  }
 0x2ce   : > { %4934 = vsyncadd (%p6517_p6), [#allocation25], 4294967024  ;;  %p6518_p11 = pmov %p6513_p1 }
 0x2cf   : > { %p6519_p8 = pmov %p6513_p1 }
 0x2d0   : > { %4936 = dma.done.wait (%p6518_p11), [#allocation28], 32  }
 0x2d1   : > { %4938 = vsyncadd (%p6519_p8), [#allocation28], 4294967264  ;;  %p6520_p4 = pmov %p6513_p1 }
 0x2d2   : > { %p6521_p5 = pmov %p6513_p1 }
 0x2d3   : > { %4940 = dma.done.wait (%p6520_p4), [#allocation31], 288  }
 0x2d4   : > { %4942 = vsyncadd (%p6521_p5), [#allocation31], 4294967008  ;;  %p6522_p0 = pmov %p6513_p1 }
 0x2d6   : > { %4944 = dma.done.wait (%p6522_p0), [#allocation34], 272   ;;  %p6523_p7 = pmov %p6522_p0 }
 0x2d7   : > { %p6524_p12 = pmov %p6522_p0 }
 0x2d8   : > { %4946 = vsyncadd (%p6523_p7), [#allocation34], 4294967024 }
 0x2d9   : > { %4948 = dma.done.wait (%p6524_p12), [#allocation37], 144   ;;  %p6525_p2 = pmov %p6522_p0 }
 0x2da   : > { %p6526_p10 = pmov %p6522_p0 }
 0x2db   : > { %4950 = vsyncadd (%p6525_p2), [#allocation37], 4294967152 }
 0x2dc   : > { %4952 = dma.done.wait (%p6526_p10), [#allocation40], 16   ;;  %p6527_p1 = pmov %p6522_p0 }
 0x2dd   : > { %v1215_v2 = vlaneseq  ;;  %v1203_v9 = vld [vmem:[%s1031_s11] sm:$0x7]  ;;  %v5011_v13 = vmov 1966171168   ;;  %vm1560_vm0 = vcmask 130048   ;;  %vm1211_vm1 = vcmask 261120  }
 0x2de   : > { %4954 = vsyncadd (%p6527_p1), [#allocation40], 4294967280  ;;  %v1246_v14 = vunpack.c.l.s4 %v5011_v13  ;;  %v3574_v17 = vld.sshfl [vmem:[%s1040_s12] sm:$0x13 pattern:$0x75316420] }
 0x2df   : > { %v1216_v3 = vshrl.u32 %v1215_v2, 7  ;;  %v2482_v4 = vand.u32 127, %v1215_v2  ;;  %v1244_v20 = vcombine.high %v3574_v17, %v3574_v17  ;;  %vm1910_vm2 = vcmask 1041409   ;;  %s1192_s3 = scalar_lea.vmem [#allocation41], %s5793_s22  ;;  %s6528_s10 = sld [smem:[#allocation60_spill]] }
 0x2e0   : > { %v1247_v15 = vunpack.c.0.s8 %v1246_v14  ;;  %vm1912_vm3 = vcmask 1042434   ;;  %vm5014_vm4 = vmmov 0   ;;  %vm1914_vm5 = vcmask 1043459   ;;  %s6529_s8 = sld [smem:[#allocation66_spill]]  ;;  %s6530_s21 = sld [smem:[#allocation91_spill]] }
 0x2e1   : > { %v5853_v5 = vsub.s32 0, %v1216_v3  ;;  %v5855_v6 = vsub.s32 2, %v1216_v3  ;;  %v5857_v7 = vsub.s32 %v2482_v4, %v1216_v3  ;;  %v5859_v8 = vsub.s32 1, %v1216_v3  ;;  %s3136_s0 = sshll.u32 %s1192_s3, 4  ;;  %s3117_s13 = scalar_lea.sflag [#allocation8], %s5790_s27  ;;  %s3137_s0 = int_to_ptr.vmem [resolvable:$true] %s3136_s0 }
 0x2e2   : > { %v5866_v16 = vsub.s32 %v1247_v15, %v1216_v3  ;;  %v5877_v40 = vsub.s32 6, %v1216_v3  ;;  %v5883_v44 = vsub.s32 3, %v1216_v3  ;;  %v5885_v45 = vsub.s32 5, %v1216_v3  ;;  %s4827_s1 = scalar_lea.vmem %s3137_s0, 128  ;;  %s5015_s7 = smov [#allocation41]  }
 0x2e3   : > { %v1232_v10 = vrot.slane %v1203_v9, %v5855_v6  ;;  %v1218_v11 = vrot.slane %v1203_v9, %v5853_v5  ;;  %v1225_v12 = vrot.slane %v1203_v9, %v5859_v8  ;;  %v5887_v46 = vsub.s32 4, %v1216_v3  ;;  %p4828_p13 = scmp.ne.s32.totalorder %s3137_s0, %s4827_s1  ;;  %s4831_s4 = sshll.u32 %s5015_s7, 4  ;;  %s4832_s4 = int_to_ptr.vmem [resolvable:$false] %s4831_s4 }
 0x2e4   : > { %v1251_v18 = vrot.slane %v3574_v17, %v5866_v16  ;;  %v1258_v23 = vrot.slane %v1244_v20, %v5866_v16  ;;  %v5901_v54 = vsub.s32 7, %v1216_v3  ;;  %vm1916_vm6 = vcmask 1044484   ;;  %p4834_p11 = scmp.lt.s32.totalorder %s3137_s0, %s4832_s4 }
 0x2e5   : > { %1234 = vbcast.lane.b32.xlu1 %v1232_v10, 256  ;;  %1220 = vbcast.lane.b32.xlu0 %v1218_v11, 256  ;;  %vm1918_vm7 = vcmask 1045509   ;;  %vm1920_vm8 = vcmask 1046534   ;;  %vm1922_vm9 = vcmask 1047559   ;;  %vm2843_vm10 = vcmask 1041408  }
 0x2e6   : > { %v1259_v19 = vcombine.high %v1251_v18, %v1251_v18  ;;  %v1263_v22 = vrot.slane %v1251_v18, %v5853_v5  ;;  %v1267_v28 = vrot.slane %v1258_v23, %v5853_v5  ;;  %vm2919_vm11 = vcmask 31744   ;;  %s3657_s29 = sshll.u32 %s6528_s10, 7  ;;  %p6531_p9 = scmp.ne.s32.totalorder %s6529_s8, 0 }
 0x2e7   : > { %vm2523_vm12 = vcmask 64512   ;;  %vm1213_vm13 = vcmask 59392   ;;  %s6262_s5 = scalar_lea.hbm %s6530_s21, %s3657_s29 }
 0x2e8   : > { %v1271_v21 = vrot.slane %v1259_v19, %v5853_v5  ;;  %p4829_p3 = pnand %p4828_p13, %p6531_p9 }
 0x2e9   : > { %1227 = vbcast.lane.b32.xlu0 %v1225_v12, 256 }
 0x2ea   : > { %p4830_p6 = pneg %p4829_p3 }
 0x357   : > { %v1235_v24 = vpop.permute.xlu1 %1234  ;;  %v1221_v25 = vpop.permute.xlu0 %1220 }
 0x358   : > { %v1277_v26 = vsub.f32 %v1235_v24, %v1271_v21  ;;  %v1275_v27 = vsub.f32 %v1221_v25, %v1263_v22  ;;  %v4020_v24 = vld [vmem:[#allocation18] sm:$0xff]   ;;  %v1201_v25 = vld [vmem:[%s1013_s28] sm:$0xff] }
 0x359   : > { %3688 = vmatprep.subr.bf16.mxu0 %v4020_v24 }
 0x35a   : > { %v1280_v29 = vmul.f32 0.15915494, %v1277_v26  ;;  %v1278_v30 = vmul.f32 0.15915494, %v1275_v27  ;;  %3689 = vmatpush3.bf16.msra.mxu0 %v4020_v24 }
 0x35b   : > { %v1228_v31 = vpop.permute.xlu0 %1227 }
 0x35c   : > { %v3752_v32 = vround.rtne.f32 %v1280_v29  ;;  %v3750_v33 = vround.rtne.f32 %v1278_v30  ;;  %v1276_v34 = vsub.f32 %v1228_v31, %v1267_v28 }
 0x35e   : > { %v1284_v35 = vmul.f32 6.2831855, %v3750_v33  ;;  %v1279_v36 = vmul.f32 0.15915494, %v1276_v34  ;;  %v1286_v37 = vmul.f32 6.2831855, %v3752_v32 }
 0x360   : > { %v3751_v38 = vround.rtne.f32 %v1279_v36  ;;  %v5875_v39 = vsub.f32 %v1275_v27, %v1284_v35  ;;  %v5879_v42 = vsub.f32 %v1277_v26, %v1286_v37  ;;  %v1303_v26 = vrot.slane %v1201_v25, %v5866_v16  ;;  %v1202_v37 = vld [vmem:[%s1022_s24] sm:$0xff] }
 0x361   : > { %v1296_v27 = vcombine.high %v1201_v25, %v1201_v25 }
 0x362   : > { %v1285_v41 = vmul.f32 6.2831855, %v3751_v38  ;;  %v2422_v47 = vrot.slane %v5875_v39, %v5877_v40  ;;  %v1290_v48 = vmul.f32 %v5875_v39, %v5875_v39  ;;  %v1292_v52 = vmul.f32 %v5879_v42, %v5879_v42  ;;  %v3575_v38 = vld [vmem:[#allocation15] ss:$0 sm:$0xff] }
 0x363   : > { %v2714_v56 = vrot.slane %v5879_v42, %v5885_v45  ;;  %v2401_v58 = vrot.slane %v5875_v39, %v5883_v44  ;;  %v2408_v0 = vrot.slane %v5875_v39, %v5887_v46  ;;  %v2700_v1 = vrot.slane %v5879_v42, %v5883_v44 }
 0x364   : > { %v5881_v43 = vsub.f32 %v1276_v34, %v1285_v41  ;;  %v2415_v2 = vrot.slane %v5875_v39, %v5885_v45  ;;  %v2707_v4 = vrot.slane %v5879_v42, %v5887_v46  ;;  %v2429_v10 = vrot.slane %v5875_v39, %v5901_v54 }
 0x365   : > { %v2721_v11 = vrot.slane %v5879_v42, %v5877_v40  ;;  %v2728_v12 = vrot.slane %v5879_v42, %v5901_v54  ;;  %v1311_v28 = vcombine.high %v1303_v26, %v1303_v26  ;;  %v1310_v29 = vrot.slane %v1296_v27, %v5866_v16 }
 0x366   : > { %v1291_v49 = vmul.f32 %v5881_v43, %v5881_v43  ;;  %v2552_v50 = vrot.slane %v5881_v43, %v5883_v44  ;;  %v2559_v51 = vrot.slane %v5881_v43, %v5887_v46  ;;  %v2566_v55 = vrot.slane %v5881_v43, %v5885_v45 }
 0x367   : > { %v2580_v59 = vrot.slane %v5881_v43, %v5901_v54  ;;  %v2573_v9 = vrot.slane %v5881_v43, %v5877_v40  ;;  %v1333_v30 = vrot.slane %v1311_v28, %v5866_v16  ;;  %v1319_v31 = vrot.slane %v1303_v26, %v5866_v16 }
 0x368   : > { %v1293_v53 = vadd.f32 %v1291_v49, %v1290_v48  ;;  %v1312_v32 = vcombine.high %v1310_v29, %v1310_v29 }
 0x369   : > { %v1352_v33 = vrot.slane %v1333_v30, %v5853_v5  ;;  %v1348_v34 = vrot.slane %v1319_v31, %v5853_v5  ;;  %v1343_v35 = vcombine.high %v1333_v30, %v1333_v30  ;;  %v1341_v36 = vcombine.high %v1319_v31, %v1319_v31 }
 0x36a   : > { %v1294_v57 = vadd.f32 %v1293_v53, %v1292_v52  ;;  %v1340_v41 = vrot.slane %v1312_v32, %v5866_v16 }
 0x36b   : > { %v1386_v48 = vadd.f32 %v1352_v33, %v1202_v37  ;;  %v1385_v49 = vadd.f32 %v1348_v34, %v1202_v37  ;;  %v1360_v52 = vrot.slane %v1343_v35, %v5853_v5  ;;  %v1356_v53 = vrot.slane %v1341_v36, %v5853_v5 }
 0x36c   : > { %v1403_v60 = vrot.slane %v1294_v57, %v5859_v8  ;;  %v2301_v61 = vadd.f32 6.2831855, %v1294_v57  ;;  %v1396_v62 = vrot.slane %v1294_v57, %v5853_v5  ;;  %v1417_v63 = vrot.slane %v1294_v57, %v5883_v44 }
 0x36d   : > { %v1410_v3 = vrot.slane %v1294_v57, %v5855_v6  ;;  %v1431_v13 = vrot.slane %v1294_v57, %v5885_v45  ;;  %v1424_v14 = vrot.slane %v1294_v57, %v5887_v46  ;;  %v1445_v17 = vrot.slane %v1294_v57, %v5901_v54 }
 0x36e   : > { %4030 = vrcp.f32 %v2301_v61  ;;  %1405 = vbcast.lane.b32.xlu0 %v1403_v60, 256  ;;  %1398 = vbcast.lane.b32.xlu1 %v1396_v62, 256  ;;  %v1438_v18 = vrot.slane %v1294_v57, %v5877_v40  ;;  %v1326_v61 = vrot.slane %v1310_v29, %v5866_v16  ;;  %v1388_v25 = vadd.f32 %v1360_v52, %v1202_v37 }
 0x36f   : > { %v1387_v26 = vadd.f32 %v1356_v53, %v1202_v37 }
 0x370   : > { %v1364_v30 = vrot.slane %v1326_v61, %v5853_v5 }
 0x372   : > { %1419 = vbcast.lane.b32.xlu0 %v1417_v63, 256  ;;  %1412 = vbcast.lane.b32.xlu1 %v1410_v3, 256  ;;  %v3576_v3 = vld [vmem:[#allocation17] ss:$0 sm:$0xff] }
 0x376   : > { %1433 = vbcast.lane.b32.xlu0 %v1431_v13, 256  ;;  %1426 = vbcast.lane.b32.xlu1 %v1424_v14, 256  ;;  %v1368_v13 = vrot.slane %v1340_v41, %v5853_v5  ;;  %v1344_v14 = vcombine.high %v1340_v41, %v1340_v41 }
 0x378   : > { %v5933_v15 = vpop.eup %4030  ;;  %v1390_v33 = vadd.f32 %v1368_v13, %v1202_v37  ;;  %v1376_v34 = vrot.slane %v1344_v14, %v5853_v5 }
 0x379   : > { %v2328_v19 = vrot.slane %v5933_v15, %v5883_v44  ;;  %v2342_v20 = vrot.slane %v5933_v15, %v5885_v45  ;;  %v2349_v21 = vrot.slane %v5933_v15, %v5877_v40  ;;  %v2356_v22 = vrot.slane %v5933_v15, %v5901_v54 }
 0x37a   : > { %1447 = vbcast.lane.b32.xlu0 %v1445_v17, 256  ;;  %1440 = vbcast.lane.b32.xlu1 %v1438_v18, 256  ;;  %v2335_v23 = vrot.slane %v5933_v15, %v5887_v46  ;;  %v1342_v17 = vcombine.high %v1326_v61, %v1326_v61  ;;  %v1392_v13 = vadd.f32 %v1376_v34, %v1202_v37 }
 0x37c   : > { %v1372_v35 = vrot.slane %v1342_v17, %v5853_v5 }
 0x3e0   : > { %v1406_v57 = vpop.permute.xlu0 %1405  ;;  %v1399_v60 = vpop.permute.xlu1 %1398 }
 0x3e1   : > { %v1457_v62 = vmul.f32 %v3575_v38, %v1406_v57  ;;  %v1456_v63 = vmul.f32 %v3575_v38, %v1399_v60  ;;  %v1389_v57 = vadd.f32 %v1364_v30, %v1202_v37 }
 0x3e3   : > { %v1465_v18 = vadd.f32 %v1457_v62, %v1386_v48  ;;  %v1464_v24 = vadd.f32 %v1456_v63, %v1385_v49 }
 0x3e4   : > { %v1420_v27 = vpop.permute.xlu0 %1419  ;;  %v1413_v28 = vpop.permute.xlu1 %1412 }
 0x3e5   : > { %v5963_v31 = vadd.f32 %v3576_v3, %v1465_v18  ;;  %v5965_v32 = vadd.f32 %v3576_v3, %v1464_v24  ;;  %v1459_v16 = vmul.f32 %v3575_v38, %v1420_v27  ;;  %v1458_v29 = vmul.f32 %v3575_v38, %v1413_v28 }
 0x3e6   : > { %v1391_v24 = vadd.f32 %v1372_v35, %v1202_v37 }
 0x3e7   : > { %v3578_v36 = vmul.f32 -1.442695, %v5963_v31  ;;  %v3577_v41 = vmul.f32 -1.442695, %v5965_v32  ;;  %v1467_v48 = vadd.f32 %v1459_v16, %v1388_v25  ;;  %v1466_v49 = vadd.f32 %v1458_v29, %v1387_v26 }
 0x3e8   : > { %v1434_v52 = vpop.permute.xlu0 %1433  ;;  %v1427_v53 = vpop.permute.xlu1 %1426 }
 0x3e9   : > { %4032 = vpow2.f32 %v3578_v36  ;;  %v1482_v60 = vadd.f32 %v3576_v3, %v1467_v48  ;;  %v5971_v61 = vadd.f32 %v3576_v3, %v1466_v49  ;;  %v1461_v62 = vmul.f32 %v3575_v38, %v1434_v52 }
 0x3ea   : > { %4034 = vpow2.f32 %v3577_v41  ;;  %v1460_v63 = vmul.f32 %v3575_v38, %v1427_v53 }
 0x3eb   : > { %v3580_v14 = vmul.f32 -1.442695, %v1482_v60  ;;  %v3579_v17 = vmul.f32 -1.442695, %v5971_v61  ;;  %v1469_v18 = vadd.f32 %v1461_v62, %v1390_v33 }
 0x3ec   : > { %v1468_v27 = vadd.f32 %v1460_v63, %v1389_v57  ;;  %v1448_v28 = vpop.permute.xlu0 %1447  ;;  %v1441_v25 = vpop.permute.xlu1 %1440 }
 0x3ed   : > { %4036 = vpow2.f32 %v3580_v14  ;;  %v1484_v26 = vadd.f32 %v3576_v3, %v1469_v18  ;;  %v1463_v16 = vmul.f32 %v3575_v38, %v1448_v28  ;;  %v1462_v30 = vmul.f32 %v3575_v38, %v1441_v25 }
 0x3ee   : > { %4038 = vpow2.f32 %v3579_v17  ;;  %v1483_v29 = vadd.f32 %v3576_v3, %v1468_v27 }
 0x3ef   : > { %v3582_v36 = vmul.f32 -1.442695, %v1484_v26  ;;  %v1471_v48 = vadd.f32 %v1463_v16, %v1392_v13  ;;  %v1470_v49 = vadd.f32 %v1462_v30, %v1391_v24 }
 0x3f0   : > { %v3581_v41 = vmul.f32 -1.442695, %v1483_v29 }
 0x3f1   : > { %4040 = vpow2.f32 %v3582_v36  ;;  %v1486_v34 = vadd.f32 %v3576_v3, %v1471_v48  ;;  %v1485_v52 = vadd.f32 %v3576_v3, %v1470_v49 }
 0x3f2   : > { %4042 = vpow2.f32 %v3581_v41 }
 0x3f3   : > { %v4033_v53 = vpop.eup %4032  ;;  %v3584_v33 = vmul.f32 -1.442695, %v1486_v34  ;;  %v3583_v57 = vmul.f32 -1.442695, %v1485_v52 }
 0x3f4   : > { %v4035_v37 = vpop.eup %4034  ;;  %v1512_v35 = vadd.f32 1.0, %v4033_v53 }
 0x3f5   : > { %v1511_v62 = vadd.f32 1.0, %v4035_v37  ;;  %4044 = vpow2.f32 %v3584_v33 }
 0x3f6   : > { %4046 = vrcp.f32 %v1512_v35 }
 0x3f7   : > { %v4037_v63 = vpop.eup %4036  ;;  %4048 = vrcp.f32 %v1511_v62 }
 0x3f8   : > { %v4039_v38 = vpop.eup %4038  ;;  %v1514_v14 = vadd.f32 1.0, %v4037_v63  ;;  %4050 = vpow2.f32 %v3583_v57 }
 0x3f9   : > { %v1513_v13 = vadd.f32 1.0, %v4039_v38 }
 0x3fa   : > { %4052 = vrcp.f32 %v1514_v14 }
 0x3fb   : > { %v4041_v17 = vpop.eup %4040  ;;  %4054 = vrcp.f32 %v1513_v13 }
 0x3fc   : > { %v4043_v18 = vpop.eup %4042  ;;  %v1516_v3 = vadd.f32 1.0, %v4041_v17 }
 0x3fd   : > { %v1515_v24 = vadd.f32 1.0, %v4043_v18 }
 0x3fe   : > { %4056 = vrcp.f32 %v1516_v3 }
 0x3ff   : > { %v4045_v27 = vpop.eup %4044  ;;  %4058 = vrcp.f32 %v1515_v24 }
 0x400   : > { %v4047_v28 = vpop.eup %4046  ;;  %v1518_v25 = vadd.f32 1.0, %v4045_v27 }
 0x401   : > { %v4049_v16 = vpop.eup %4048  ;;  %v1536_v30 = vmul.f32 %v4047_v28, %v5963_v31 }
 0x402   : > { %v4051_v36 = vpop.eup %4050  ;;  %4060 = vrcp.f32 %v1518_v25  ;;  %v1535_v48 = vmul.f32 %v4049_v16, %v5965_v32 }
 0x403   : > { %v1517_v49 = vadd.f32 1.0, %v4051_v36 }
 0x404   : > { %v4053_v41 = vpop.eup %4052  ;;  %v1543_v53 = vpack.c.bf16 %v1536_v30, %v1535_v48 }
 0x405   : > { %v4055_v33 = vpop.eup %4054  ;;  %v1538_v37 = vmul.f32 %v4053_v41, %v1482_v60  ;;  %4062 = vrcp.f32 %v1517_v49 }
 0x406   : > { %v1537_v35 = vmul.f32 %v4055_v33, %v5971_v61  ;;  %3690 = vmatprep.mubr.msk.bf16.mxu0 %vm1560_vm0, %v1543_v53  ;;  %v3585_v61 = vld [vmem:[#allocation20] ss:$0 sm:$0xff] }
 0x408   : > { %v4057_v57 = vpop.eup %4056  ;;  %v1544_v62 = vpack.c.bf16 %v1538_v37, %v1537_v35 }
 0x409   : > { %v4059_v63 = vpop.eup %4058  ;;  %v1540_v38 = vmul.f32 %v4057_v57, %v1484_v26 }
 0x40a   : > { %v1539_v31 = vmul.f32 %v4059_v63, %v1483_v29  ;;  %3691 = vmatmul.mubr.msk.bf16.vlgmr.msra.gmra.mrb[0].mxu0 %vm1560_vm0, %v1544_v62 }
 0x40c   : > { %v4061_v14 = vpop.eup %4060  ;;  %v1545_v32 = vpack.c.bf16 %v1540_v38, %v1539_v31 }
 0x40d   : > { %v1542_v13 = vmul.f32 %v4061_v14, %v1486_v34 }
 0x40e   : > { %3694 = vmatprep.mubr.msk.bf16.mxu0 %vm1560_vm0, %v1545_v32 }
 0x40f   : > { %v4063_v17 = vpop.eup %4062 }
 0x410   : > { %v1541_v18 = vmul.f32 %v4063_v17, %v1485_v52 }
 0x412   : > { %v1546_v60 = vpack.c.bf16 %v1542_v13, %v1541_v18 }
 0x414   : > { %3695 = vmatmul.mubr.msk.bf16.gmra.mrb[4].mxu0 %vm1560_vm0, %v1546_v60 }
 0x4dd   : > { %v3692_v3 = vpop.f32.mrb[0].mxu0 }
 0x4de   : > { %v1616_v24 = vadd.f32 %v3692_v3, %v3585_v61  ;;  %v1607_v27 = vpop.f32.mrb[1].mxu0 }
 0x4df   : > { %v1608_v28 = vadd.f32 %v3585_v61, %v1607_v27  ;;  %v3693_v25 = vpop.f32.mrb[2].mxu0 }
 0x4e0   : > { %v3593_v26 = vmul.f32 -1.442695, %v1616_v24  ;;  %v1619_v29 = vadd.f32 %v3693_v25, %v3585_v61  ;;  %v1610_v16 = vpop.f32.mrb[3].mxu0 }
 0x4e1   : > { %v3591_v30 = vmul.f32 -1.442695, %v1608_v28  ;;  %v1611_v36 = vadd.f32 %v3585_v61, %v1610_v16 }
 0x4e2   : > { %4064 = vpow2.f32 %v3593_v26  ;;  %v3594_v34 = vmul.f32 -1.442695, %v1619_v29 }
 0x4e3   : > { %4066 = vpow2.f32 %v3591_v30  ;;  %v3592_v48 = vmul.f32 -1.442695, %v1611_v36 }
 0x4e4   : > { %4068 = vpow2.f32 %v3594_v34 }
 0x4e5   : > { %4070 = vpow2.f32 %v3592_v48  ;;  %v3599_v48 = vld [vmem:[#allocation21] ss:$0 sm:$0xff] }
 0x4e7   : > { %v3696_v52 = vpop.f32.mrb[4].mxu0 }
 0x4e8   : > { %v5981_v49 = vadd.f32 %v3696_v52, %v3585_v61  ;;  %v1623_v41 = vpop.f32.mrb[5].mxu0 }
 0x4e9   : > { %v1624_v53 = vadd.f32 %v3585_v61, %v1623_v41  ;;  %v3697_v33 = vpop.f32.mrb[6].mxu0 }
 0x4ea   : > { %v3597_v37 = vmul.f32 -1.442695, %v5981_v49  ;;  %v5984_v35 = vadd.f32 %v3697_v33, %v3585_v61  ;;  %v1626_v57 = vpop.f32.mrb[7].mxu0 }
 0x4eb   : > { %v3595_v62 = vmul.f32 -1.442695, %v1624_v53  ;;  %v5986_v63 = vadd.f32 %v3585_v61, %v1626_v57 }
 0x4ec   : > { %v4065_v38 = vpop.eup %4064  ;;  %4072 = vpow2.f32 %v3597_v37  ;;  %v3598_v31 = vmul.f32 -1.442695, %v5984_v35 }
 0x4ed   : > { %v4067_v14 = vpop.eup %4066  ;;  %v1664_v32 = vadd.f32 1.0, %v4065_v38  ;;  %4074 = vpow2.f32 %v3595_v62  ;;  %v3596_v3 = vmul.f32 -1.442695, %v5986_v63 }
 0x4ee   : > { %v4069_v13 = vpop.eup %4068  ;;  %v1662_v17 = vadd.f32 1.0, %v4067_v14  ;;  %4076 = vpow2.f32 %v3598_v31 }
 0x4ef   : > { %v4071_v18 = vpop.eup %4070  ;;  %4078 = vrcp.f32 %v1664_v32  ;;  %v1665_v60 = vadd.f32 1.0, %v4069_v13 }
 0x4f0   : > { %4080 = vrcp.f32 %v1662_v17  ;;  %v1663_v27 = vadd.f32 1.0, %v4071_v18 }
 0x4f1   : > { %4082 = vrcp.f32 %v1665_v60 }
 0x4f2   : > { %4084 = vrcp.f32 %v1663_v27 }
 0x4f3   : > { %4086 = vpow2.f32 %v3596_v3 }
 0x4f6   : > { %v4073_v61 = vpop.eup %4072 }
 0x4f7   : > { %v4075_v25 = vpop.eup %4074  ;;  %v1668_v26 = vadd.f32 1.0, %v4073_v61 }
 0x4f8   : > { %v4077_v16 = vpop.eup %4076  ;;  %v1666_v30 = vadd.f32 1.0, %v4075_v25 }
 0x4f9   : > { %v4079_v34 = vpop.eup %4078  ;;  %4088 = vrcp.f32 %v1668_v26  ;;  %v1669_v33 = vadd.f32 1.0, %v4077_v16 }
 0x4fa   : > { %v4081_v52 = vpop.eup %4080  ;;  %v5990_v41 = vmul.f32 %v4079_v34, %v1616_v24  ;;  %4090 = vrcp.f32 %v1666_v30 }
 0x4fb   : > { %v4083_v37 = vpop.eup %4082  ;;  %v5992_v57 = vmul.f32 %v4081_v52, %v1608_v28  ;;  %4092 = vrcp.f32 %v1669_v33 }
 0x4fc   : > { %v4085_v62 = vpop.eup %4084  ;;  %v5994_v38 = vmul.f32 %v4083_v37, %v1619_v29  ;;  %v1703_v31 = vmul.f32 %v3599_v48, %v5990_v41 }
 0x4fd   : > { %v4087_v14 = vpop.eup %4086  ;;  %v5997_v32 = vmul.f32 %v4085_v62, %v1611_v36  ;;  %v1701_v13 = vmul.f32 %v3599_v48, %v5992_v57 }
 0x4fe   : > { %v1667_v17 = vadd.f32 1.0, %v4087_v14  ;;  %v1716_v24 = vsel %vm1211_vm1, %v1703_v31, 0.0  ;;  %v1704_v60 = vmul.f32 %v3599_v48, %v5994_v38 }
 0x4ff   : > { %1717 = vadd.xlane.f32.xlu0 %v1716_v24  ;;  %v1710_v18 = vsel %vm1211_vm1, %v1701_v13, 0.0  ;;  %v1702_v28 = vmul.f32 %v3599_v48, %v5997_v32  ;;  %v5012_v13 = vmov 0  }
 0x500   : > { %4094 = vrcp.f32 %v1667_v17  ;;  %1711 = vadd.xlane.f32.xlu1 %v1710_v18  ;;  %v1719_v36 = vsel %vm1211_vm1, %v1704_v60, 0.0  ;;  %4017 = vset.pattern.permute.xlu0 %v5012_v13 }
 0x501   : > { %v1713_v29 = vsel %vm1211_vm1, %v1702_v28, 0.0  ;;  %4018 = vset.pattern.permute.xlu1 %v5012_v13 }
 0x503   : > { %v4089_v3 = vpop.eup %4088  ;;  %1714 = vadd.xlane.f32.xlu0 %v1713_v29 }
 0x504   : > { %v4091_v27 = vpop.eup %4090  ;;  %1720 = vadd.xlane.f32.xlu1 %v1719_v36  ;;  %v6007_v61 = vmul.f32 %v4089_v3, %v5981_v49 }
 0x505   : > { %v6009_v25 = vmul.f32 %v4091_v27, %v1624_v53  ;;  %v4093_v16 = vpop.eup %4092 }
 0x506   : > { %v1707_v34 = vmul.f32 %v3599_v48, %v6007_v61  ;;  %v6015_v33 = vmul.f32 %v4093_v16, %v5984_v35  ;;  %v3600_v35 = vld [vmem:[#allocation4] ss:$0 sm:$0xff] }
 0x507   : > { %v1705_v26 = vmul.f32 %v3599_v48, %v6009_v25 }
 0x508   : > { %v1728_v53 = vsel %vm1211_vm1, %v1707_v34, 0.0  ;;  %v1708_v31 = vmul.f32 %v3599_v48, %v6015_v33 }
 0x509   : > { %v1722_v30 = vsel %vm1211_vm1, %v1705_v26, 0.0 }
 0x50a   : > { %v4095_v52 = vpop.eup %4094  ;;  %1723 = vadd.xlane.f32.xlu0 %v1722_v30  ;;  %v1731_v14 = vsel %vm1211_vm1, %v1708_v31, 0.0 }
 0x50b   : > { %v6018_v37 = vmul.f32 %v4095_v52, %v5986_v63 }
 0x50d   : > { %v1706_v49 = vmul.f32 %v3599_v48, %v6018_v37 }
 0x50e   : > { %1729 = vadd.xlane.f32.xlu0 %v1728_v53 }
 0x50f   : > { %v1725_v62 = vsel %vm1211_vm1, %v1706_v49, 0.0 }
 0x510   : > { %1726 = vadd.xlane.f32.xlu1 %v1725_v62 }
 0x514   : > { %1732 = vadd.xlane.f32.xlu1 %v1731_v14 }
 0x58c   : > { %v1718_v17 = vpop.xlane.xlu0 %1717 }
 0x58d   : > { %v1743_v63 = vadd.f32 %v3600_v35, %v1718_v17  ;;  %v1712_v24 = vpop.xlane.xlu1 %1711 }
 0x58e   : > { %v1741_v18 = vadd.f32 %v3600_v35, %v1712_v24 }
 0x58f   : > { %v3603_v28 = vmul.f32 -1.442695, %v1743_v63 }
 0x590   : > { %v3601_v60 = vmul.f32 -1.442695, %v1741_v18  ;;  %v1715_v29 = vpop.xlane.xlu0 %1714 }
 0x591   : > { %4096 = vpow2.f32 %v3603_v28  ;;  %v1742_v3 = vadd.f32 %v3600_v35, %v1715_v29  ;;  %v1721_v36 = vpop.xlane.xlu1 %1720 }
 0x592   : > { %4098 = vpow2.f32 %v3601_v60  ;;  %v1744_v48 = vadd.f32 %v3600_v35, %v1721_v36 }
 0x593   : > { %v3602_v27 = vmul.f32 -1.442695, %v1742_v3 }
 0x594   : > { %v3604_v26 = vmul.f32 -1.442695, %v1744_v48 }
 0x595   : > { %4100 = vpow2.f32 %v3602_v27 }
 0x596   : > { %4102 = vpow2.f32 %v3604_v26 }
 0x597   : > { %v1724_v16 = vpop.xlane.xlu0 %1723 }
 0x598   : > { %v1745_v30 = vadd.f32 %v3600_v35, %v1724_v16 }
 0x59a   : > { %v3605_v34 = vmul.f32 -1.442695, %v1745_v30 }
 0x59b   : > { %v4097_v52 = vpop.eup %4096  ;;  %v1730_v49 = vpop.xlane.xlu0 %1729 }
 0x59c   : > { %v4099_v53 = vpop.eup %4098  ;;  %v1775_v62 = vadd.f32 1.0, %v4097_v52  ;;  %v1747_v31 = vadd.f32 %v3600_v35, %v1730_v49  ;;  %4104 = vpow2.f32 %v3605_v34  ;;  %v2307_v52 = vrot.slane %v5933_v15, %v5853_v5 }
 0x59d   : > { %v1773_v14 = vadd.f32 1.0, %v4099_v53  ;;  %v1727_v13 = vpop.xlane.xlu1 %1726 }
 0x59e   : > { %4106 = vrcp.f32 %v1775_v62  ;;  %v1746_v17 = vadd.f32 %v3600_v35, %v1727_v13  ;;  %v3607_v63 = vmul.f32 -1.442695, %v1747_v31  ;;  %v2387_v13 = vrot.slane %v5875_v39, %v5859_v8 }
 0x59f   : > { %v4101_v24 = vpop.eup %4100  ;;  %4108 = vrcp.f32 %v1773_v14 }
 0x5a0   : > { %v4103_v18 = vpop.eup %4102  ;;  %v3606_v28 = vmul.f32 -1.442695, %v1746_v17  ;;  %4110 = vpow2.f32 %v3607_v63  ;;  %v1774_v36 = vadd.f32 1.0, %v4101_v24  ;;  %v2538_v24 = vrot.slane %v5881_v43, %v5859_v8 }
 0x5a1   : > { %v1776_v60 = vadd.f32 1.0, %v4103_v18  ;;  %v1733_v29 = vpop.xlane.xlu1 %1732 }
 0x5a2   : > { %v1748_v3 = vadd.f32 %v3600_v35, %v1733_v29  ;;  %v4022_v29 = vld [vmem:[#allocation23 + $0x8] sm:$0xff]  }
 0x5a3   : > { %4112 = vrcp.f32 %v1776_v60  ;;  %v2394_v60 = vrot.slane %v5875_v39, %v5855_v6 }
 0x5a4   : > { %4114 = vpow2.f32 %v3606_v28  ;;  %v3608_v48 = vmul.f32 -1.442695, %v1748_v3  ;;  %v4021_v28 = vld [vmem:[#allocation23] sm:$0xff]   ;;  %v2679_v3 = vrot.slane %v5879_v42, %v5853_v5 }
 0x5a5   : > { %4116 = vrcp.f32 %v1774_v36  ;;  %3698 = vmatprep.subr.bf16.mxu1 %v4021_v28 }
 0x5a6   : > { %v4105_v27 = vpop.eup %4104  ;;  %4118 = vpow2.f32 %v3608_v48  ;;  %3699 = vmatpush3.bf16.msra.mxu1 %v4021_v28  ;;  %v2314_v48 = vrot.slane %v5933_v15, %v5859_v8 }
 0x5a7   : > { %v1777_v53 = vadd.f32 1.0, %v4105_v27  ;;  %3700 = vmatprep.subr.bf16.mxu1 %v4022_v29  ;;  %v2321_v27 = vrot.slane %v5933_v15, %v5855_v6 }
 0x5a8   : > { %v4107_v26 = vpop.eup %4106 }
 0x5a9   : > { %v4109_v16 = vpop.eup %4108  ;;  %1809 = vperm.xlu1 %4018, %v4107_v26   ;;  %v2380_v26 = vrot.slane %v5875_v39, %v5853_v5 }
 0x5aa   : > { %v4111_v30 = vpop.eup %4110  ;;  %1799 = vperm.xlu0 %4017, %v4109_v16   ;;  %3701 = vmatpush3.bf16.msra.mxu1 %v4022_v29 }
 0x5ab   : > { %v1779_v34 = vadd.f32 1.0, %v4111_v30 }
 0x5ad   : > { %v4113_v49 = vpop.eup %4112  ;;  %4120 = vrcp.f32 %v1779_v34 }
 0x5ae   : > { %v4115_v35 = vpop.eup %4114  ;;  %1814 = vperm.xlu1 %4018, %v4113_v49   ;;  %2309 = vbcast.lane.b32.xlu0 %v2307_v52, 256  ;;  %4122 = vrcp.f32 %v1777_v53 }
 0x5af   : > { %v4117_v62 = vpop.eup %4116  ;;  %v1778_v31 = vadd.f32 1.0, %v4115_v35 }
 0x5b0   : > { %v4119_v14 = vpop.eup %4118 }
 0x5b1   : > { %4124 = vrcp.f32 %v1778_v31  ;;  %v1780_v17 = vadd.f32 1.0, %v4119_v14 }
 0x5b2   : > { %1804 = vperm.xlu1 %4018, %v4117_v62   ;;  %2330 = vbcast.lane.b32.xlu0 %v2328_v19, 256 }
 0x5b3   : > { %4126 = vrcp.f32 %v1780_v17 }
 0x5b6   : > { %2389 = vbcast.lane.b32.xlu0 %v2387_v13, 256 }
 0x5b7   : > { %v4121_v63 = vpop.eup %4120 }
 0x5b8   : > { %1829 = vperm.xlu1 %4018, %v4121_v63   ;;  %v4123_v18 = vpop.eup %4122 }
 0x5ba   : > { %2540 = vbcast.lane.b32.xlu0 %v2538_v24, 256 }
 0x5bb   : > { %v4125_v19 = vpop.eup %4124 }
 0x5bc   : > { %1819 = vperm.xlu1 %4018, %v4123_v18  }
 0x5bd   : > { %v4127_v36 = vpop.eup %4126 }
 0x5be   : > { %2396 = vbcast.lane.b32.xlu0 %v2394_v60, 256 }
 0x5c0   : > { %1824 = vperm.xlu1 %4018, %v4125_v19  }
 0x5c2   : > { %2681 = vbcast.lane.b32.xlu0 %v2679_v3, 256 }
 0x5c4   : > { %1834 = vperm.xlu1 %4018, %v4127_v36  }
 0x5c6   : > { %2344 = vbcast.lane.b32.xlu0 %v2342_v20, 256  ;;  %v5013_v20 = vmov 0.0  }
 0x5c7   : > { %1212 = vst.msk [vmem:[#allocation2] sm:$0xff] %vm1211_vm1, %v5013_v20  ;;  %3722 = vmatprep.subr.bf16.mxu1 %v5013_v20 }
 0x5c8   : > { %2316 = vbcast.lane.b32.xlu1 %v2314_v48, 256  ;;  %1214 = vst.msk [vmem:[#allocation3] sm:$0x7] %vm1213_vm13, %v5013_v20 }
 0x5ca   : > { %2554 = vbcast.lane.b32.xlu0 %v2552_v50, 256  ;;  %v2531_v50 = vrot.slane %v5881_v43, %v5853_v5  ;;  %v2686_v5 = vrot.slane %v5879_v42, %v5859_v8 }
 0x5cc   : > { %2323 = vbcast.lane.b32.xlu1 %v2321_v27, 256 }
 0x5ce   : > { %2351 = vbcast.lane.b32.xlu0 %v2349_v21, 256  ;;  %v2545_v21 = vrot.slane %v5881_v43, %v5855_v6 }
 0x5d0   : > { %2382 = vbcast.lane.b32.xlu1 %v2380_v26, 256 }
 0x5d2   : > { %2561 = vbcast.lane.b32.xlu0 %v2559_v51, 256  ;;  %v2693_v51 = vrot.slane %v5879_v42, %v5855_v6 }
 0x5d4   : > { %2533 = vbcast.lane.b32.xlu1 %v2531_v50, 256 }
 0x5d6   : > { %2358 = vbcast.lane.b32.xlu0 %v2356_v22, 256 }
 0x5d8   : > { %2337 = vbcast.lane.b32.xlu1 %v2335_v23, 256 }
 0x5da   : > { %2568 = vbcast.lane.b32.xlu0 %v2566_v55, 256 }
 0x5dc   : > { %2547 = vbcast.lane.b32.xlu1 %v2545_v21, 256 }
 0x5de   : > { %2424 = vbcast.lane.b32.xlu0 %v2422_v47, 256 }
 0x5e0   : > { %2688 = vbcast.lane.b32.xlu1 %v2686_v5, 256 }
 0x5e2   : > { %2716 = vbcast.lane.b32.xlu0 %v2714_v56, 256 }
 0x5e4   : > { %2403 = vbcast.lane.b32.xlu1 %v2401_v58, 256 }
 0x5e6   : > { %2582 = vbcast.lane.b32.xlu0 %v2580_v59, 256 }
 0x5e8   : > { %2695 = vbcast.lane.b32.xlu1 %v2693_v51, 256 }
 0x5ec   : > { %2410 = vbcast.lane.b32.xlu1 %v2408_v0, 256 }
 0x5f0   : > { %2702 = vbcast.lane.b32.xlu1 %v2700_v1, 256 }
 0x5f4   : > { %2417 = vbcast.lane.b32.xlu1 %v2415_v2, 256  ;;  %v4023_v2 = vld [vmem:[#allocation32] sm:$0xff]  }
 0x5f8   : > { %2709 = vbcast.lane.b32.xlu1 %v2707_v4, 256 }
 0x5fc   : > { %2575 = vbcast.lane.b32.xlu1 %v2573_v9, 256 }
 0x600   : > { %2431 = vbcast.lane.b32.xlu1 %v2429_v10, 256 }
 0x604   : > { %2723 = vbcast.lane.b32.xlu1 %v2721_v11, 256 }
 0x628   : > { %v1810_v6 = vpop.permute.xlu1 %1809 }
 0x629   : > { %v1800_v8 = vpop.permute.xlu0 %1799  ;;  %v1839_v45 = vmul.f32 %v1810_v6, %v5990_v41 }
 0x62a   : > { %v1837_v44 = vmul.f32 %v1800_v8, %v5992_v57  ;;  %v4024_v57 = vld [vmem:[#allocation32 + $0x8] sm:$0xff]  }
 0x62b   : > { %v1860_v55 = vsel %vm1211_vm1, %v1839_v45, 0.0 }
 0x62c   : > { %v1846_v47 = vsel %vm1211_vm1, %v1837_v44, 0.0  ;;  %v1861_v59 = vrot.slane %v1860_v55, 4 }
 0x62d   : > { %v1815_v46 = vpop.permute.xlu1 %1814  ;;  %v1847_v56 = vrot.slane %v1846_v47, 4 }
 0x62e   : > { %v1840_v43 = vmul.f32 %v1815_v46, %v5994_v38  ;;  %v1862_v23 = vadd.f32 %v1861_v59, %v1860_v55 }
 0x62f   : > { %v1848_v4 = vadd.f32 %v1847_v56, %v1846_v47 }
 0x630   : > { %v1867_v40 = vsel %vm1211_vm1, %v1840_v43, 0.0  ;;  %v1928_v9 = vpack.c.bf16 %v1840_v43, %v1839_v45  ;;  %v1863_v49 = vrot.slane %v1862_v23, 2 }
 0x631   : > { %v1805_v39 = vpop.permute.xlu1 %1804  ;;  %v1868_v11 = vrot.slane %v1867_v40, 4  ;;  %v1849_v38 = vrot.slane %v1848_v4, 2 }
 0x632   : > { %v1838_v58 = vmul.f32 %v1805_v39, %v5997_v32  ;;  %v1864_v63 = vadd.f32 %v1863_v49, %v1862_v23 }
 0x633   : > { %v1869_v16 = vadd.f32 %v1868_v11, %v1867_v40  ;;  %v1850_v62 = vadd.f32 %v1849_v38, %v1848_v4 }
 0x634   : > { %v1853_v0 = vsel %vm1211_vm1, %v1838_v58, 0.0  ;;  %v1927_v1 = vpack.c.bf16 %v1838_v58, %v1837_v44  ;;  %v1865_v26 = vrot.slane %v1864_v63, 1 }
 0x635   : > { %v1854_v10 = vrot.slane %v1853_v0, 4  ;;  %v1851_v28 = vrot.slane %v1850_v62, 1 }
 0x636   : > { %3702 = vmatprep.mubr.msk.bf16.mxu1 %vm1211_vm1, %v1927_v1  ;;  %v1866_v55 = vadd.f32 %v1865_v26, %v1864_v63 }
 0x637   : > { %v1855_v15 = vadd.f32 %v1854_v10, %v1853_v0  ;;  %v1830_v22 = vpop.permute.xlu1 %1829  ;;  %3703 = vmatmul.mubr.msk.bf16.vlgmr.msra.gmra.mrb[0].mxu1 %vm1211_vm1, %v1928_v9  ;;  %v1852_v5 = vadd.f32 %v1851_v28, %v1850_v62  ;;  %v4025_v62 = vld [vmem:[#allocation26] sm:$0xff]  }
 0x638   : > { %v1843_v41 = vmul.f32 %v1830_v22, %v6007_v61  ;;  %3723 = vmatpush3.bf16.msra.mxu1 %v4023_v2  ;;  %v1870_v61 = vrot.slane %v1869_v16, 2  ;;  %3710 = vmatprep.subr.bf16.mxu0 %v4025_v62 }
 0x639   : > { %v1856_v32 = vrot.slane %v1855_v15, 2  ;;  %3724 = vmatprep.subr.bf16.mxu1 %v5013_v20  ;;  %3711 = vmatpush3.bf16.msra.mxu0 %v4025_v62 }
 0x63a   : > { %v1888_v30 = vsel %vm1211_vm1, %v1843_v41, 0.0  ;;  %v1871_v19 = vadd.f32 %v1870_v61, %v1869_v16  ;;  %v4026_v61 = vld [vmem:[#allocation26 + $0x8] sm:$0xff]  }
 0x63b   : > { %v1857_v34 = vadd.f32 %v1856_v32, %v1855_v15  ;;  %v1820_v52 = vpop.permute.xlu1 %1819  ;;  %v1889_v53 = vrot.slane %v1888_v30, 4  ;;  %3712 = vmatprep.subr.bf16.mxu0 %v4026_v61 }
 0x63c   : > { %v1841_v35 = vmul.f32 %v1820_v52, %v6009_v25  ;;  %3725 = vmatpush3.bf16.msra.mxu1 %v4024_v57  ;;  %v1872_v6 = vrot.slane %v1871_v19, 1 }
 0x63d   : > { %3730 = vmatprep.subr.bf16.mxu1 %v5013_v20  ;;  %v1858_v14 = vrot.slane %v1857_v34, 1  ;;  %v1890_v24 = vadd.f32 %v1889_v53, %v1888_v30  ;;  %v2858_v30 = vld [vmem:[#allocation30] sm:$0x3]  ;;  %v6147_v53 = vld [vmem:[%s1004_s20] sm:$0xff]  ;;  %3713 = vmatpush3.bf16.msra.mxu0 %v4026_v61  ;;  %s4833_s20 = scalar_lea.vmem %s4832_s4, 256 }
 0x63e   : > { %v1874_v31 = vsel %vm1211_vm1, %v1841_v35, 0.0  ;;  %v1873_v59 = vadd.f32 %v1872_v6, %v1871_v19  ;;  %v2924_v49 = vsel %vm2843_vm10, %v2858_v30, 0  ;;  %3736 = vmatprep.subr.bf16.mxu0 %v5013_v20  ;;  %p4835_p8 = scmp.lt.s32.totalorder %s4833_s20, %s4827_s1 }
 0x63f   : > { %v1875_v13 = vrot.slane %v1874_v31, 4  ;;  %v1825_v17 = vpop.permute.xlu1 %1824  ;;  %v1859_v3 = vadd.f32 %v1858_v14, %v1857_v34  ;;  %v1891_v50 = vrot.slane %v1890_v24, 2 }
 0x640   : > { %v1842_v18 = vmul.f32 %v1825_v17, %v6018_v37  ;;  %p4836_p4 = por %p4835_p8, %p4834_p11 }
 0x641   : > { %v1876_v60 = vadd.f32 %v1875_v13, %v1874_v31  ;;  %v1911_v45 = vsel %vm1910_vm2, %v1859_v3, %v1852_v5  ;;  %v1892_v56 = vadd.f32 %v1891_v50, %v1890_v24  ;;  %v3609_v31 = vld [vmem:[#allocation24] ss:$0 sm:$0xff] }
 0x642   : > { %v1881_v29 = vsel %vm1211_vm1, %v1842_v18, 0.0  ;;  %v1929_v25 = vpack.c.bf16 %v1842_v18, %v1841_v35  ;;  %v1913_v58 = vsel %vm1912_vm3, %v1866_v55, %v1911_v45  ;;  %v2857_v35 = vpack.c.bf16 %v6147_v53, %v6147_v53  ;;  %p4837_p5 = pnand %p4836_p4, %p4830_p6 }
 0x643   : > { %v1877_v36 = vrot.slane %v1876_v60, 2  ;;  %v1882_v48 = vrot.slane %v1881_v29, 4  ;;  %v1835_v27 = vpop.permute.xlu1 %1834  ;;  %v1893_v2 = vrot.slane %v1892_v56, 1  ;;  %v1915_v4 = vsel %vm1914_vm5, %v1873_v59, %v1913_v58 }
 0x644   : > { %v1844_v21 = vmul.f32 %v1835_v27, %v6015_v33  ;;  %3706 = vmatprep.mubr.msk.bf16.mxu1 %vm1211_vm1, %v1929_v25 }
 0x645   : > { %v1878_v37 = vadd.f32 %v1877_v36, %v1876_v60  ;;  %v1883_v51 = vadd.f32 %v1882_v48, %v1881_v29  ;;  %v1894_v23 = vadd.f32 %v1893_v2, %v1892_v56 }
 0x646   : > { %v1895_v8 = vsel %vm1211_vm1, %v1844_v21, 0.0  ;;  %v1930_v44 = vpack.c.bf16 %v1844_v21, %v1843_v41  ;;  %v1845_v41 = vld [vmem:[#allocation2] sm:$0xff] }
 0x647   : > { %v1879_v46 = vrot.slane %v1878_v37, 1  ;;  %v1884_v47 = vrot.slane %v1883_v51, 2  ;;  %v1896_v43 = vrot.slane %v1895_v8, 4 }
 0x648   : > { %3707 = vmatmul.mubr.msk.bf16.gmra.mrb[4].mxu1 %vm1211_vm1, %v1930_v44 }
 0x649   : > { %v1885_v33 = vadd.f32 %v1884_v47, %v1883_v51  ;;  %v1897_v39 = vadd.f32 %v1896_v43, %v1895_v8  ;;  %3726 = vmatprep.mubr.msk.bf16.mxu1 %vm5014_vm4, %v5013_v20  ;;  %v1880_v40 = vadd.f32 %v1879_v46, %v1878_v37 }
 0x64b   : > { %v1886_v0 = vrot.slane %v1885_v33, 1  ;;  %v1898_v1 = vrot.slane %v1897_v39, 2  ;;  %v1917_v11 = vsel %vm1916_vm6, %v1880_v40, %v1915_v4 }
 0x64d   : > { %v1887_v9 = vadd.f32 %v1886_v0, %v1885_v33  ;;  %v1899_v10 = vadd.f32 %v1898_v1, %v1897_v39 }
 0x64f   : > { %v1919_v15 = vsel %vm1918_vm7, %v1887_v9, %v1917_v11  ;;  %v1900_v22 = vrot.slane %v1899_v10, 1 }
 0x650   : > { %v1921_v38 = vsel %vm1920_vm8, %v1894_v23, %v1919_v15 }
 0x651   : > { %v1901_v57 = vadd.f32 %v1900_v22, %v1899_v10 }
 0x653   : > { %v1923_v32 = vsel %vm1922_vm9, %v1901_v57, %v1921_v38  ;;  %v4027_v38 = vld [vmem:[#allocation35] sm:$0xff]  }
 0x654   : > { %v1925_v16 = vadd.f32 %v1923_v32, %v1845_v41 }
 0x656   : > { %1926 = vst.msk [vmem:[#allocation2] sm:$0xff] %vm1211_vm1, %v1925_v16 }
 0x65d   : > { %v2856_v34 = vld [vmem:[#allocation2] sm:$0xff] }
 0x65e   : > { %v2859_v52 = vpack.c.bf16 %v2856_v34, %v2856_v34  ;;  %v4028_v34 = vld [vmem:[#allocation35 + $0x8] sm:$0xff]  }
 0x660   : > { %3727 = vmatmul.mubr.msk.bf16.vlgmr.msra.gmra.mrb[8].mxu1 %vm1211_vm1, %v2859_v52 }
 0x661   : > { %3731 = vmatpush3.bf16.msra.mxu1 %v2924_v49  ;;  %3732 = vmatprep.mubr.msk.bf16.mxu1 %vm5014_vm4, %v5013_v20 }
 0x662   : > { %3744 = vmatprep.subr.bf16.mxu1 %v5013_v20 }
 0x668   : > { %3733 = vmatmul.mubr.msk.bf16.vlgmr.msra.gmra.mrb[12].mxu1 %vm2919_vm11, %v2857_v35 }
 0x669   : > { %3746 = vmatprep.mubr.msk.bf16.mxu1 %vm5014_vm4, %v5013_v20 }
 0x70a   : > { %v3704_v14 = vpop.f32.mrb[0].mxu1 }
 0x70b   : > { %v2009_v13 = vadd.f32 %v3704_v14, %v3609_v31  ;;  %v2000_v17 = vpop.f32.mrb[1].mxu1 }
 0x70c   : > { %v2001_v63 = vadd.f32 %v3609_v31, %v2000_v17  ;;  %v3705_v24 = vpop.f32.mrb[2].mxu1 }
 0x70d   : > { %v3618_v18 = vmul.f32 -1.442695, %v2009_v13  ;;  %v2012_v28 = vadd.f32 %v3705_v24, %v3609_v31  ;;  %v2003_v60 = vpop.f32.mrb[3].mxu1 }
 0x70e   : > { %v3616_v19 = vmul.f32 -1.442695, %v2001_v63  ;;  %v2004_v29 = vadd.f32 %v3609_v31, %v2003_v60  ;;  %v3645_v60 = vld [vmem:[#allocation33] ss:$0 sm:$0xff] }
 0x70f   : > { %4128 = vpow2.f32 %v3618_v18  ;;  %v3619_v25 = vmul.f32 -1.442695, %v2012_v28 }
 0x710   : > { %4130 = vpow2.f32 %v3616_v19  ;;  %v3617_v3 = vmul.f32 -1.442695, %v2004_v29 }
 0x711   : > { %4132 = vpow2.f32 %v3619_v25 }
 0x712   : > { %4134 = vpow2.f32 %v3617_v3 }
 0x719   : > { %v4129_v36 = vpop.eup %4128 }
 0x71a   : > { %v4131_v48 = vpop.eup %4130  ;;  %v2057_v27 = vadd.f32 1.0, %v4129_v36 }
 0x71b   : > { %v4133_v26 = vpop.eup %4132  ;;  %v2055_v50 = vadd.f32 1.0, %v4131_v48  ;;  %v3708_v21 = vpop.f32.mrb[4].mxu1 }
 0x71c   : > { %v4135_v5 = vpop.eup %4134  ;;  %4136 = vrcp.f32 %v2057_v27  ;;  %v2058_v37 = vadd.f32 1.0, %v4133_v26  ;;  %v2025_v51 = vadd.f32 %v3708_v21, %v3609_v31  ;;  %v2016_v6 = vpop.f32.mrb[5].mxu1 }
 0x71d   : > { %4138 = vrcp.f32 %v2055_v50  ;;  %v2056_v8 = vadd.f32 1.0, %v4135_v5  ;;  %v2017_v44 = vadd.f32 %v3609_v31, %v2016_v6  ;;  %v3709_v45 = vpop.f32.mrb[6].mxu1  ;;  %v4029_v6 = vld [vmem:[#allocation38] sm:$0xff]  }
 0x71e   : > { %4140 = vrcp.f32 %v2058_v37  ;;  %v3622_v46 = vmul.f32 -1.442695, %v2025_v51  ;;  %v2028_v47 = vadd.f32 %v3709_v45, %v3609_v31  ;;  %v2019_v43 = vpop.f32.mrb[7].mxu1  ;;  %3745 = vmatpush3.bf16.msra.mxu1 %v4029_v6 }
 0x71f   : > { %4142 = vrcp.f32 %v2056_v8  ;;  %v3620_v55 = vmul.f32 -1.442695, %v2017_v44  ;;  %v2020_v56 = vadd.f32 %v3609_v31, %v2019_v43  ;;  %v3624_v8 = vld [vmem:[#allocation27] ss:$0 sm:$0xff] }
 0x720   : > { %4144 = vpow2.f32 %v3622_v46  ;;  %v3623_v33 = vmul.f32 -1.442695, %v2028_v47 }
 0x721   : > { %4146 = vpow2.f32 %v3620_v55  ;;  %v3621_v39 = vmul.f32 -1.442695, %v2020_v56 }
 0x722   : > { %4148 = vpow2.f32 %v3623_v33 }
 0x723   : > { %4150 = vpow2.f32 %v3621_v39 }
 0x726   : > { %v4137_v58 = vpop.eup %4136 }
 0x727   : > { %v4139_v40 = vpop.eup %4138  ;;  %v2081_v1 = vmul.f32 %v4137_v58, %v2009_v13 }
 0x728   : > { %v4141_v59 = vpop.eup %4140  ;;  %v2079_v9 = vmul.f32 %v4139_v40, %v2001_v63 }
 0x729   : > { %v4143_v0 = vpop.eup %4142  ;;  %v2082_v2 = vmul.f32 %v4141_v59, %v2012_v28 }
 0x72a   : > { %v4145_v4 = vpop.eup %4144  ;;  %v2080_v10 = vmul.f32 %v4143_v0, %v2004_v29 }
 0x72b   : > { %v4147_v11 = vpop.eup %4146  ;;  %v2088_v15 = vpack.c.bf16 %v2082_v2, %v2081_v1  ;;  %v2061_v22 = vadd.f32 1.0, %v4145_v4 }
 0x72c   : > { %v4149_v23 = vpop.eup %4148  ;;  %v2087_v41 = vpack.c.bf16 %v2080_v10, %v2079_v9  ;;  %v2059_v57 = vadd.f32 1.0, %v4147_v11 }
 0x72d   : > { %v4151_v32 = vpop.eup %4150  ;;  %4152 = vrcp.f32 %v2061_v22  ;;  %v2062_v16 = vadd.f32 1.0, %v4149_v23 }
 0x72e   : > { %4154 = vrcp.f32 %v2059_v57  ;;  %v2060_v30 = vadd.f32 1.0, %v4151_v32  ;;  %3714 = vmatprep.mubr.msk.bf16.mxu0 %vm1211_vm1, %v2087_v41 }
 0x72f   : > { %4156 = vrcp.f32 %v2062_v16  ;;  %3715 = vmatmul.mubr.msk.bf16.vlgmr.msra.gmra.mrb[8].mxu0 %vm1211_vm1, %v2088_v15 }
 0x730   : > { %4158 = vrcp.f32 %v2060_v30  ;;  %3737 = vmatpush3.bf16.msra.mxu0 %v4027_v38 }
 0x731   : > { %3738 = vmatprep.subr.bf16.mxu0 %v5013_v20 }
 0x733   : > { %v2913_v52 = vpop.f32.mrb[8].mxu1 }
 0x734   : > { %v3728_v49 = vpop.f32.mrb[9].mxu1  ;;  %3739 = vmatpush3.bf16.msra.mxu0 %v4028_v34 }
 0x735   : > { %v2916_v35 = vpop.f32.mrb[10].mxu1 }
 0x736   : > { %v3729_v62 = vpop.f32.mrb[11].mxu1 }
 0x737   : > { %v4153_v61 = vpop.eup %4152 }
 0x738   : > { %v4155_v31 = vpop.eup %4154  ;;  %v2085_v17 = vmul.f32 %v4153_v61, %v2025_v51  ;;  %v3639_v61 = vld [vmem:[#allocation29] ss:$0 sm:$0xff] }
 0x739   : > { %v4157_v14 = vpop.eup %4156  ;;  %v2083_v24 = vmul.f32 %v4155_v31, %v2017_v44 }
 0x73a   : > { %v4159_v13 = vpop.eup %4158  ;;  %v2086_v63 = vmul.f32 %v4157_v14, %v2028_v47 }
 0x73b   : > { %v2084_v18 = vmul.f32 %v4159_v13, %v2020_v56  ;;  %v2960_v28 = vpop.f32.mrb[12].mxu1 }
 0x73c   : > { %v2090_v19 = vpack.c.bf16 %v2086_v63, %v2085_v17  ;;  %v2961_v29 = vadd.f32 %v2960_v28, %v2913_v52  ;;  %v3734_v25 = vpop.f32.mrb[13].mxu1 }
 0x73d   : > { %v2089_v3 = vpack.c.bf16 %v2084_v18, %v2083_v24  ;;  %v2963_v36 = vpop.f32.mrb[14].mxu1 }
 0x73e   : > { %v2973_v48 = vadd.f32 %v3645_v60, %v2961_v29  ;;  %v3735_v27 = vpop.f32.mrb[15].mxu1 }
 0x73f   : > { %3718 = vmatprep.mubr.msk.bf16.mxu0 %vm1211_vm1, %v2089_v3 }
 0x740   : > { %v3646_v26 = vmul.f32 -1.442695, %v2973_v48  ;;  %3719 = vmatmul.mubr.msk.bf16.gmra.mrb[12].mxu0 %vm1211_vm1, %v2090_v19 }
 0x741   : > { %3740 = vmatprep.mubr.msk.bf16.mxu0 %vm5014_vm4, %v5013_v20 }
 0x742   : > { %4160 = vpow2.f32 %v3646_v26 }
 0x74c   : > { %v4161_v50 = vpop.eup %4160 }
 0x74d   : > { %v2977_v21 = vadd.f32 1.0, %v4161_v50 }
 0x74f   : > { %4162 = vrcp.f32 %v2977_v21 }
 0x759   : > { %v4163_v5 = vpop.eup %4162 }
 0x75a   : > { %v2980_v37 = vmul.f32 %v4163_v5, %v2973_v48 }
 0x75c   : > { %v2981_v51 = vpack.c.bf16 %v2980_v37, %v2980_v37 }
 0x75e   : > { %3741 = vmatmul.mubr.msk.bf16.vlgmr.msra.gmra.mrb[16].mxu0 %vm1211_vm1, %v2981_v51 }
 0x802   : > { %v3716_v44 = vpop.f32.mrb[8].mxu0 }
 0x803   : > { %v2169_v45 = vadd.f32 %v3716_v44, %v3624_v8  ;;  %v2160_v46 = vpop.f32.mrb[9].mxu0  ;;  %v3647_v44 = vld [vmem:[#allocation36] ss:$0 sm:$0xff] }
 0x804   : > { %v2161_v47 = vadd.f32 %v3624_v8, %v2160_v46  ;;  %v3717_v43 = vpop.f32.mrb[10].mxu0 }
 0x805   : > { %v3633_v55 = vmul.f32 -1.442695, %v2169_v45  ;;  %v2172_v56 = vadd.f32 %v3717_v43, %v3624_v8  ;;  %v2163_v33 = vpop.f32.mrb[11].mxu0 }
 0x806   : > { %v3631_v39 = vmul.f32 -1.442695, %v2161_v47  ;;  %v2164_v58 = vadd.f32 %v3624_v8, %v2163_v33 }
 0x807   : > { %4164 = vpow2.f32 %v3633_v55  ;;  %v3634_v40 = vmul.f32 -1.442695, %v2172_v56 }
 0x808   : > { %4166 = vpow2.f32 %v3631_v39  ;;  %v3632_v59 = vmul.f32 -1.442695, %v2164_v58 }
 0x809   : > { %4168 = vpow2.f32 %v3634_v40 }
 0x80a   : > { %4170 = vpow2.f32 %v3632_v59 }
 0x811   : > { %v4165_v0 = vpop.eup %4164 }
 0x812   : > { %v4167_v1 = vpop.eup %4166  ;;  %v2217_v2 = vadd.f32 1.0, %v4165_v0 }
 0x813   : > { %v4169_v4 = vpop.eup %4168  ;;  %v2215_v9 = vadd.f32 1.0, %v4167_v1  ;;  %v3720_v10 = vpop.f32.mrb[12].mxu0 }
 0x814   : > { %v4171_v11 = vpop.eup %4170  ;;  %4172 = vrcp.f32 %v2217_v2  ;;  %v2218_v15 = vadd.f32 1.0, %v4169_v4  ;;  %v2185_v22 = vadd.f32 %v3720_v10, %v3624_v8  ;;  %v2176_v23 = vpop.f32.mrb[13].mxu0 }
 0x815   : > { %4174 = vrcp.f32 %v2215_v9  ;;  %v2216_v41 = vadd.f32 1.0, %v4171_v11  ;;  %v2177_v57 = vadd.f32 %v3624_v8, %v2176_v23  ;;  %v3721_v38 = vpop.f32.mrb[14].mxu0 }
 0x816   : > { %4176 = vrcp.f32 %v2218_v15  ;;  %v3637_v32 = vmul.f32 -1.442695, %v2185_v22  ;;  %v2188_v16 = vadd.f32 %v3721_v38, %v3624_v8  ;;  %v2179_v30 = vpop.f32.mrb[15].mxu0 }
 0x817   : > { %4178 = vrcp.f32 %v2216_v41  ;;  %v3635_v34 = vmul.f32 -1.442695, %v2177_v57  ;;  %v2180_v52 = vadd.f32 %v3624_v8, %v2179_v30  ;;  %v2317_v30 = vpop.permute.xlu1 %2316 }
 0x818   : > { %4180 = vpow2.f32 %v3637_v32  ;;  %v3638_v49 = vmul.f32 -1.442695, %v2188_v16 }
 0x819   : > { %4182 = vpow2.f32 %v3635_v34  ;;  %v3636_v35 = vmul.f32 -1.442695, %v2180_v52  ;;  %v2310_v34 = vpop.permute.xlu0 %2309 }
 0x81a   : > { %4184 = vpow2.f32 %v3638_v49 }
 0x81b   : > { %4186 = vpow2.f32 %v3636_v35 }
 0x81d   : > { %v2331_v49 = vpop.permute.xlu0 %2330 }
 0x81e   : > { %v4173_v62 = vpop.eup %4172 }
 0x81f   : > { %v4175_v31 = vpop.eup %4174  ;;  %v2241_v14 = vmul.f32 %v4173_v62, %v2169_v45 }
 0x820   : > { %v4177_v13 = vpop.eup %4176  ;;  %v2239_v17 = vmul.f32 %v4175_v31, %v2161_v47 }
 0x821   : > { %v4179_v63 = vpop.eup %4178  ;;  %v2242_v24 = vmul.f32 %v4177_v13, %v2172_v56  ;;  %v2256_v18 = vmul.f32 %v3639_v61, %v2241_v14  ;;  %v2390_v62 = vpop.permute.xlu0 %2389 }
 0x822   : > { %v4181_v28 = vpop.eup %4180  ;;  %v2240_v60 = vmul.f32 %v4179_v63, %v2164_v58  ;;  %v2254_v19 = vmul.f32 %v3639_v61, %v2239_v17 }
 0x823   : > { %v4183_v29 = vpop.eup %4182  ;;  %v2221_v25 = vadd.f32 1.0, %v4181_v28  ;;  %v2268_v3 = vsel %vm1560_vm0, %v2256_v18, 0.0  ;;  %v2257_v50 = vmul.f32 %v3639_v61, %v2242_v24 }
 0x824   : > { %v4185_v36 = vpop.eup %4184  ;;  %v2219_v48 = vadd.f32 1.0, %v4183_v29  ;;  %2269 = vadd.xlane.f32.xlu0 %v2268_v3  ;;  %v2262_v27 = vsel %vm1560_vm0, %v2254_v19, 0.0  ;;  %v2255_v26 = vmul.f32 %v3639_v61, %v2240_v60 }
 0x825   : > { %v4187_v21 = vpop.eup %4186  ;;  %4188 = vrcp.f32 %v2221_v25  ;;  %v2222_v5 = vadd.f32 1.0, %v4185_v36  ;;  %2263 = vadd.xlane.f32.xlu1 %v2262_v27  ;;  %v2271_v6 = vsel %vm1560_vm0, %v2257_v50, 0.0  ;;  %v2541_v31 = vpop.permute.xlu0 %2540 }
 0x826   : > { %4190 = vrcp.f32 %v2219_v48  ;;  %v2220_v37 = vadd.f32 1.0, %v4187_v21  ;;  %v2265_v51 = vsel %vm1560_vm0, %v2255_v26, 0.0 }
 0x827   : > { %4192 = vrcp.f32 %v2222_v5 }
 0x828   : > { %4194 = vrcp.f32 %v2220_v37  ;;  %2266 = vadd.xlane.f32.xlu0 %v2265_v51  ;;  %v3640_v51 = vld [vmem:[#allocation5] ss:$0 sm:$0xff] }
 0x829   : > { %2272 = vadd.xlane.f32.xlu1 %v2271_v6  ;;  %v2397_v13 = vpop.permute.xlu0 %2396 }
 0x82d   : > { %v2682_v63 = vpop.permute.xlu0 %2681 }
 0x82f   : > { %v4189_v8 = vpop.eup %4188 }
 0x830   : > { %v4191_v45 = vpop.eup %4190  ;;  %v2245_v46 = vmul.f32 %v4189_v8, %v2185_v22 }
 0x831   : > { %v4193_v47 = vpop.eup %4192  ;;  %v2243_v43 = vmul.f32 %v4191_v45, %v2177_v57  ;;  %v3042_v55 = vpop.f32.mrb[16].mxu0 }
 0x832   : > { %v4195_v56 = vpop.eup %4194  ;;  %v2246_v33 = vmul.f32 %v4193_v47, %v2188_v16  ;;  %v3043_v39 = vadd.f32 %v3647_v44, %v3042_v55  ;;  %v3742_v58 = vpop.f32.mrb[17].mxu0  ;;  %v2260_v40 = vmul.f32 %v3639_v61, %v2245_v46 }
 0x833   : > { %v2244_v59 = vmul.f32 %v4195_v56, %v2180_v52  ;;  %v3045_v0 = vpop.f32.mrb[18].mxu0  ;;  %v2258_v10 = vmul.f32 %v3639_v61, %v2243_v43  ;;  %v2324_v52 = vpop.permute.xlu1 %2323 }
 0x834   : > { %v3651_v1 = vmul.f32 -1.442695, %v3043_v39  ;;  %v3743_v2 = vpop.f32.mrb[19].mxu0  ;;  %v2280_v4 = vsel %vm1560_vm0, %v2260_v40, 0.0  ;;  %v2261_v9 = vmul.f32 %v3639_v61, %v2246_v33  ;;  %v6178_v18 = vpop.permute.xlu0 %2344 }
 0x835   : > { %2281 = vadd.xlane.f32.xlu0 %v2280_v4  ;;  %v2259_v15 = vmul.f32 %v3639_v61, %v2244_v59  ;;  %v2274_v22 = vsel %vm1560_vm0, %v2258_v10, 0.0 }
 0x836   : > { %4196 = vpow2.f32 %v3651_v1  ;;  %v2283_v11 = vsel %vm1560_vm0, %v2261_v9, 0.0 }
 0x837   : > { %2284 = vadd.xlane.f32.xlu1 %v2283_v11  ;;  %v2277_v23 = vsel %vm1560_vm0, %v2259_v15, 0.0  ;;  %v2383_v35 = vpop.permute.xlu1 %2382 }
 0x838   : > { %v2555_v54 = vpop.permute.xlu0 %2554 }
 0x839   : > { %2275 = vadd.xlane.f32.xlu0 %v2274_v22 }
 0x83b   : > { %2278 = vadd.xlane.f32.xlu1 %v2277_v23  ;;  %v2534_v61 = vpop.permute.xlu1 %2533 }
 0x83c   : > { %v2352_v28 = vpop.permute.xlu0 %2351 }
 0x83f   : > { %v6176_v14 = vpop.permute.xlu1 %2337 }
 0x840   : > { %v4197_v41 = vpop.eup %4196  ;;  %v2562_v19 = vpop.permute.xlu0 %2561 }
 0x841   : > { %v3051_v57 = vadd.f32 1.0, %v4197_v41 }
 0x843   : > { %4198 = vrcp.f32 %v3051_v57  ;;  %v2548_v17 = vpop.permute.xlu1 %2547 }
 0x844   : > { %v2359_v25 = vpop.permute.xlu0 %2358 }
 0x847   : > { %v2689_v24 = vpop.permute.xlu1 %2688 }
 0x848   : > { %v6184_v36 = vpop.permute.xlu0 %2568 }
 0x84b   : > { %v2404_v42 = vpop.permute.xlu1 %2403 }
 0x84c   : > { %v2425_v27 = vpop.permute.xlu0 %2424 }
 0x84d   : > { %v4199_v38 = vpop.eup %4198 }
 0x84e   : > { %v3054_v32 = vmul.f32 %v4199_v38, %v3043_v39 }
 0x84f   : > { %2730 = vbcast.lane.b32.xlu0 %v2728_v12, 256  ;;  %v2696_v12 = vpop.permute.xlu1 %2695 }
 0x850   : > { %v3055_v16 = vpack.c.bf16 %v3054_v32, %v3054_v32  ;;  %v6188_v50 = vpop.permute.xlu0 %2716 }
 0x852   : > { %3747 = vmatmul.mubr.msk.bf16.vlgmr.msra.gmra.mrb[16].mxu1 %vm1560_vm0, %v3055_v16 }
 0x853   : > { %v6180_v60 = vpop.permute.xlu1 %2410 }
 0x854   : > { %v2583_v5 = vpop.permute.xlu0 %2582 }
 0x857   : > { %v2703_v29 = vpop.permute.xlu1 %2702 }
 0x85b   : > { %v6182_v3 = vpop.permute.xlu1 %2417 }
 0x85f   : > { %v6186_v48 = vpop.permute.xlu1 %2709 }
 0x863   : > { %v2576_v26 = vpop.permute.xlu1 %2575 }
 0x867   : > { %v6190_v21 = vpop.permute.xlu1 %2431 }
 0x86b   : > { %v6192_v37 = vpop.permute.xlu1 %2723 }
 0x8b1   : > { %v2270_v6 = vpop.xlane.xlu0 %2269 }
 0x8b2   : > { %v2295_v8 = vadd.f32 %v3640_v51, %v2270_v6  ;;  %v2264_v44 = vpop.xlane.xlu1 %2263 }
 0x8b3   : > { %v2293_v46 = vadd.f32 %v3640_v51, %v2264_v44 }
 0x8b4   : > { %v2370_v45 = vmul.f32 %v2324_v52, %v2295_v8 }
 0x8b5   : > { %v2267_v33 = vpop.xlane.xlu0 %2266  ;;  %v2368_v58 = vmul.f32 %v2310_v34, %v2293_v46 }
 0x8b6   : > { %v2273_v47 = vpop.xlane.xlu1 %2272  ;;  %v2594_v43 = vmul.f32 %v2548_v17, %v2370_v45  ;;  %v2443_v55 = vmul.f32 %v2397_v13, %v2370_v45  ;;  %v2742_v40 = vmul.f32 %v2696_v12, %v2370_v45  ;;  %v2294_v59 = vadd.f32 %v3640_v51, %v2267_v33 }
 0x8b7   : > { %v2296_v56 = vadd.f32 %v3640_v51, %v2273_v47  ;;  %v2441_v1 = vmul.f32 %v2383_v35, %v2368_v58  ;;  %v2592_v10 = vmul.f32 %v2534_v61, %v2368_v58  ;;  %v2740_v22 = vmul.f32 %v2682_v63, %v2368_v58 }
 0x8b8   : > { %2615 = vperm.xlu0 %4017, %v2594_v43   ;;  %2464 = vperm.xlu1 %4018, %v2443_v55   ;;  %v2369_v2 = vmul.f32 %v2317_v30, %v2294_v59 }
 0x8b9   : > { %v2371_v39 = vmul.f32 %v2331_v49, %v2296_v56 }
 0x8ba   : > { %v2442_v11 = vmul.f32 %v2390_v62, %v2369_v2  ;;  %v2593_v41 = vmul.f32 %v2541_v31, %v2369_v2  ;;  %v2741_v34 = vmul.f32 %v2689_v24, %v2369_v2 }
 0x8bb   : > { %v2595_v0 = vmul.f32 %v2555_v54, %v2371_v39  ;;  %v2743_v4 = vmul.f32 %v2703_v29, %v2371_v39  ;;  %v2444_v16 = vmul.f32 %v2404_v42, %v2371_v39  ;;  %v3652_v29 = vld [vmem:[#allocation39] ss:$0 sm:$0xff] }
 0x8bc   : > { %2763 = vperm.xlu1 %4018, %v2742_v40  }
 0x8bd   : > { %2618 = vperm.xlu0 %4017, %v2595_v0  }
 0x8c0   : > { %2458 = vperm.xlu1 %4018, %v2441_v1  }
 0x8c1   : > { %2766 = vperm.xlu0 %4017, %v2743_v4  }
 0x8c2   : > { %v2282_v9 = vpop.xlane.xlu0 %2281 }
 0x8c3   : > { %v2299_v15 = vadd.f32 %v3640_v51, %v2282_v9 }
 0x8c4   : > { %2609 = vperm.xlu1 %4018, %v2592_v10   ;;  %v2285_v38 = vpop.xlane.xlu1 %2284 }
 0x8c5   : > { %2461 = vperm.xlu0 %4017, %v2442_v11   ;;  %v2374_v57 = vmul.f32 %v2352_v28, %v2299_v15  ;;  %v2300_v49 = vadd.f32 %v3640_v51, %v2285_v38 }
 0x8c6   : > { %v2276_v23 = vpop.xlane.xlu0 %2275 }
 0x8c7   : > { %v2297_v32 = vadd.f32 %v3640_v51, %v2276_v23  ;;  %v2598_v52 = vmul.f32 %v2576_v26, %v2374_v57  ;;  %v2447_v35 = vmul.f32 %v2425_v27, %v2374_v57  ;;  %v2375_v13 = vmul.f32 %v2359_v25, %v2300_v49 }
 0x8c8   : > { %2757 = vperm.xlu1 %4018, %v2740_v22   ;;  %v2279_v62 = vpop.xlane.xlu1 %2278 }
 0x8c9   : > { %2612 = vperm.xlu0 %4017, %v2593_v41   ;;  %v2372_v30 = vmul.f32 %v6176_v14, %v2297_v32  ;;  %v2298_v31 = vadd.f32 %v3640_v51, %v2279_v62  ;;  %v2599_v42 = vmul.f32 %v2583_v5, %v2375_v13  ;;  %v2448_v14 = vmul.f32 %v6190_v21, %v2375_v13 }
 0x8cb   : > { %v2596_v61 = vmul.f32 %v2562_v19, %v2372_v30  ;;  %v2445_v17 = vmul.f32 %v6180_v60, %v2372_v30  ;;  %v2744_v63 = vmul.f32 %v6186_v48, %v2372_v30  ;;  %v2373_v24 = vmul.f32 %v6178_v18, %v2298_v31  ;;  %v2731_v60 = vpop.permute.xlu0 %2730 }
 0x8cc   : > { %2467 = vperm.xlu1 %4018, %v2444_v16   ;;  %v2746_v18 = vmul.f32 %v6192_v37, %v2374_v57  ;;  %v2747_v19 = vmul.f32 %v2731_v60, %v2375_v13 }
 0x8cd   : > { %2760 = vperm.xlu0 %4017, %v2741_v34   ;;  %v2597_v54 = vmul.f32 %v6184_v36, %v2373_v24  ;;  %v2446_v12 = vmul.f32 %v6182_v3, %v2373_v24  ;;  %v2745_v28 = vmul.f32 %v6188_v50, %v2373_v24 }
 0x8d0   : > { %2627 = vperm.xlu1 %4018, %v2598_v52  }
 0x8d1   : > { %2476 = vperm.xlu0 %4017, %v2447_v35  }
 0x8d4   : > { %2621 = vperm.xlu1 %4018, %v2596_v61  }
 0x8d5   : > { %2470 = vperm.xlu0 %4017, %v2445_v17  }
 0x8d8   : > { %2769 = vperm.xlu1 %4018, %v2744_v63  }
 0x8d9   : > { %2630 = vperm.xlu0 %4017, %v2599_v42  }
 0x8dc   : > { %2479 = vperm.xlu1 %4018, %v2448_v14  }
 0x8dd   : > { %2624 = vperm.xlu0 %4017, %v2597_v54  }
 0x8e0   : > { %2473 = vperm.xlu1 %4018, %v2446_v12  }
 0x8e1   : > { %2772 = vperm.xlu0 %4017, %v2745_v28  }
 0x8e4   : > { %2775 = vperm.xlu1 %4018, %v2746_v18  }
 0x8e5   : > { %2778 = vperm.xlu0 %4017, %v2747_v19  }
 0x925   : > { %v3108_v25 = vpop.f32.mrb[16].mxu1 }
 0x926   : > { %v3109_v48 = vadd.f32 %v3652_v29, %v3108_v25  ;;  %v3748_v36 = vpop.f32.mrb[17].mxu1 }
 0x927   : > { %v3111_v27 = vpop.f32.mrb[18].mxu1 }
 0x928   : > { %v3114_v26 = vadd.f32 %v3109_v48, %v6147_v53  ;;  %v3749_v3 = vpop.f32.mrb[19].mxu1 }
 0x92a   : > { %3115 = vst.msk [vmem:[%s1192_s3] sm:$0xff] %vm2919_vm11, %v3114_v26 }
 0x937   : > { %v2465_v50 = vpop.permute.xlu1 %2464  ;;  %v2616_v21 = vpop.permute.xlu0 %2615 }
 0x938   : > { %v2643_v1 = vrot.slane %v2616_v21, %v5857_v7  ;;  %v2494_v38 = vrot.slane %v2465_v50, %v5857_v7 }
 0x93b   : > { %v2764_v5 = vpop.permute.xlu1 %2763 }
 0x93c   : > { %v2619_v51 = vpop.permute.xlu0 %2618  ;;  %v2791_v49 = vrot.slane %v2764_v5, %v5857_v7 }
 0x93d   : > { %v2647_v15 = vrot.slane %v2619_v51, %v5857_v7 }
 0x93f   : > { %v2459_v37 = vpop.permute.xlu1 %2458 }
 0x940   : > { %v2767_v6 = vpop.permute.xlu0 %2766  ;;  %v2486_v4 = vrot.slane %v2459_v37, %v5857_v7 }
 0x941   : > { %v2795_v13 = vrot.slane %v2767_v6, %v5857_v7 }
 0x943   : > { %v2610_v8 = vpop.permute.xlu1 %2609 }
 0x944   : > { %v2462_v44 = vpop.permute.xlu0 %2461  ;;  %v2635_v58 = vrot.slane %v2610_v8, %v5857_v7 }
 0x945   : > { %v2490_v40 = vrot.slane %v2462_v44, %v5857_v7 }
 0x947   : > { %v2758_v45 = vpop.permute.xlu1 %2757  ;;  %v2515_v22 = vsel %vm1910_vm2, %v2490_v40, %v2486_v4 }
 0x948   : > { %v2613_v46 = vpop.permute.xlu0 %2612  ;;  %v2783_v23 = vrot.slane %v2758_v45, %v5857_v7  ;;  %v2516_v35 = vsel %vm1912_vm3, %v2494_v38, %v2515_v22 }
 0x949   : > { %v2639_v53 = vrot.slane %v2613_v46, %v5857_v7 }
 0x94b   : > { %v2468_v47 = vpop.permute.xlu1 %2467  ;;  %v2664_v59 = vsel %vm1910_vm2, %v2639_v53, %v2635_v58 }
 0x94c   : > { %v2761_v43 = vpop.permute.xlu0 %2760  ;;  %v2665_v10 = vsel %vm1912_vm3, %v2643_v1, %v2664_v59  ;;  %v2498_v41 = vrot.slane %v2468_v47, %v5857_v7 }
 0x94d   : > { %v2787_v9 = vrot.slane %v2761_v43, %v5857_v7  ;;  %v2666_v34 = vsel %vm1914_vm5, %v2647_v15, %v2665_v10 }
 0x94e   : > { %v2517_v31 = vsel %vm1914_vm5, %v2498_v41, %v2516_v35 }
 0x94f   : > { %v2628_v55 = vpop.permute.xlu1 %2627  ;;  %v2812_v16 = vsel %vm1910_vm2, %v2787_v9, %v2783_v23 }
 0x950   : > { %v2477_v56 = vpop.permute.xlu0 %2476  ;;  %v2659_v62 = vrot.slane %v2628_v55, %v5857_v7  ;;  %v2813_v42 = vsel %vm1912_vm3, %v2791_v49, %v2812_v16 }
 0x951   : > { %v2510_v60 = vrot.slane %v2477_v56, %v5857_v7  ;;  %v2814_v27 = vsel %vm1914_vm5, %v2795_v13, %v2813_v42 }
 0x953   : > { %v2622_v33 = vpop.permute.xlu1 %2621 }
 0x954   : > { %v2471_v39 = vpop.permute.xlu0 %2470  ;;  %v2651_v11 = vrot.slane %v2622_v33, %v5857_v7 }
 0x955   : > { %v2502_v30 = vrot.slane %v2471_v39, %v5857_v7 }
 0x956   : > { %v2667_v61 = vsel %vm1916_vm6, %v2651_v11, %v2666_v34 }
 0x957   : > { %v2770_v0 = vpop.permute.xlu1 %2769  ;;  %v2518_v18 = vsel %vm1916_vm6, %v2502_v30, %v2517_v31 }
 0x958   : > { %v2631_v2 = vpop.permute.xlu0 %2630  ;;  %v2799_v14 = vrot.slane %v2770_v0, %v5857_v7 }
 0x959   : > { %v2663_v17 = vrot.slane %v2631_v2, %v5857_v7 }
 0x95a   : > { %v2815_v50 = vsel %vm1916_vm6, %v2799_v14, %v2814_v27 }
 0x95b   : > { %v2480_v57 = vpop.permute.xlu1 %2479 }
 0x95c   : > { %v2625_v32 = vpop.permute.xlu0 %2624  ;;  %v2514_v25 = vrot.slane %v2480_v57, %v5857_v7 }
 0x95d   : > { %v2655_v52 = vrot.slane %v2625_v32, %v5857_v7 }
 0x95f   : > { %v2668_v63 = vsel %vm1918_vm7, %v2655_v52, %v2667_v61  ;;  %v2474_v24 = vpop.permute.xlu1 %2473 }
 0x960   : > { %v2506_v54 = vrot.slane %v2474_v24, %v5857_v7  ;;  %v2773_v12 = vpop.permute.xlu0 %2772  ;;  %v2669_v28 = vsel %vm1920_vm8, %v2659_v62, %v2668_v63 }
 0x961   : > { %v2803_v19 = vrot.slane %v2773_v12, %v5857_v7  ;;  %v2670_v29 = vsel %vm1922_vm9, %v2663_v17, %v2669_v28 }
 0x962   : > { %v2519_v48 = vsel %vm1918_vm7, %v2506_v54, %v2518_v18  ;;  %v2672_v36 = vsel %vm2523_vm12, %v2670_v29, 0.0 }
 0x963   : > { %v2776_v26 = vpop.permute.xlu1 %2775  ;;  %2673 = vadd.xlane.f32.xlu0 %v2672_v36  ;;  %v2520_v3 = vsel %vm1920_vm8, %v2510_v60, %v2519_v48  ;;  %v2816_v37 = vsel %vm1918_vm7, %v2803_v19, %v2815_v50 }
 0x964   : > { %v2807_v21 = vrot.slane %v2776_v26, %v5857_v7  ;;  %v2779_v5 = vpop.permute.xlu0 %2778  ;;  %v2521_v51 = vsel %vm1922_vm9, %v2514_v25, %v2520_v3 }
 0x965   : > { %v2811_v6 = vrot.slane %v2779_v5, %v5857_v7  ;;  %v2524_v8 = vsel %vm2523_vm12, %v2521_v51, 0.0 }
 0x966   : > { %2525 = vadd.xlane.f32.xlu1 %v2524_v8  ;;  %v2817_v44 = vsel %vm1920_vm8, %v2807_v21, %v2816_v37 }
 0x967   : > { %v2818_v45 = vsel %vm1922_vm9, %v2811_v6, %v2817_v44 }
 0x968   : > { %v2820_v46 = vsel %vm2523_vm12, %v2818_v45, 0.0 }
 0x969   : > { %2821 = vadd.xlane.f32.xlu0 %v2820_v46 }
 0x96a   : > { %4840 = shalt.err (!%p4837_p5)
}
 0x96b   : > { %s4841_s22 = scalar_lea.hbm %s6262_s5, 128  ;;  %s4845_s14 = scalar_lea.hbm %s6530_s21, 256 }
 0x96c   : > { %p4842_p0 = scmp.ne.s32.totalorder %s6262_s5, %s4841_s22  ;;  %p4846_p2 = scmp.lt.u32.totalorder %s6262_s5, %s6530_s21 }
 0x96d   : > { %p4847_p10 = scmp.lt.u32.totalorder %s4845_s14, %s4841_s22  ;;  %p4849_p13 = scmp.lt.u32.totalorder %s4841_s22, %s6262_s5 }
 0x96e   : > { %p4843_p7 = pnand %p4842_p0, %p6531_p9 }
 0x96f   : > { %p4848_p1 = por %p4847_p10, %p4846_p2 }
 0x970   : > { %p4844_p12 = pneg %p4843_p7 }
 0x971   : > { %p4850_p3 = por %p4849_p13, %p4848_p1 }
 0x973   : > { %p4851_p6 = pnand %p4850_p3, %p4844_p12 }
 0x975   : > { %4854 = shalt.err (!%p4851_p6)
}
 0x976   : > { %3831 = dma.vmem_to_hbm [thread:$0]  (%p6531_p9), %s3137_s0, 128, %s6262_s5, %s3117_s13   ;;  %vm2841_vm14 = vcmask 1040384   ;;  %v2845_v53 = vld [vmem:[#allocation3] sm:$0x7]  ;;  %v4200_v0 = vld [vmem:[%s1031_s11] sm:$0x7] }
 0x977   : > { %s3658_s6 = sshll.u32 %s6528_s10, 6  ;;  %s1199_s12 = scalar_lea.vmem [#allocation42], %s5808_s19 }
 0x978   : > { %s3150_s3 = sshll.u32 %s1199_s12, 4  ;;  %s6532_s15 = sld [smem:[#allocation92_spill]]  ;;  %s6298_s3 = int_to_ptr.vmem [resolvable:$true] %s3150_s3 }
 0x979   : > { %s3122_s0 = scalar_lea.sflag [#allocation43], %s5790_s27  ;;  %s4855_s10 = scalar_lea.vmem %s6298_s3, 64 }
 0x97a   : > { %p4856_p11 = scmp.ne.s32.totalorder %s6298_s3, %s4855_s10  ;;  %s5016_s19 = smov [#allocation42]  }
 0x97b   : > { %s4859_s11 = sshll.u32 %s5016_s19, 4  ;;  %s4860_s11 = int_to_ptr.vmem [resolvable:$false] %s4859_s11 }
 0x97c   : > { %p4857_p8 = pnand %p4856_p11, %p6531_p9  ;;  %s4861_s13 = scalar_lea.vmem %s4860_s11, 128 }
 0x97d   : > { %p4862_p5 = scmp.lt.s32.totalorder %s6298_s3, %s4860_s11  ;;  %p4863_p0 = scmp.lt.s32.totalorder %s4861_s13, %s4855_s10 }
 0x97e   : > { %s6296_s5 = scalar_lea.hbm %s6532_s15, %s3658_s6  ;;  %p4858_p4 = pneg %p4857_p8 }
 0x97f   : > { %p4864_p7 = por %p4863_p0, %p4862_p5 }
 0x981   : > { %p4865_p12 = pnand %p4864_p7, %p4858_p4 }
 0x9f0   : > { %v2674_v20 = vpop.xlane.xlu0 %2673 }
 0x9f1   : > { %v2833_v55 = vrot.slane %v2674_v20, %v5857_v7 }
 0x9f3   : > { %v2526_v47 = vpop.xlane.xlu1 %2525 }
 0x9f4   : > { %v2827_v43 = vrot.slane %v2526_v47, %v5857_v7 }
 0x9f6   : > { %v2822_v56 = vpop.xlane.xlu0 %2821  ;;  %v2842_v39 = vsel %vm2841_vm14, %v2827_v43, %v2833_v55 }
 0x9f7   : > { %v2839_v33 = vrot.slane %v2822_v56, %v5857_v7 }
 0x9f9   : > { %v2844_v58 = vsel %vm2843_vm10, %v2842_v39, %v2839_v33 }
 0x9fa   : > { %v2846_v40 = vadd.f32 %v2845_v53, %v2844_v58 }
 0x9fc   : > { %2848 = vst.msk [vmem:[#allocation3] sm:$0x7] %vm1213_vm13, %v2846_v40 }
 0xa03   : > { %v2852_v59 = vld [vmem:[#allocation3] sm:$0x7] }
 0xa04   : > { %v2853_v1 = vadd.f32 %v4200_v0, %v2852_v59 }
 0xa06   : > { %2854 = vst.msk [vmem:[%s1199_s12] sm:$0x7] %vm1213_vm13, %v2853_v1 }
 0xa07   : > { %4868 = shalt.err (!%p4865_p12)
}
 0xa08   : > { %s4869_s27 = scalar_lea.hbm %s6296_s5, 64  ;;  %s4873_s4 = scalar_lea.hbm %s6532_s15, 128 }
 0xa09   : > { %p4870_p2 = scmp.ne.s32.totalorder %s6296_s5, %s4869_s27  ;;  %p4874_p13 = scmp.lt.u32.totalorder %s6296_s5, %s6532_s15 }
 0xa0a   : > { %p4875_p3 = scmp.lt.u32.totalorder %s4873_s4, %s4869_s27  ;;  %p4877_p11 = scmp.lt.u32.totalorder %s4869_s27, %s6296_s5 }
 0xa0b   : > { %p4871_p10 = pnand %p4870_p2, %p6531_p9 }
 0xa0c   : > { %p4876_p6 = por %p4875_p3, %p4874_p13 }
 0xa0d   : > { %p4872_p1 = pneg %p4871_p10 }
 0xa0e   : > { %p4878_p8 = por %p4877_p11, %p4876_p6 }
 0xa10   : > { %p4879_p4 = pnand %p4878_p8, %p4872_p1 }
 0xa12   : > { %4882 = shalt.err (!%p4879_p4)
}
 0xa13   : > { %3832 = dma.vmem_to_hbm [thread:$0]  (%p6531_p9), %s6298_s3, 64, %s6296_s5, %s3122_s0  }
 0xa14 PF: > { %s6533_s26 = sld [smem:[#allocation58_spill]]  ;;  %s6534_s18 = sld [smem:[#allocation68_spill]] }
 0xa15   : > { %s6535_s14 = sld [smem:[#allocation62_spill]] }
 0xa1a   : > { %s3162_s28 = sand.u32 1, %s6533_s26   ;;  %p6536_p5 = scmp.ne.s32.totalorder %s6534_s18, 0 }
 0xa1b   : > { %p6537_p0 = scmp.ge.s32.totalorder %s6535_s14, 2  ;;  %s3163_s24 = scalar_lea.sflag [#allocation8], %s3162_s28 }
 0xa1d   : > { %p3904_p7 = pnand %p6537_p0, %p6536_p5 }
 0xa1f   : > { %4956 = dma.done.wait (!%p3904_p7), %s3163_s24, 128  }
 0xa20   : > { %4958 = vsyncadd (!%p3904_p7), %s3163_s24, 4294967168  ;;  %s3172_s6 = scalar_lea.sflag [#allocation43], %s3162_s28 }
 0xa21   : > { %4960 = dma.done.wait (!%p3904_p7), %s3172_s6, 64  }
 0xa22   : > { %4962 = vsyncadd (!%p3904_p7), %s3172_s6, 4294967232  ;;  %s64_s1 = sadd.s32 1, %s6535_s14   ;;  %s6538_s8 = sld [smem:[#allocation59_spill]] }
 0xa23   : > { %p61_p12 = scmp.ge.s32.totalorder %s64_s1, 4   ;;  %s6539_s7 = sld [smem:[#allocation67_spill]] }
 0xa24   : > { %s6540_s3 = sld [smem:[#allocation61_spill]]  ;;  %s6541_s26 = sld [smem:[#allocation65_spill]] }
 0xa25   : > { %s6542_s10 = smov %s4969_s16  ;;  %63 = sbr.rel (!%p61_p12) target bundleno = 46 (0x2e), region = 302 }
 0xa28   : > { %s6543_s16 = smov %s6538_s8 }
 0xa2c   :  { %3177 = vsyncpa [#allocation7], 1 }
 0xa2d   :  { %3179 = vsyncpa [#allocation7 + $0x1], 1 }
 0xa2e   :  { %3180 = vsyncpa [#allocation10], 1 }
 0xa2f   :  { %3182 = vsyncpa [#allocation10 + $0x1], 1 }
 0xa30   :  { %3183 = vsyncpa [#allocation13], 1 }
 0xa31   :  { %3185 = vsyncpa [#allocation13 + $0x1], 1 }
 0xa32   :  { %3186 = vsyncpa [#allocation16], 1 }
 0xa33   :  { %3187 = vsyncpa [#allocation19], 1 }
 0xa34   :  { %3188 = vsyncpa [#allocation22], 1 }
 0xa35   :  { %3189 = vsyncpa [#allocation25], 1 }
 0xa36   :  { %3190 = vsyncpa [#allocation28], 1 }
 0xa37   :  { %3191 = vsyncpa [#allocation31], 1 }
 0xa38   :  { %3192 = vsyncpa [#allocation34], 1 }
 0xa39   :  { %3193 = vsyncpa [#allocation37], 1 }
 0xa3a   :  { %3194 = vsyncpa [#allocation40], 1 }
 0xa3b   :  { %3195 = vsyncpa [#allocation8], 1 }
 0xa3c   :  { %3197 = vsyncpa [#allocation8 + $0x1], 1 }
 0xa3d   :  { %3198 = vsyncpa [#allocation43], 1 }
 0xa3e   :  { %3200 = vsyncpa [#allocation43 + $0x1], 1 }

</bundles_post_ra>
